<compile_context>
chip_gen: v7x
topology: tpu7x:2x2x1
jax: 0.10.0
libtpu: 0.0.40
codegen_flags: <defaults>
</compile_context>

<pallas_src>
from functools import partial

import jax
import jax.numpy as jnp
from jax.experimental import pallas as pl
from jax.experimental.pallas import tpu as pltpu


def to_order(degree: int) -> int:
    return 2 * degree + 1


def _round_up(x: int, m: int) -> int:
    return ((x + m - 1) // m) * m


# ---------------------------------------------------------------------------
# Pallas kernel: radial MLP + the two per-edge contractions (the hot path).
# ---------------------------------------------------------------------------
def _pairwise_conv_kernel(edges_ref, feats_ref, basis_ref,
                          w1_ref, w2_ref, w3_ref, vec_ref, out_ref,
                          *, nc_in, d_in, num_freq, d_out, nc_out):
    eps = 1e-5
    f32 = jnp.float32
    mid = w1_ref.shape[0]
    fd = num_freq * d_out

    # packed per-feature vectors: [b1, g1, be1, b2, g2, be2], each (mid, 1)
    vec = vec_ref[...]
    b1, g1, be1 = vec[0 * mid:1 * mid], vec[1 * mid:2 * mid], vec[2 * mid:3 * mid]
    b2, g2, be2 = vec[3 * mid:4 * mid], vec[4 * mid:5 * mid], vec[5 * mid:6 * mid]

    def layernorm(h, g, b):
        # feature dim is axis 0 (sublanes) in edge-minor layout
        mu = jnp.mean(h, axis=0, keepdims=True)
        var = jnp.mean((h - mu) ** 2, axis=0, keepdims=True)
        return (h - mu) * jax.lax.rsqrt(var + eps) * g + b

    # ---- radial function MLP: Linear -> LN -> GELU (x2) ----
    x = edges_ref[...].astype(f32)                                        # (edge_dim, TE)
    h = jnp.dot(w1_ref[...], x, preferred_element_type=f32) + b1
    # TODO(synk): PyTorch nn.GELU default is exact erf; tanh approximation used here.
    h = jax.nn.gelu(layernorm(h, g1, be1), approximate=True)
    h = jnp.dot(w2_ref[...], h, preferred_element_type=f32) + b2
    h = jax.nn.gelu(layernorm(h, g2, be2), approximate=True)              # (mid, TE)

    feats = feats_ref[...].astype(f32)        # (nc_in*d_in, TE)   f32 math (v5e-safe)
    basis = basis_ref[...].astype(f32)        # (d_in*F*d_out, TE)

    # ---- per-edge contractions, input-channel (i) outermost ----
    # out[o*d_out + d, e] = sum_{i,f} rad_i[o*F + f, e] * tmp_i[f*d_out + d, e]
    acc = [None] * nc_out                     # per-output-channel (d_out, TE)
    for i in range(nc_in):
        # tmp_i[f*d_out + d, e] = sum_m feats[i*d_in + m, e] * basis[m*fd + f*d_out + d, e]
        tmp = feats[i * d_in:i * d_in + 1, :] * basis[0:fd, :]
        for m in range(1, d_in):
            r = i * d_in + m
            tmp = tmp + feats[r:r + 1, :] * basis[m * fd:(m + 1) * fd, :]
        # radial rows for this input channel only (i-major w3): (nc_out*F, TE)
        rad = jnp.dot(w3_ref[i], h, preferred_element_type=f32)
        for o in range(nc_out):
            for f in range(num_freq):
                rr = o * num_freq + f
                term = rad[rr:rr + 1, :] * tmp[f * d_out:(f + 1) * d_out, :]
                acc[o] = term if acc[o] is None else acc[o] + term

    # epilogue: contiguous (nc_out*d_out, TE) output slab
    for o in range(nc_out):
        out_ref[o * d_out:(o + 1) * d_out, :] = acc[o].astype(out_ref.dtype)


# ---------------------------------------------------------------------------
# Wrapper (layout glue + pallas_call)
# ---------------------------------------------------------------------------
def pairwise_conv(edges, feats, basis, params, *, degree_in, degree_out,
                  nc_in, nc_out, max_te=1024, input_dtype=jnp.float32):
    d_in = to_order(degree_in)
    d_out = to_order(degree_out)
    num_freq = to_order(min(degree_in, degree_out))
    B, N, M = feats.shape[:3]
    E = B * N * M
    edge_dim = edges.shape[-1]
    mid = params['w1'].shape[0]
    OF = nc_out * num_freq

    # ---- lane-tile choice: large tiles amortize per-step overhead, but keep
    # at least 2 grid tiles so both v7x TensorCores get work on small E.
    e128 = _round_up(E, 128)
    te = min(max_te, e128)
    if e128 >= 256:
        te = min(te, _round_up(e128 // 2, 128))
    te = max(te, 128)
    e_pad = _round_up(E, te)
    grid = e_pad // te

    # ---- layout glue: flatten to edge-minor 2-D slabs ----
    # TODO(synk): ideally produce/consume these slabs upstream to avoid the HBM transposes.
    e2 = edges.reshape(E, edge_dim).T.astype(input_dtype)                     # (edge_dim, E)
    f2 = feats.reshape(E, nc_in * d_in).T.astype(input_dtype)                 # (nc_in*d_in, E)
    b2 = basis.reshape(E, d_in * num_freq * d_out).T.astype(input_dtype)      # (d_in*F*d_out, E)

    pad = e_pad - E
    if pad:
        # TODO(synk): handle the ragged E tail in-kernel (masked store) to drop this copy.
        e2 = jnp.pad(e2, ((0, 0), (0, pad)))
        f2 = jnp.pad(f2, ((0, 0), (0, pad)))
        b2 = jnp.pad(b2, ((0, 0), (0, pad)))

    # i-major reordering of the final radial Linear: row o*I*F + i*F + f
    # -> block i, row o*F + f (so each input channel's rows are contiguous).
    w3i = params['w3'].reshape(nc_out, nc_in, num_freq, mid) \
                      .transpose(1, 0, 2, 3).reshape(nc_in, OF, mid).astype(jnp.float32)
    # pack the six per-feature vectors into one (6*mid, 1) constant-index ref
    vecs = jnp.concatenate([params['b1'], params['g1'], params['be1'],
                            params['b2'], params['g2'], params['be2']]) \
              .reshape(6 * mid, 1).astype(jnp.float32)

    const = lambda shape: pl.BlockSpec(shape, lambda e, _s=len(shape): (0,) * _s)
    in_specs = [
        pl.BlockSpec((edge_dim, te), lambda e: (0, e)),
        pl.BlockSpec((nc_in * d_in, te), lambda e: (0, e)),
        pl.BlockSpec((d_in * num_freq * d_out, te), lambda e: (0, e)),
        const((mid, edge_dim)),
        const((mid, mid)),
        const((nc_in, OF, mid)),
        const((6 * mid, 1)),
    ]
    out_spec = pl.BlockSpec((nc_out * d_out, te), lambda e: (0, e))

    kernel = partial(_pairwise_conv_kernel, nc_in=nc_in, d_in=d_in,
                     num_freq=num_freq, d_out=d_out, nc_out=nc_out)

    out = pl.pallas_call(
        kernel,
        out_shape=jax.ShapeDtypeStruct((nc_out * d_out, e_pad), jnp.float32),
        grid=(grid,),
        in_specs=in_specs,
        out_specs=out_spec,
        compiler_params=pltpu.CompilerParams(dimension_semantics=("parallel",)),
    )(e2, f2, b2,
      params['w1'].astype(jnp.float32), params['w2'].astype(jnp.float32),
      w3i, vecs)

    out = out[:, :E].T                                  # (E, nc_out*d_out)
    return out.reshape(B, N, M, nc_out, d_out)


# ---------------------------------------------------------------------------
# Deterministic parameter init (matches the RadialFunc module shapes)
# ---------------------------------------------------------------------------
def init_params(key, edge_dim, mid, num_freq, nc_in, nc_out):
    def linear(k, fan_in, fan_out, bias=True):
        lim = 1.0 / float(fan_in) ** 0.5
        kw, kb = jax.random.split(k)
        w = jax.random.uniform(kw, (fan_out, fan_in), jnp.float32, -lim, lim)
        b = jax.random.uniform(kb, (fan_out,), jnp.float32, -lim, lim) if bias else None
        return w, b

    k1, k2, k3 = jax.random.split(key, 3)
    w1, b1 = linear(k1, edge_dim, mid)
    w2, b2 = linear(k2, mid, mid)
    w3, _ = linear(k3, mid, num_freq * nc_in * nc_out, bias=False)  # bias = (dropout > 0) = False
    ones, zeros = jnp.ones((mid,), jnp.float32), jnp.zeros((mid,), jnp.float32)
    return dict(w1=w1, b1=b1, g1=ones, be1=zeros,
                w2=w2, b2=b2, g2=ones, be2=zeros, w3=w3)


# ---------------------------------------------------------------------------
# Plain-JAX reference mirroring the torch forward (for a sanity check)
# ---------------------------------------------------------------------------
def reference(edges, feats, basis, params, *, degree_in, degree_out, nc_in, nc_out):
    d_in, d_out = to_order(degree_in), to_order(degree_out)
    num_freq = to_order(min(degree_in, degree_out))
    B, N, M = feats.shape[:3]
    E = B * N * M
    hi = jax.lax.Precision.HIGHEST
    eps = 1e-5

    def ln(h, g, b):
        mu = h.mean(-1, keepdims=True)
        var = ((h - mu) ** 2).mean(-1, keepdims=True)
        return (h - mu) / jnp.sqrt(var + eps) * g + b

    x = edges.reshape(E, -1)
    h = jnp.dot(x, params['w1'].T, precision=hi) + params['b1']
    h = jax.nn.gelu(ln(h, params['g1'], params['be1']), approximate=True)
    h = jnp.dot(h, params['w2'].T, precision=hi) + params['b2']
    h = jax.nn.gelu(ln(h, params['g2'], params['be2']), approximate=True)
    rw = jnp.dot(h, params['w3'].T, precision=hi).reshape(E, nc_out, nc_in * num_freq)

    f = feats.reshape(E, nc_in, d_in)
    b = basis.reshape(E, d_in, num_freq * d_out)
    tmp = jnp.einsum('eid,edx->eix', f, b, precision=hi).reshape(E, nc_in * num_freq, d_out)
    out = jnp.einsum('eok,ekd->eod', rw, tmp, precision=hi)
    return out.reshape(B, N, M, nc_out, d_out)


if __name__ == "__main__":
    degree_in, degree_out = 1, 1
    nc_in, nc_out = 4, 4
    edge_dim = 8
    radial_mult = 2.0
    mid = int(edge_dim * radial_mult)
    d_in, d_out = to_order(degree_in), to_order(degree_out)
    num_freq = to_order(min(degree_in, degree_out))

    B, N, M = 2, 16, 32            # E = 1024 edges  ->  2 lane-tiles of 512
    key = jax.random.PRNGKey(0)
    k1, k2, k3, kp = jax.random.split(key, 4)
    edges = jax.random.normal(k1, (B, N, M, edge_dim), jnp.float32)
    feats = jax.random.normal(k2, (B, N, M, nc_in, d_in), jnp.float32)
    basis = jax.random.normal(k3, (B, N, M, d_in, num_freq * d_out), jnp.float32)
    params = init_params(kp, edge_dim, mid, num_freq, nc_in, nc_out)

    ref = reference(edges, feats, basis, params,
                    degree_in=degree_in, degree_out=degree_out,
                    nc_in=nc_in, nc_out=nc_out)
    ref = jax.block_until_ready(ref)
    scale = float(jnp.max(jnp.abs(ref))) + 1e-6

    # f32 input path (default): tight check
    out = pairwise_conv(edges, feats, basis, params,
                        degree_in=degree_in, degree_out=degree_out,
                        nc_in=nc_in, nc_out=nc_out,
                        max_te=1024, input_dtype=jnp.float32)
    out = jax.block_until_ready(out)
    assert out.shape == (B, N, M, nc_out, d_out), out.shape
    err = float(jnp.max(jnp.abs(out - ref)))
    assert err < 1e-2, f"f32 max abs err {err}"

    # bf16 input path (halves HBM traffic for the edge-sized operands): looser check
    out_bf16 = pairwise_conv(edges, feats, basis, params,
                             degree_in=degree_in, degree_out=degree_out,
                             nc_in=nc_in, nc_out=nc_out,
                             max_te=1024, input_dtype=jnp.bfloat16)
    out_bf16 = jax.block_until_ready(out_bf16)
    err_bf = float(jnp.max(jnp.abs(out_bf16 - ref)))
    assert err_bf < 1e-1 * scale, f"bf16 max abs err {err_bf} (scale {scale})"

    print("KERNEL_OK")
</pallas_src>

<mosaic_0001>
module attributes {stable_mosaic.version = 11 : i64} {
  func.func @_pairwise_conv_kernel(%arg0: i32, %arg1: memref<8x512xf32, #tpu.memory_space<vmem>>, %arg2: memref<12x512xf32, #tpu.memory_space<vmem>>, %arg3: memref<27x512xf32, #tpu.memory_space<vmem>>, %arg4: memref<16x8xf32, #tpu.memory_space<vmem>>, %arg5: memref<16x16xf32, #tpu.memory_space<vmem>>, %arg6: memref<4x12x16xf32, #tpu.memory_space<vmem>>, %arg7: memref<96x1xf32, #tpu.memory_space<vmem>>, %arg8: memref<12x512xf32, #tpu.memory_space<vmem>>) attributes {dimension_semantics = [#tpu.dimension_semantics<parallel>], iteration_bounds = array<i64: 2>, scalar_prefetch = 0 : i64, scratch_operands = 0 : i64, tpu.core_type = #tpu.core_type<tc>, window_params = [{transform_indices = @transform_0, window_bounds = array<i64: 8, 512>}, {transform_indices = @transform_1, window_bounds = array<i64: 12, 512>}, {transform_indices = @transform_2, window_bounds = array<i64: 27, 512>}, {pipeline_mode = #tpu.pipeline_mode<synchronous>, transform_indices = @transform_3, window_bounds = array<i64: 16, 8>}, {pipeline_mode = #tpu.pipeline_mode<synchronous>, transform_indices = @transform_4, window_bounds = array<i64: 16, 16>}, {pipeline_mode = #tpu.pipeline_mode<synchronous>, transform_indices = @transform_5, window_bounds = array<i64: 4, 12, 16>}, {pipeline_mode = #tpu.pipeline_mode<synchronous>, transform_indices = @transform_6, window_bounds = array<i64: 96, 1>}, {transform_indices = @transform_7, window_bounds = array<i64: 12, 512>}]} {
    %c0 = arith.constant 0 : index
    %c0_0 = arith.constant 0 : index
    %0 = vector.load %arg7[%c0, %c0_0] : memref<96x1xf32, #tpu.memory_space<vmem>>, vector<96x1xf32>
    %1 = vector.extract_strided_slice %0 {offsets = [0, 0], sizes = [16, 1], strides = [1, 1]} : vector<96x1xf32> to vector<16x1xf32>
    %2 = vector.extract_strided_slice %0 {offsets = [16, 0], sizes = [16, 1], strides = [1, 1]} : vector<96x1xf32> to vector<16x1xf32>
    %3 = vector.extract_strided_slice %0 {offsets = [32, 0], sizes = [16, 1], strides = [1, 1]} : vector<96x1xf32> to vector<16x1xf32>
    %4 = vector.extract_strided_slice %0 {offsets = [48, 0], sizes = [16, 1], strides = [1, 1]} : vector<96x1xf32> to vector<16x1xf32>
    %5 = vector.extract_strided_slice %0 {offsets = [64, 0], sizes = [16, 1], strides = [1, 1]} : vector<96x1xf32> to vector<16x1xf32>
    %6 = vector.extract_strided_slice %0 {offsets = [80, 0], sizes = [16, 1], strides = [1, 1]} : vector<96x1xf32> to vector<16x1xf32>
    %c0_1 = arith.constant 0 : index
    %c0_2 = arith.constant 0 : index
    %7 = vector.load %arg1[%c0_1, %c0_2] : memref<8x512xf32, #tpu.memory_space<vmem>>, vector<8x512xf32>
    %c0_3 = arith.constant 0 : index
    %c0_4 = arith.constant 0 : index
    %8 = vector.load %arg4[%c0_3, %c0_4] : memref<16x8xf32, #tpu.memory_space<vmem>>, vector<16x8xf32>
    %cst = arith.constant dense<0.000000e+00> : vector<16x512xf32>
    %9 = tpu.matmul %8, %7, %cst {dimension_numbers = #tpu.dot_dimension_numbers<[1], [0], [0], [1], [0, 0, 1, 1], [], []>} : vector<16x8xf32>, vector<8x512xf32>, vector<16x512xf32> -> vector<16x512xf32>
    %10 = vector.broadcast %1 : vector<16x1xf32> to vector<16x512xf32>
    %11 = arith.addf %9, %10 : vector<16x512xf32>
    %cst_5 = arith.constant dense<0.000000e+00> : vector<512xf32>
    %12 = vector.multi_reduction <add>, %11, %cst_5 [0] : vector<16x512xf32> to vector<512xf32>
    %13 = vector.shape_cast %12 : vector<512xf32> to vector<1x512xf32>
    %cst_6 = arith.constant 1.600000e+01 : f32
    %14 = vector.broadcast %cst_6 : f32 to vector<1x512xf32>
    %15 = arith.divf %13, %14 : vector<1x512xf32>
    %16 = vector.broadcast %15 : vector<1x512xf32> to vector<16x512xf32>
    %17 = arith.subf %11, %16 : vector<16x512xf32>
    %18 = arith.mulf %17, %17 : vector<16x512xf32>
    %cst_7 = arith.constant dense<0.000000e+00> : vector<512xf32>
    %19 = vector.multi_reduction <add>, %18, %cst_7 [0] : vector<16x512xf32> to vector<512xf32>
    %20 = vector.shape_cast %19 : vector<512xf32> to vector<1x512xf32>
    %cst_8 = arith.constant 1.600000e+01 : f32
    %21 = vector.broadcast %cst_8 : f32 to vector<1x512xf32>
    %22 = arith.divf %20, %21 : vector<1x512xf32>
    %23 = vector.broadcast %15 : vector<1x512xf32> to vector<16x512xf32>
    %24 = arith.subf %11, %23 : vector<16x512xf32>
    %cst_9 = arith.constant 9.99999974E-6 : f32
    %25 = vector.broadcast %cst_9 : f32 to vector<1x512xf32>
    %26 = arith.addf %22, %25 : vector<1x512xf32>
    %27 = math.rsqrt %26 : vector<1x512xf32>
    %28 = vector.broadcast %27 : vector<1x512xf32> to vector<16x512xf32>
    %29 = arith.mulf %24, %28 : vector<16x512xf32>
    %30 = vector.broadcast %2 : vector<16x1xf32> to vector<16x512xf32>
    %31 = arith.mulf %29, %30 : vector<16x512xf32>
    %32 = vector.broadcast %3 : vector<16x1xf32> to vector<16x512xf32>
    %33 = arith.addf %31, %32 : vector<16x512xf32>
    %34 = arith.mulf %33, %33 : vector<16x512xf32>
    %35 = arith.mulf %33, %34 : vector<16x512xf32>
    %cst_10 = arith.constant 4.471500e-02 : f32
    %36 = vector.broadcast %cst_10 : f32 to vector<16x512xf32>
    %37 = arith.mulf %36, %35 : vector<16x512xf32>
    %38 = arith.addf %33, %37 : vector<16x512xf32>
    %cst_11 = arith.constant 0.797884583 : f32
    %39 = vector.broadcast %cst_11 : f32 to vector<16x512xf32>
    %40 = arith.mulf %39, %38 : vector<16x512xf32>
    %41 = math.tanh %40 : vector<16x512xf32>
    %cst_12 = arith.constant 1.000000e+00 : f32
    %42 = vector.broadcast %cst_12 : f32 to vector<16x512xf32>
    %43 = arith.addf %42, %41 : vector<16x512xf32>
    %cst_13 = arith.constant 5.000000e-01 : f32
    %44 = vector.broadcast %cst_13 : f32 to vector<16x512xf32>
    %45 = arith.mulf %44, %43 : vector<16x512xf32>
    %46 = arith.mulf %33, %45 : vector<16x512xf32>
    %c0_14 = arith.constant 0 : index
    %c0_15 = arith.constant 0 : index
    %47 = vector.load %arg5[%c0_14, %c0_15] : memref<16x16xf32, #tpu.memory_space<vmem>>, vector<16x16xf32>
    %cst_16 = arith.constant dense<0.000000e+00> : vector<16x512xf32>
    %48 = tpu.matmul %47, %46, %cst_16 {dimension_numbers = #tpu.dot_dimension_numbers<[1], [0], [0], [1], [0, 0, 1, 1], [], []>} : vector<16x16xf32>, vector<16x512xf32>, vector<16x512xf32> -> vector<16x512xf32>
    %49 = vector.broadcast %4 : vector<16x1xf32> to vector<16x512xf32>
    %50 = arith.addf %48, %49 : vector<16x512xf32>
    %cst_17 = arith.constant dense<0.000000e+00> : vector<512xf32>
    %51 = vector.multi_reduction <add>, %50, %cst_17 [0] : vector<16x512xf32> to vector<512xf32>
    %52 = vector.shape_cast %51 : vector<512xf32> to vector<1x512xf32>
    %cst_18 = arith.constant 1.600000e+01 : f32
    %53 = vector.broadcast %cst_18 : f32 to vector<1x512xf32>
    %54 = arith.divf %52, %53 : vector<1x512xf32>
    %55 = vector.broadcast %54 : vector<1x512xf32> to vector<16x512xf32>
    %56 = arith.subf %50, %55 : vector<16x512xf32>
    %57 = arith.mulf %56, %56 : vector<16x512xf32>
    %cst_19 = arith.constant dense<0.000000e+00> : vector<512xf32>
    %58 = vector.multi_reduction <add>, %57, %cst_19 [0] : vector<16x512xf32> to vector<512xf32>
    %59 = vector.shape_cast %58 : vector<512xf32> to vector<1x512xf32>
    %cst_20 = arith.constant 1.600000e+01 : f32
    %60 = vector.broadcast %cst_20 : f32 to vector<1x512xf32>
    %61 = arith.divf %59, %60 : vector<1x512xf32>
    %62 = vector.broadcast %54 : vector<1x512xf32> to vector<16x512xf32>
    %63 = arith.subf %50, %62 : vector<16x512xf32>
    %cst_21 = arith.constant 9.99999974E-6 : f32
    %64 = vector.broadcast %cst_21 : f32 to vector<1x512xf32>
    %65 = arith.addf %61, %64 : vector<1x512xf32>
    %66 = math.rsqrt %65 : vector<1x512xf32>
    %67 = vector.broadcast %66 : vector<1x512xf32> to vector<16x512xf32>
    %68 = arith.mulf %63, %67 : vector<16x512xf32>
    %69 = vector.broadcast %5 : vector<16x1xf32> to vector<16x512xf32>
    %70 = arith.mulf %68, %69 : vector<16x512xf32>
    %71 = vector.broadcast %6 : vector<16x1xf32> to vector<16x512xf32>
    %72 = arith.addf %70, %71 : vector<16x512xf32>
    %73 = arith.mulf %72, %72 : vector<16x512xf32>
    %74 = arith.mulf %72, %73 : vector<16x512xf32>
    %cst_22 = arith.constant 4.471500e-02 : f32
    %75 = vector.broadcast %cst_22 : f32 to vector<16x512xf32>
    %76 = arith.mulf %75, %74 : vector<16x512xf32>
    %77 = arith.addf %72, %76 : vector<16x512xf32>
    %cst_23 = arith.constant 0.797884583 : f32
    %78 = vector.broadcast %cst_23 : f32 to vector<16x512xf32>
    %79 = arith.mulf %78, %77 : vector<16x512xf32>
    %80 = math.tanh %79 : vector<16x512xf32>
    %cst_24 = arith.constant 1.000000e+00 : f32
    %81 = vector.broadcast %cst_24 : f32 to vector<16x512xf32>
    %82 = arith.addf %81, %80 : vector<16x512xf32>
    %cst_25 = arith.constant 5.000000e-01 : f32
    %83 = vector.broadcast %cst_25 : f32 to vector<16x512xf32>
    %84 = arith.mulf %83, %82 : vector<16x512xf32>
    %85 = arith.mulf %72, %84 : vector<16x512xf32>
    %c0_26 = arith.constant 0 : index
    %c0_27 = arith.constant 0 : index
    %86 = vector.load %arg2[%c0_26, %c0_27] : memref<12x512xf32, #tpu.memory_space<vmem>>, vector<12x512xf32>
    %c0_28 = arith.constant 0 : index
    %c0_29 = arith.constant 0 : index
    %87 = vector.load %arg3[%c0_28, %c0_29] : memref<27x512xf32, #tpu.memory_space<vmem>>, vector<27x512xf32>
    %88 = vector.extract_strided_slice %86 {offsets = [0, 0], sizes = [1, 512], strides = [1, 1]} : vector<12x512xf32> to vector<1x512xf32>
    %89 = vector.extract_strided_slice %87 {offsets = [0, 0], sizes = [9, 512], strides = [1, 1]} : vector<27x512xf32> to vector<9x512xf32>
    %90 = vector.broadcast %88 : vector<1x512xf32> to vector<9x512xf32>
    %91 = arith.mulf %90, %89 : vector<9x512xf32>
    %92 = vector.extract_strided_slice %86 {offsets = [1, 0], sizes = [1, 512], strides = [1, 1]} : vector<12x512xf32> to vector<1x512xf32>
    %93 = vector.extract_strided_slice %87 {offsets = [9, 0], sizes = [9, 512], strides = [1, 1]} : vector<27x512xf32> to vector<9x512xf32>
    %94 = vector.broadcast %92 : vector<1x512xf32> to vector<9x512xf32>
    %95 = arith.mulf %94, %93 : vector<9x512xf32>
    %96 = arith.addf %91, %95 : vector<9x512xf32>
    %97 = vector.extract_strided_slice %86 {offsets = [2, 0], sizes = [1, 512], strides = [1, 1]} : vector<12x512xf32> to vector<1x512xf32>
    %98 = vector.extract_strided_slice %87 {offsets = [18, 0], sizes = [9, 512], strides = [1, 1]} : vector<27x512xf32> to vector<9x512xf32>
    %99 = vector.broadcast %97 : vector<1x512xf32> to vector<9x512xf32>
    %100 = arith.mulf %99, %98 : vector<9x512xf32>
    %101 = arith.addf %96, %100 : vector<9x512xf32>
    %c0_30 = arith.constant 0 : index
    %c0_31 = arith.constant 0 : index
    %c0_32 = arith.constant 0 : index
    %102 = vector.load %arg6[%c0_30, %c0_31, %c0_32] : memref<4x12x16xf32, #tpu.memory_space<vmem>>, vector<1x12x16xf32>
    %103 = vector.shape_cast %102 : vector<1x12x16xf32> to vector<12x16xf32>
    %cst_33 = arith.constant dense<0.000000e+00> : vector<12x512xf32>
    %104 = tpu.matmul %103, %85, %cst_33 {dimension_numbers = #tpu.dot_dimension_numbers<[1], [0], [0], [1], [0, 0, 1, 1], [], []>} : vector<12x16xf32>, vector<16x512xf32>, vector<12x512xf32> -> vector<12x512xf32>
    %105 = vector.extract_strided_slice %104 {offsets = [0, 0], sizes = [1, 512], strides = [1, 1]} : vector<12x512xf32> to vector<1x512xf32>
    %106 = vector.extract_strided_slice %101 {offsets = [0, 0], sizes = [3, 512], strides = [1, 1]} : vector<9x512xf32> to vector<3x512xf32>
    %107 = vector.broadcast %105 : vector<1x512xf32> to vector<3x512xf32>
    %108 = arith.mulf %107, %106 : vector<3x512xf32>
    %109 = vector.extract_strided_slice %104 {offsets = [1, 0], sizes = [1, 512], strides = [1, 1]} : vector<12x512xf32> to vector<1x512xf32>
    %110 = vector.extract_strided_slice %101 {offsets = [3, 0], sizes = [3, 512], strides = [1, 1]} : vector<9x512xf32> to vector<3x512xf32>
    %111 = vector.broadcast %109 : vector<1x512xf32> to vector<3x512xf32>
    %112 = arith.mulf %111, %110 : vector<3x512xf32>
    %113 = arith.addf %108, %112 : vector<3x512xf32>
    %114 = vector.extract_strided_slice %104 {offsets = [2, 0], sizes = [1, 512], strides = [1, 1]} : vector<12x512xf32> to vector<1x512xf32>
    %115 = vector.extract_strided_slice %101 {offsets = [6, 0], sizes = [3, 512], strides = [1, 1]} : vector<9x512xf32> to vector<3x512xf32>
    %116 = vector.broadcast %114 : vector<1x512xf32> to vector<3x512xf32>
    %117 = arith.mulf %116, %115 : vector<3x512xf32>
    %118 = arith.addf %113, %117 : vector<3x512xf32>
    %119 = vector.extract_strided_slice %104 {offsets = [3, 0], sizes = [1, 512], strides = [1, 1]} : vector<12x512xf32> to vector<1x512xf32>
    %120 = vector.extract_strided_slice %101 {offsets = [0, 0], sizes = [3, 512], strides = [1, 1]} : vector<9x512xf32> to vector<3x512xf32>
    %121 = vector.broadcast %119 : vector<1x512xf32> to vector<3x512xf32>
    %122 = arith.mulf %121, %120 : vector<3x512xf32>
    %123 = vector.extract_strided_slice %104 {offsets = [4, 0], sizes = [1, 512], strides = [1, 1]} : vector<12x512xf32> to vector<1x512xf32>
    %124 = vector.extract_strided_slice %101 {offsets = [3, 0], sizes = [3, 512], strides = [1, 1]} : vector<9x512xf32> to vector<3x512xf32>
    %125 = vector.broadcast %123 : vector<1x512xf32> to vector<3x512xf32>
    %126 = arith.mulf %125, %124 : vector<3x512xf32>
    %127 = arith.addf %122, %126 : vector<3x512xf32>
    %128 = vector.extract_strided_slice %104 {offsets = [5, 0], sizes = [1, 512], strides = [1, 1]} : vector<12x512xf32> to vector<1x512xf32>
    %129 = vector.extract_strided_slice %101 {offsets = [6, 0], sizes = [3, 512], strides = [1, 1]} : vector<9x512xf32> to vector<3x512xf32>
    %130 = vector.broadcast %128 : vector<1x512xf32> to vector<3x512xf32>
    %131 = arith.mulf %130, %129 : vector<3x512xf32>
    %132 = arith.addf %127, %131 : vector<3x512xf32>
    %133 = vector.extract_strided_slice %104 {offsets = [6, 0], sizes = [1, 512], strides = [1, 1]} : vector<12x512xf32> to vector<1x512xf32>
    %134 = vector.extract_strided_slice %101 {offsets = [0, 0], sizes = [3, 512], strides = [1, 1]} : vector<9x512xf32> to vector<3x512xf32>
    %135 = vector.broadcast %133 : vector<1x512xf32> to vector<3x512xf32>
    %136 = arith.mulf %135, %134 : vector<3x512xf32>
    %137 = vector.extract_strided_slice %104 {offsets = [7, 0], sizes = [1, 512], strides = [1, 1]} : vector<12x512xf32> to vector<1x512xf32>
    %138 = vector.extract_strided_slice %101 {offsets = [3, 0], sizes = [3, 512], strides = [1, 1]} : vector<9x512xf32> to vector<3x512xf32>
    %139 = vector.broadcast %137 : vector<1x512xf32> to vector<3x512xf32>
    %140 = arith.mulf %139, %138 : vector<3x512xf32>
    %141 = arith.addf %136, %140 : vector<3x512xf32>
    %142 = vector.extract_strided_slice %104 {offsets = [8, 0], sizes = [1, 512], strides = [1, 1]} : vector<12x512xf32> to vector<1x512xf32>
    %143 = vector.extract_strided_slice %101 {offsets = [6, 0], sizes = [3, 512], strides = [1, 1]} : vector<9x512xf32> to vector<3x512xf32>
    %144 = vector.broadcast %142 : vector<1x512xf32> to vector<3x512xf32>
    %145 = arith.mulf %144, %143 : vector<3x512xf32>
    %146 = arith.addf %141, %145 : vector<3x512xf32>
    %147 = vector.extract_strided_slice %104 {offsets = [9, 0], sizes = [1, 512], strides = [1, 1]} : vector<12x512xf32> to vector<1x512xf32>
    %148 = vector.extract_strided_slice %101 {offsets = [0, 0], sizes = [3, 512], strides = [1, 1]} : vector<9x512xf32> to vector<3x512xf32>
    %149 = vector.broadcast %147 : vector<1x512xf32> to vector<3x512xf32>
    %150 = arith.mulf %149, %148 : vector<3x512xf32>
    %151 = vector.extract_strided_slice %104 {offsets = [10, 0], sizes = [1, 512], strides = [1, 1]} : vector<12x512xf32> to vector<1x512xf32>
    %152 = vector.extract_strided_slice %101 {offsets = [3, 0], sizes = [3, 512], strides = [1, 1]} : vector<9x512xf32> to vector<3x512xf32>
    %153 = vector.broadcast %151 : vector<1x512xf32> to vector<3x512xf32>
    %154 = arith.mulf %153, %152 : vector<3x512xf32>
    %155 = arith.addf %150, %154 : vector<3x512xf32>
    %156 = vector.extract_strided_slice %104 {offsets = [11, 0], sizes = [1, 512], strides = [1, 1]} : vector<12x512xf32> to vector<1x512xf32>
    %157 = vector.extract_strided_slice %101 {offsets = [6, 0], sizes = [3, 512], strides = [1, 1]} : vector<9x512xf32> to vector<3x512xf32>
    %158 = vector.broadcast %156 : vector<1x512xf32> to vector<3x512xf32>
    %159 = arith.mulf %158, %157 : vector<3x512xf32>
    %160 = arith.addf %155, %159 : vector<3x512xf32>
    %161 = vector.extract_strided_slice %86 {offsets = [3, 0], sizes = [1, 512], strides = [1, 1]} : vector<12x512xf32> to vector<1x512xf32>
    %162 = vector.extract_strided_slice %87 {offsets = [0, 0], sizes = [9, 512], strides = [1, 1]} : vector<27x512xf32> to vector<9x512xf32>
    %163 = vector.broadcast %161 : vector<1x512xf32> to vector<9x512xf32>
    %164 = arith.mulf %163, %162 : vector<9x512xf32>
    %165 = vector.extract_strided_slice %86 {offsets = [4, 0], sizes = [1, 512], strides = [1, 1]} : vector<12x512xf32> to vector<1x512xf32>
    %166 = vector.extract_strided_slice %87 {offsets = [9, 0], sizes = [9, 512], strides = [1, 1]} : vector<27x512xf32> to vector<9x512xf32>
    %167 = vector.broadcast %165 : vector<1x512xf32> to vector<9x512xf32>
    %168 = arith.mulf %167, %166 : vector<9x512xf32>
    %169 = arith.addf %164, %168 : vector<9x512xf32>
    %170 = vector.extract_strided_slice %86 {offsets = [5, 0], sizes = [1, 512], strides = [1, 1]} : vector<12x512xf32> to vector<1x512xf32>
    %171 = vector.extract_strided_slice %87 {offsets = [18, 0], sizes = [9, 512], strides = [1, 1]} : vector<27x512xf32> to vector<9x512xf32>
    %172 = vector.broadcast %170 : vector<1x512xf32> to vector<9x512xf32>
    %173 = arith.mulf %172, %171 : vector<9x512xf32>
    %174 = arith.addf %169, %173 : vector<9x512xf32>
    %c1 = arith.constant 1 : index
    %c0_34 = arith.constant 0 : index
    %c0_35 = arith.constant 0 : index
    %175 = vector.load %arg6[%c1, %c0_34, %c0_35] : memref<4x12x16xf32, #tpu.memory_space<vmem>>, vector<1x12x16xf32>
    %176 = vector.shape_cast %175 : vector<1x12x16xf32> to vector<12x16xf32>
    %cst_36 = arith.constant dense<0.000000e+00> : vector<12x512xf32>
    %177 = tpu.matmul %176, %85, %cst_36 {dimension_numbers = #tpu.dot_dimension_numbers<[1], [0], [0], [1], [0, 0, 1, 1], [], []>} : vector<12x16xf32>, vector<16x512xf32>, vector<12x512xf32> -> vector<12x512xf32>
    %178 = vector.extract_strided_slice %177 {offsets = [0, 0], sizes = [1, 512], strides = [1, 1]} : vector<12x512xf32> to vector<1x512xf32>
    %179 = vector.extract_strided_slice %174 {offsets = [0, 0], sizes = [3, 512], strides = [1, 1]} : vector<9x512xf32> to vector<3x512xf32>
    %180 = vector.broadcast %178 : vector<1x512xf32> to vector<3x512xf32>
    %181 = arith.mulf %180, %179 : vector<3x512xf32>
    %182 = arith.addf %118, %181 : vector<3x512xf32>
    %183 = vector.extract_strided_slice %177 {offsets = [1, 0], sizes = [1, 512], strides = [1, 1]} : vector<12x512xf32> to vector<1x512xf32>
    %184 = vector.extract_strided_slice %174 {offsets = [3, 0], sizes = [3, 512], strides = [1, 1]} : vector<9x512xf32> to vector<3x512xf32>
    %185 = vector.broadcast %183 : vector<1x512xf32> to vector<3x512xf32>
    %186 = arith.mulf %185, %184 : vector<3x512xf32>
    %187 = arith.addf %182, %186 : vector<3x512xf32>
    %188 = vector.extract_strided_slice %177 {offsets = [2, 0], sizes = [1, 512], strides = [1, 1]} : vector<12x512xf32> to vector<1x512xf32>
    %189 = vector.extract_strided_slice %174 {offsets = [6, 0], sizes = [3, 512], strides = [1, 1]} : vector<9x512xf32> to vector<3x512xf32>
    %190 = vector.broadcast %188 : vector<1x512xf32> to vector<3x512xf32>
    %191 = arith.mulf %190, %189 : vector<3x512xf32>
    %192 = arith.addf %187, %191 : vector<3x512xf32>
    %193 = vector.extract_strided_slice %177 {offsets = [3, 0], sizes = [1, 512], strides = [1, 1]} : vector<12x512xf32> to vector<1x512xf32>
    %194 = vector.extract_strided_slice %174 {offsets = [0, 0], sizes = [3, 512], strides = [1, 1]} : vector<9x512xf32> to vector<3x512xf32>
    %195 = vector.broadcast %193 : vector<1x512xf32> to vector<3x512xf32>
    %196 = arith.mulf %195, %194 : vector<3x512xf32>
    %197 = arith.addf %132, %196 : vector<3x512xf32>
    %198 = vector.extract_strided_slice %177 {offsets = [4, 0], sizes = [1, 512], strides = [1, 1]} : vector<12x512xf32> to vector<1x512xf32>
    %199 = vector.extract_strided_slice %174 {offsets = [3, 0], sizes = [3, 512], strides = [1, 1]} : vector<9x512xf32> to vector<3x512xf32>
    %200 = vector.broadcast %198 : vector<1x512xf32> to vector<3x512xf32>
    %201 = arith.mulf %200, %199 : vector<3x512xf32>
    %202 = arith.addf %197, %201 : vector<3x512xf32>
    %203 = vector.extract_strided_slice %177 {offsets = [5, 0], sizes = [1, 512], strides = [1, 1]} : vector<12x512xf32> to vector<1x512xf32>
    %204 = vector.extract_strided_slice %174 {offsets = [6, 0], sizes = [3, 512], strides = [1, 1]} : vector<9x512xf32> to vector<3x512xf32>
    %205 = vector.broadcast %203 : vector<1x512xf32> to vector<3x512xf32>
    %206 = arith.mulf %205, %204 : vector<3x512xf32>
    %207 = arith.addf %202, %206 : vector<3x512xf32>
    %208 = vector.extract_strided_slice %177 {offsets = [6, 0], sizes = [1, 512], strides = [1, 1]} : vector<12x512xf32> to vector<1x512xf32>
    %209 = vector.extract_strided_slice %174 {offsets = [0, 0], sizes = [3, 512], strides = [1, 1]} : vector<9x512xf32> to vector<3x512xf32>
    %210 = vector.broadcast %208 : vector<1x512xf32> to vector<3x512xf32>
    %211 = arith.mulf %210, %209 : vector<3x512xf32>
    %212 = arith.addf %146, %211 : vector<3x512xf32>
    %213 = vector.extract_strided_slice %177 {offsets = [7, 0], sizes = [1, 512], strides = [1, 1]} : vector<12x512xf32> to vector<1x512xf32>
    %214 = vector.extract_strided_slice %174 {offsets = [3, 0], sizes = [3, 512], strides = [1, 1]} : vector<9x512xf32> to vector<3x512xf32>
    %215 = vector.broadcast %213 : vector<1x512xf32> to vector<3x512xf32>
    %216 = arith.mulf %215, %214 : vector<3x512xf32>
    %217 = arith.addf %212, %216 : vector<3x512xf32>
    %218 = vector.extract_strided_slice %177 {offsets = [8, 0], sizes = [1, 512], strides = [1, 1]} : vector<12x512xf32> to vector<1x512xf32>
    %219 = vector.extract_strided_slice %174 {offsets = [6, 0], sizes = [3, 512], strides = [1, 1]} : vector<9x512xf32> to vector<3x512xf32>
    %220 = vector.broadcast %218 : vector<1x512xf32> to vector<3x512xf32>
    %221 = arith.mulf %220, %219 : vector<3x512xf32>
    %222 = arith.addf %217, %221 : vector<3x512xf32>
    %223 = vector.extract_strided_slice %177 {offsets = [9, 0], sizes = [1, 512], strides = [1, 1]} : vector<12x512xf32> to vector<1x512xf32>
    %224 = vector.extract_strided_slice %174 {offsets = [0, 0], sizes = [3, 512], strides = [1, 1]} : vector<9x512xf32> to vector<3x512xf32>
    %225 = vector.broadcast %223 : vector<1x512xf32> to vector<3x512xf32>
    %226 = arith.mulf %225, %224 : vector<3x512xf32>
    %227 = arith.addf %160, %226 : vector<3x512xf32>
    %228 = vector.extract_strided_slice %177 {offsets = [10, 0], sizes = [1, 512], strides = [1, 1]} : vector<12x512xf32> to vector<1x512xf32>
    %229 = vector.extract_strided_slice %174 {offsets = [3, 0], sizes = [3, 512], strides = [1, 1]} : vector<9x512xf32> to vector<3x512xf32>
    %230 = vector.broadcast %228 : vector<1x512xf32> to vector<3x512xf32>
    %231 = arith.mulf %230, %229 : vector<3x512xf32>
    %232 = arith.addf %227, %231 : vector<3x512xf32>
    %233 = vector.extract_strided_slice %177 {offsets = [11, 0], sizes = [1, 512], strides = [1, 1]} : vector<12x512xf32> to vector<1x512xf32>
    %234 = vector.extract_strided_slice %174 {offsets = [6, 0], sizes = [3, 512], strides = [1, 1]} : vector<9x512xf32> to vector<3x512xf32>
    %235 = vector.broadcast %233 : vector<1x512xf32> to vector<3x512xf32>
    %236 = arith.mulf %235, %234 : vector<3x512xf32>
    %237 = arith.addf %232, %236 : vector<3x512xf32>
    %238 = vector.extract_strided_slice %86 {offsets = [6, 0], sizes = [1, 512], strides = [1, 1]} : vector<12x512xf32> to vector<1x512xf32>
    %239 = vector.extract_strided_slice %87 {offsets = [0, 0], sizes = [9, 512], strides = [1, 1]} : vector<27x512xf32> to vector<9x512xf32>
    %240 = vector.broadcast %238 : vector<1x512xf32> to vector<9x512xf32>
    %241 = arith.mulf %240, %239 : vector<9x512xf32>
    %242 = vector.extract_strided_slice %86 {offsets = [7, 0], sizes = [1, 512], strides = [1, 1]} : vector<12x512xf32> to vector<1x512xf32>
    %243 = vector.extract_strided_slice %87 {offsets = [9, 0], sizes = [9, 512], strides = [1, 1]} : vector<27x512xf32> to vector<9x512xf32>
    %244 = vector.broadcast %242 : vector<1x512xf32> to vector<9x512xf32>
    %245 = arith.mulf %244, %243 : vector<9x512xf32>
    %246 = arith.addf %241, %245 : vector<9x512xf32>
    %247 = vector.extract_strided_slice %86 {offsets = [8, 0], sizes = [1, 512], strides = [1, 1]} : vector<12x512xf32> to vector<1x512xf32>
    %248 = vector.extract_strided_slice %87 {offsets = [18, 0], sizes = [9, 512], strides = [1, 1]} : vector<27x512xf32> to vector<9x512xf32>
    %249 = vector.broadcast %247 : vector<1x512xf32> to vector<9x512xf32>
    %250 = arith.mulf %249, %248 : vector<9x512xf32>
    %251 = arith.addf %246, %250 : vector<9x512xf32>
    %c2 = arith.constant 2 : index
    %c0_37 = arith.constant 0 : index
    %c0_38 = arith.constant 0 : index
    %252 = vector.load %arg6[%c2, %c0_37, %c0_38] : memref<4x12x16xf32, #tpu.memory_space<vmem>>, vector<1x12x16xf32>
    %253 = vector.shape_cast %252 : vector<1x12x16xf32> to vector<12x16xf32>
    %cst_39 = arith.constant dense<0.000000e+00> : vector<12x512xf32>
    %254 = tpu.matmul %253, %85, %cst_39 {dimension_numbers = #tpu.dot_dimension_numbers<[1], [0], [0], [1], [0, 0, 1, 1], [], []>} : vector<12x16xf32>, vector<16x512xf32>, vector<12x512xf32> -> vector<12x512xf32>
    %255 = vector.extract_strided_slice %254 {offsets = [0, 0], sizes = [1, 512], strides = [1, 1]} : vector<12x512xf32> to vector<1x512xf32>
    %256 = vector.extract_strided_slice %251 {offsets = [0, 0], sizes = [3, 512], strides = [1, 1]} : vector<9x512xf32> to vector<3x512xf32>
    %257 = vector.broadcast %255 : vector<1x512xf32> to vector<3x512xf32>
    %258 = arith.mulf %257, %256 : vector<3x512xf32>
    %259 = arith.addf %192, %258 : vector<3x512xf32>
    %260 = vector.extract_strided_slice %254 {offsets = [1, 0], sizes = [1, 512], strides = [1, 1]} : vector<12x512xf32> to vector<1x512xf32>
    %261 = vector.extract_strided_slice %251 {offsets = [3, 0], sizes = [3, 512], strides = [1, 1]} : vector<9x512xf32> to vector<3x512xf32>
    %262 = vector.broadcast %260 : vector<1x512xf32> to vector<3x512xf32>
    %263 = arith.mulf %262, %261 : vector<3x512xf32>
    %264 = arith.addf %259, %263 : vector<3x512xf32>
    %265 = vector.extract_strided_slice %254 {offsets = [2, 0], sizes = [1, 512], strides = [1, 1]} : vector<12x512xf32> to vector<1x512xf32>
    %266 = vector.extract_strided_slice %251 {offsets = [6, 0], sizes = [3, 512], strides = [1, 1]} : vector<9x512xf32> to vector<3x512xf32>
    %267 = vector.broadcast %265 : vector<1x512xf32> to vector<3x512xf32>
    %268 = arith.mulf %267, %266 : vector<3x512xf32>
    %269 = arith.addf %264, %268 : vector<3x512xf32>
    %270 = vector.extract_strided_slice %254 {offsets = [3, 0], sizes = [1, 512], strides = [1, 1]} : vector<12x512xf32> to vector<1x512xf32>
    %271 = vector.extract_strided_slice %251 {offsets = [0, 0], sizes = [3, 512], strides = [1, 1]} : vector<9x512xf32> to vector<3x512xf32>
    %272 = vector.broadcast %270 : vector<1x512xf32> to vector<3x512xf32>
    %273 = arith.mulf %272, %271 : vector<3x512xf32>
    %274 = arith.addf %207, %273 : vector<3x512xf32>
    %275 = vector.extract_strided_slice %254 {offsets = [4, 0], sizes = [1, 512], strides = [1, 1]} : vector<12x512xf32> to vector<1x512xf32>
    %276 = vector.extract_strided_slice %251 {offsets = [3, 0], sizes = [3, 512], strides = [1, 1]} : vector<9x512xf32> to vector<3x512xf32>
    %277 = vector.broadcast %275 : vector<1x512xf32> to vector<3x512xf32>
    %278 = arith.mulf %277, %276 : vector<3x512xf32>
    %279 = arith.addf %274, %278 : vector<3x512xf32>
    %280 = vector.extract_strided_slice %254 {offsets = [5, 0], sizes = [1, 512], strides = [1, 1]} : vector<12x512xf32> to vector<1x512xf32>
    %281 = vector.extract_strided_slice %251 {offsets = [6, 0], sizes = [3, 512], strides = [1, 1]} : vector<9x512xf32> to vector<3x512xf32>
    %282 = vector.broadcast %280 : vector<1x512xf32> to vector<3x512xf32>
    %283 = arith.mulf %282, %281 : vector<3x512xf32>
    %284 = arith.addf %279, %283 : vector<3x512xf32>
    %285 = vector.extract_strided_slice %254 {offsets = [6, 0], sizes = [1, 512], strides = [1, 1]} : vector<12x512xf32> to vector<1x512xf32>
    %286 = vector.extract_strided_slice %251 {offsets = [0, 0], sizes = [3, 512], strides = [1, 1]} : vector<9x512xf32> to vector<3x512xf32>
    %287 = vector.broadcast %285 : vector<1x512xf32> to vector<3x512xf32>
    %288 = arith.mulf %287, %286 : vector<3x512xf32>
    %289 = arith.addf %222, %288 : vector<3x512xf32>
    %290 = vector.extract_strided_slice %254 {offsets = [7, 0], sizes = [1, 512], strides = [1, 1]} : vector<12x512xf32> to vector<1x512xf32>
    %291 = vector.extract_strided_slice %251 {offsets = [3, 0], sizes = [3, 512], strides = [1, 1]} : vector<9x512xf32> to vector<3x512xf32>
    %292 = vector.broadcast %290 : vector<1x512xf32> to vector<3x512xf32>
    %293 = arith.mulf %292, %291 : vector<3x512xf32>
    %294 = arith.addf %289, %293 : vector<3x512xf32>
    %295 = vector.extract_strided_slice %254 {offsets = [8, 0], sizes = [1, 512], strides = [1, 1]} : vector<12x512xf32> to vector<1x512xf32>
    %296 = vector.extract_strided_slice %251 {offsets = [6, 0], sizes = [3, 512], strides = [1, 1]} : vector<9x512xf32> to vector<3x512xf32>
    %297 = vector.broadcast %295 : vector<1x512xf32> to vector<3x512xf32>
    %298 = arith.mulf %297, %296 : vector<3x512xf32>
    %299 = arith.addf %294, %298 : vector<3x512xf32>
    %300 = vector.extract_strided_slice %254 {offsets = [9, 0], sizes = [1, 512], strides = [1, 1]} : vector<12x512xf32> to vector<1x512xf32>
    %301 = vector.extract_strided_slice %251 {offsets = [0, 0], sizes = [3, 512], strides = [1, 1]} : vector<9x512xf32> to vector<3x512xf32>
    %302 = vector.broadcast %300 : vector<1x512xf32> to vector<3x512xf32>
    %303 = arith.mulf %302, %301 : vector<3x512xf32>
    %304 = arith.addf %237, %303 : vector<3x512xf32>
    %305 = vector.extract_strided_slice %254 {offsets = [10, 0], sizes = [1, 512], strides = [1, 1]} : vector<12x512xf32> to vector<1x512xf32>
    %306 = vector.extract_strided_slice %251 {offsets = [3, 0], sizes = [3, 512], strides = [1, 1]} : vector<9x512xf32> to vector<3x512xf32>
    %307 = vector.broadcast %305 : vector<1x512xf32> to vector<3x512xf32>
    %308 = arith.mulf %307, %306 : vector<3x512xf32>
    %309 = arith.addf %304, %308 : vector<3x512xf32>
    %310 = vector.extract_strided_slice %254 {offsets = [11, 0], sizes = [1, 512], strides = [1, 1]} : vector<12x512xf32> to vector<1x512xf32>
    %311 = vector.extract_strided_slice %251 {offsets = [6, 0], sizes = [3, 512], strides = [1, 1]} : vector<9x512xf32> to vector<3x512xf32>
    %312 = vector.broadcast %310 : vector<1x512xf32> to vector<3x512xf32>
    %313 = arith.mulf %312, %311 : vector<3x512xf32>
    %314 = arith.addf %309, %313 : vector<3x512xf32>
    %315 = vector.extract_strided_slice %86 {offsets = [9, 0], sizes = [1, 512], strides = [1, 1]} : vector<12x512xf32> to vector<1x512xf32>
    %316 = vector.extract_strided_slice %87 {offsets = [0, 0], sizes = [9, 512], strides = [1, 1]} : vector<27x512xf32> to vector<9x512xf32>
    %317 = vector.broadcast %315 : vector<1x512xf32> to vector<9x512xf32>
    %318 = arith.mulf %317, %316 : vector<9x512xf32>
    %319 = vector.extract_strided_slice %86 {offsets = [10, 0], sizes = [1, 512], strides = [1, 1]} : vector<12x512xf32> to vector<1x512xf32>
    %320 = vector.extract_strided_slice %87 {offsets = [9, 0], sizes = [9, 512], strides = [1, 1]} : vector<27x512xf32> to vector<9x512xf32>
    %321 = vector.broadcast %319 : vector<1x512xf32> to vector<9x512xf32>
    %322 = arith.mulf %321, %320 : vector<9x512xf32>
    %323 = arith.addf %318, %322 : vector<9x512xf32>
    %324 = vector.extract_strided_slice %86 {offsets = [11, 0], sizes = [1, 512], strides = [1, 1]} : vector<12x512xf32> to vector<1x512xf32>
    %325 = vector.extract_strided_slice %87 {offsets = [18, 0], sizes = [9, 512], strides = [1, 1]} : vector<27x512xf32> to vector<9x512xf32>
    %326 = vector.broadcast %324 : vector<1x512xf32> to vector<9x512xf32>
    %327 = arith.mulf %326, %325 : vector<9x512xf32>
    %328 = arith.addf %323, %327 : vector<9x512xf32>
    %c3 = arith.constant 3 : index
    %c0_40 = arith.constant 0 : index
    %c0_41 = arith.constant 0 : index
    %329 = vector.load %arg6[%c3, %c0_40, %c0_41] : memref<4x12x16xf32, #tpu.memory_space<vmem>>, vector<1x12x16xf32>
    %330 = vector.shape_cast %329 : vector<1x12x16xf32> to vector<12x16xf32>
    %cst_42 = arith.constant dense<0.000000e+00> : vector<12x512xf32>
    %331 = tpu.matmul %330, %85, %cst_42 {dimension_numbers = #tpu.dot_dimension_numbers<[1], [0], [0], [1], [0, 0, 1, 1], [], []>} : vector<12x16xf32>, vector<16x512xf32>, vector<12x512xf32> -> vector<12x512xf32>
    %332 = vector.extract_strided_slice %331 {offsets = [0, 0], sizes = [1, 512], strides = [1, 1]} : vector<12x512xf32> to vector<1x512xf32>
    %333 = vector.extract_strided_slice %328 {offsets = [0, 0], sizes = [3, 512], strides = [1, 1]} : vector<9x512xf32> to vector<3x512xf32>
    %334 = vector.broadcast %332 : vector<1x512xf32> to vector<3x512xf32>
    %335 = arith.mulf %334, %333 : vector<3x512xf32>
    %336 = arith.addf %269, %335 : vector<3x512xf32>
    %337 = vector.extract_strided_slice %331 {offsets = [1, 0], sizes = [1, 512], strides = [1, 1]} : vector<12x512xf32> to vector<1x512xf32>
    %338 = vector.extract_strided_slice %328 {offsets = [3, 0], sizes = [3, 512], strides = [1, 1]} : vector<9x512xf32> to vector<3x512xf32>
    %339 = vector.broadcast %337 : vector<1x512xf32> to vector<3x512xf32>
    %340 = arith.mulf %339, %338 : vector<3x512xf32>
    %341 = arith.addf %336, %340 : vector<3x512xf32>
    %342 = vector.extract_strided_slice %331 {offsets = [2, 0], sizes = [1, 512], strides = [1, 1]} : vector<12x512xf32> to vector<1x512xf32>
    %343 = vector.extract_strided_slice %328 {offsets = [6, 0], sizes = [3, 512], strides = [1, 1]} : vector<9x512xf32> to vector<3x512xf32>
    %344 = vector.broadcast %342 : vector<1x512xf32> to vector<3x512xf32>
    %345 = arith.mulf %344, %343 : vector<3x512xf32>
    %346 = arith.addf %341, %345 : vector<3x512xf32>
    %347 = vector.extract_strided_slice %331 {offsets = [3, 0], sizes = [1, 512], strides = [1, 1]} : vector<12x512xf32> to vector<1x512xf32>
    %348 = vector.extract_strided_slice %328 {offsets = [0, 0], sizes = [3, 512], strides = [1, 1]} : vector<9x512xf32> to vector<3x512xf32>
    %349 = vector.broadcast %347 : vector<1x512xf32> to vector<3x512xf32>
    %350 = arith.mulf %349, %348 : vector<3x512xf32>
    %351 = arith.addf %284, %350 : vector<3x512xf32>
    %352 = vector.extract_strided_slice %331 {offsets = [4, 0], sizes = [1, 512], strides = [1, 1]} : vector<12x512xf32> to vector<1x512xf32>
    %353 = vector.extract_strided_slice %328 {offsets = [3, 0], sizes = [3, 512], strides = [1, 1]} : vector<9x512xf32> to vector<3x512xf32>
    %354 = vector.broadcast %352 : vector<1x512xf32> to vector<3x512xf32>
    %355 = arith.mulf %354, %353 : vector<3x512xf32>
    %356 = arith.addf %351, %355 : vector<3x512xf32>
    %357 = vector.extract_strided_slice %331 {offsets = [5, 0], sizes = [1, 512], strides = [1, 1]} : vector<12x512xf32> to vector<1x512xf32>
    %358 = vector.extract_strided_slice %328 {offsets = [6, 0], sizes = [3, 512], strides = [1, 1]} : vector<9x512xf32> to vector<3x512xf32>
    %359 = vector.broadcast %357 : vector<1x512xf32> to vector<3x512xf32>
    %360 = arith.mulf %359, %358 : vector<3x512xf32>
    %361 = arith.addf %356, %360 : vector<3x512xf32>
    %362 = vector.extract_strided_slice %331 {offsets = [6, 0], sizes = [1, 512], strides = [1, 1]} : vector<12x512xf32> to vector<1x512xf32>
    %363 = vector.extract_strided_slice %328 {offsets = [0, 0], sizes = [3, 512], strides = [1, 1]} : vector<9x512xf32> to vector<3x512xf32>
    %364 = vector.broadcast %362 : vector<1x512xf32> to vector<3x512xf32>
    %365 = arith.mulf %364, %363 : vector<3x512xf32>
    %366 = arith.addf %299, %365 : vector<3x512xf32>
    %367 = vector.extract_strided_slice %331 {offsets = [7, 0], sizes = [1, 512], strides = [1, 1]} : vector<12x512xf32> to vector<1x512xf32>
    %368 = vector.extract_strided_slice %328 {offsets = [3, 0], sizes = [3, 512], strides = [1, 1]} : vector<9x512xf32> to vector<3x512xf32>
    %369 = vector.broadcast %367 : vector<1x512xf32> to vector<3x512xf32>
    %370 = arith.mulf %369, %368 : vector<3x512xf32>
    %371 = arith.addf %366, %370 : vector<3x512xf32>
    %372 = vector.extract_strided_slice %331 {offsets = [8, 0], sizes = [1, 512], strides = [1, 1]} : vector<12x512xf32> to vector<1x512xf32>
    %373 = vector.extract_strided_slice %328 {offsets = [6, 0], sizes = [3, 512], strides = [1, 1]} : vector<9x512xf32> to vector<3x512xf32>
    %374 = vector.broadcast %372 : vector<1x512xf32> to vector<3x512xf32>
    %375 = arith.mulf %374, %373 : vector<3x512xf32>
    %376 = arith.addf %371, %375 : vector<3x512xf32>
    %377 = vector.extract_strided_slice %331 {offsets = [9, 0], sizes = [1, 512], strides = [1, 1]} : vector<12x512xf32> to vector<1x512xf32>
    %378 = vector.extract_strided_slice %328 {offsets = [0, 0], sizes = [3, 512], strides = [1, 1]} : vector<9x512xf32> to vector<3x512xf32>
    %379 = vector.broadcast %377 : vector<1x512xf32> to vector<3x512xf32>
    %380 = arith.mulf %379, %378 : vector<3x512xf32>
    %381 = arith.addf %314, %380 : vector<3x512xf32>
    %382 = vector.extract_strided_slice %331 {offsets = [10, 0], sizes = [1, 512], strides = [1, 1]} : vector<12x512xf32> to vector<1x512xf32>
    %383 = vector.extract_strided_slice %328 {offsets = [3, 0], sizes = [3, 512], strides = [1, 1]} : vector<9x512xf32> to vector<3x512xf32>
    %384 = vector.broadcast %382 : vector<1x512xf32> to vector<3x512xf32>
    %385 = arith.mulf %384, %383 : vector<3x512xf32>
    %386 = arith.addf %381, %385 : vector<3x512xf32>
    %387 = vector.extract_strided_slice %331 {offsets = [11, 0], sizes = [1, 512], strides = [1, 1]} : vector<12x512xf32> to vector<1x512xf32>
    %388 = vector.extract_strided_slice %328 {offsets = [6, 0], sizes = [3, 512], strides = [1, 1]} : vector<9x512xf32> to vector<3x512xf32>
    %389 = vector.broadcast %387 : vector<1x512xf32> to vector<3x512xf32>
    %390 = arith.mulf %389, %388 : vector<3x512xf32>
    %391 = arith.addf %386, %390 : vector<3x512xf32>
    %c0_43 = arith.constant 0 : index
    %c0_44 = arith.constant 0 : index
    %392 = vector.load %arg8[%c0_43, %c0_44] : memref<12x512xf32, #tpu.memory_space<vmem>>, vector<3x512xf32>
    tpu.vector_store %arg8[%c0_43, %c0_44], %346 {strides = array<i32>} : memref<12x512xf32, #tpu.memory_space<vmem>>, vector<3x512xf32>,
    %c3_45 = arith.constant 3 : index
    %c0_46 = arith.constant 0 : index
    %393 = vector.load %arg8[%c3_45, %c0_46] : memref<12x512xf32, #tpu.memory_space<vmem>>, vector<3x512xf32>
    tpu.vector_store %arg8[%c3_45, %c0_46], %361 {strides = array<i32>} : memref<12x512xf32, #tpu.memory_space<vmem>>, vector<3x512xf32>,
    %c6 = arith.constant 6 : index
    %c0_47 = arith.constant 0 : index
    %394 = vector.load %arg8[%c6, %c0_47] : memref<12x512xf32, #tpu.memory_space<vmem>>, vector<3x512xf32>
    tpu.vector_store %arg8[%c6, %c0_47], %376 {strides = array<i32>} : memref<12x512xf32, #tpu.memory_space<vmem>>, vector<3x512xf32>,
    %c9 = arith.constant 9 : index
    %c0_48 = arith.constant 0 : index
    %395 = vector.load %arg8[%c9, %c0_48] : memref<12x512xf32, #tpu.memory_space<vmem>>, vector<3x512xf32>
    tpu.vector_store %arg8[%c9, %c0_48], %391 {strides = array<i32>} : memref<12x512xf32, #tpu.memory_space<vmem>>, vector<3x512xf32>,
    return
  }
  func.func @transform_0(%arg0: i32) -> (i32, i32) {
    %c0_i32 = arith.constant 0 : i32
    %c0_i32_0 = arith.constant 0 : i32
    return %c0_i32, %arg0 : i32, i32
  }
  func.func @transform_1(%arg0: i32) -> (i32, i32) {
    %c0_i32 = arith.constant 0 : i32
    %c0_i32_0 = arith.constant 0 : i32
    return %c0_i32, %arg0 : i32, i32
  }
  func.func @transform_2(%arg0: i32) -> (i32, i32) {
    %c0_i32 = arith.constant 0 : i32
    %c0_i32_0 = arith.constant 0 : i32
    return %c0_i32, %arg0 : i32, i32
  }
  func.func @transform_3(%arg0: i32) -> (i32, i32) {
    %c0_i32 = arith.constant 0 : i32
    %c0_i32_0 = arith.constant 0 : i32
    %c0_i32_1 = arith.constant 0 : i32
    return %c0_i32, %c0_i32_0 : i32, i32
  }
  func.func @transform_4(%arg0: i32) -> (i32, i32) {
    %c0_i32 = arith.constant 0 : i32
    %c0_i32_0 = arith.constant 0 : i32
    %c0_i32_1 = arith.constant 0 : i32
    return %c0_i32, %c0_i32_0 : i32, i32
  }
  func.func @transform_5(%arg0: i32) -> (i32, i32, i32) {
    %c0_i32 = arith.constant 0 : i32
    %c0_i32_0 = arith.constant 0 : i32
    %c0_i32_1 = arith.constant 0 : i32
    %c0_i32_2 = arith.constant 0 : i32
    return %c0_i32, %c0_i32_0, %c0_i32_1 : i32, i32, i32
  }
  func.func @transform_6(%arg0: i32) -> (i32, i32) {
    %c0_i32 = arith.constant 0 : i32
    %c0_i32_0 = arith.constant 0 : i32
    %c0_i32_1 = arith.constant 0 : i32
    return %c0_i32, %c0_i32_0 : i32, i32
  }
  func.func @transform_7(%arg0: i32) -> (i32, i32) {
    %c0_i32 = arith.constant 0 : i32
    %c0_i32_0 = arith.constant 0 : i32
    return %c0_i32, %arg0 : i32, i32
  }
}

</mosaic_0001>

<bundles_post_ra>
// kernel: tpu_custom_call.1
= control target key start
LH: loop header
LB: loop body
LE: loop exit
PB: predicated region body
PF: predicated region fallthrough
CT: control target
= control target key end

     0   :  { %12 = vsyncpa [#allocation4], 0  ;;  %s6866_s0 = inlined_call_operand.vmem [shape: f32[8,1024], index: 0, kind: input, shape index: {}]   ;;  %s6867_s1 = inlined_call_operand.vmem [shape: f32[12,1024], index: 1, kind: input, shape index: {}]   ;;  %s6868_s2 = inlined_call_operand.hbm [shape: f32[27,1024], index: 2, kind: input, shape index: {}]   ;;  %s6869_s3 = inlined_call_operand.vmem [shape: f32[16,8], index: 3, kind: input, shape index: {}]   ;;  %s6870_s4 = inlined_call_operand.vmem [shape: f32[16,16], index: 4, kind: input, shape index: {}]   ;;  %s6871_s5 = inlined_call_operand.vmem [shape: f32[4,12,16], index: 5, kind: input, shape index: {}]   ;;  %s6872_s6 = inlined_call_operand.vmem [shape: f32[96,1], index: 6, kind: input, shape index: {}]   ;;  %s6873_s7 = inlined_call_operand.hbm [shape: f32[12,1024], index: 7, kind: output, shape index: {}]  }
   0x1   :  { %14 = vsyncpa [#allocation4 + $0x1], 0 }
   0x2   :  { %15 = vsyncpa [#allocation5], 0 }
   0x3   :  { %17 = vsyncpa [#allocation5 + $0x1], 0  ;;  %s4708_s24 = smov 0   ;;  %s4710_s25 = smov 0  }
   0x4   :  { %s4712_s26 = smov 0   ;;  %s4714_s27 = smov 0  }
   0x5 LB: > { %s4729_s28 = sadd.s32 4294967295, %s4656_s27   ;;  %s4350_s29 = sadd.s32 4294967294, %s4656_s27   ;;  %s4656_s27 = sphi %s4714_s27, %s7119_s27   ;;  %s4652_s26 = sphi %s4712_s26, %s7118_s26   ;;  %s4648_s25 = sphi %s4710_s25, %s7117_s25   ;;  %s4644_s24 = sphi %s4708_s24, %s7116_s24  }
   0x6   : > { %s4733_s30 = sadd.s32 1, %s4656_s27   ;;  %s56_s8 = sadd.s32 1, %s4652_s26 }
   0x7   : > { %s53_s9 = ssub.s32 %s4656_s27, %s4733_s30  ;;  %p63_p0 = scmp.ne.s32.totalorder %s4652_s26, %s4648_s25 }
   0x8   : > { %p54_p1 = scmp.eq.s32.totalorder %s53_s9, 0  ;;  %p64_p2 = scmp.eq.s32.totalorder %s4656_s27, 0 }
   0x9   : > { %p95_p3 = scmp.ne.s32.totalorder %s4648_s25, %s4644_s24  ;;  %p96_p4 = scmp.eq.s32.totalorder %s4729_s28, 0 }
   0xa   : > { %s4745_s10 = scalar_select %p54_p1, %s4652_s26, %s56_s8  }
   0xb   : > { %p4747_p5 = por %p64_p2, %p63_p0  ;;  %p4751_p6 = por %p96_p4, %p95_p3 }
   0xc   : > { %p203_p7 = scmp.eq.s32.totalorder %s4729_s28, 1  ;;  %p209_p8 = scmp.eq.s32.totalorder %s4350_s29, 1 }
   0xd   : > { %p6874_p11 = scmp.ge.s32.totalorder %s4656_s27, 2 }
   0xe   : > { %p4756_p9 = por %p203_p7, %p63_p0  ;;  %p4760_p10 = por %p209_p8, %p95_p3 }
   0xf   : > { %237 = sbr.rel (%p6874_p11) target bundleno = 57 (0x39), region = 32 }
  0x10   : > { %s6924_s13 = scalar_select %p4756_p9, 1, 0 }
  0x11   : > { %s6925_s14 = scalar_select %p4760_p10, 1, 0 }
  0x16   : > { %249 = sbr.rel (!%p4747_p5) target bundleno = 30 (0x1e), region = 40  ;;  %s251_s15 = sand.u32 (%p4747_p5), 1, %s4652_s26  }
  0x17   : > { %s4400_s16 = sshll.u32 (%p4747_p5), %s4656_s27, 5  ;;  %s4353_s17 = sshll.u32 (%p4747_p5), %s251_s15, 6 }
  0x18   : > { %s256_s20 = scalar_lea.vmem (%p4747_p5), %s6867_s1, %s4400_s16  ;;  %s253_s21 = scalar_lea.vmem (%p4747_p5), [#allocation2], %s4353_s17 }
  0x19   : > { %v269_v0 = vld [vmem:[%s256_s20] sm:$0xff] (%p4747_p5)  ;;  %v271_v1 = vld [vmem:[%s256_s20 + $0x8] sm:$0xff] (%p4747_p5)  ;;  %v273_v2 = vld [vmem:[%s256_s20 + $0x10] sm:$0xff] (%p4747_p5) }
  0x1a   : > { %270 = vst [vmem:[%s253_s21] sm:$0xff] (%p4747_p5), %v269_v0  ;;  %272 = vst [vmem:[%s253_s21 + $0x8] sm:$0xff] (%p4747_p5), %v271_v1  ;;  %v275_v3 = vld [vmem:[%s256_s20 + $0x18] sm:$0xff] (%p4747_p5)  ;;  %v277_v4 = vld [vmem:[%s256_s20 + $0x40] sm:$0xff] (%p4747_p5) }
  0x1b   : > { %274 = vst [vmem:[%s253_s21 + $0x10] sm:$0xff] (%p4747_p5), %v273_v2  ;;  %v279_v5 = vld [vmem:[%s256_s20 + $0x48] sm:$0xff] (%p4747_p5)  ;;  %276 = vst [vmem:[%s253_s21 + $0x18] sm:$0xff] (%p4747_p5), %v275_v3  ;;  %v281_v6 = vld [vmem:[%s256_s20 + $0x50] sm:$0xff] (%p4747_p5) }
  0x1c   : > { %278 = vst [vmem:[%s253_s21 + $0x20] sm:$0xff] (%p4747_p5), %v277_v4  ;;  %280 = vst [vmem:[%s253_s21 + $0x28] sm:$0xff] (%p4747_p5), %v279_v5  ;;  %v283_v7 = vld [vmem:[%s256_s20 + $0x58] sm:$0xff] (%p4747_p5) }
  0x1d   : > { %282 = vst [vmem:[%s253_s21 + $0x30] sm:$0xff] %v281_v6  ;;  %284 = vst [vmem:[%s253_s21 + $0x38] sm:$0xff] %v283_v7 }
  0x1e PF: > { %s291_s22 = sand.u32 1, %s4652_s26   ;;  %s4401_s23 = sshll.u32 %s4656_s27, 9 }
  0x1f   : > { %s4356_s29 = sshll.u32 %s291_s22, 7  ;;  %s4779_s15 = scalar_lea.hbm %s6868_s2, %s4401_s23 }
  0x20   : > { %s295_s16 = scalar_lea.vmem [#allocation3], %s4356_s29  ;;  %s4783_s18 = scalar_lea.sflag [#allocation4], %s291_s22 }
  0x21   : > { %s302_s17 = sshll.u32 %s295_s16, 4  ;;  %s4562_s19 = scalar_lea.hbm %s4779_s15, 2048  ;;  %s4781_s17 = int_to_ptr.vmem [resolvable:$true] %s302_s17 }
  0x22   : > { %p4563_p12 = scmp.ne.s32.totalorder %s4779_s15, %s4562_s19  ;;  %s4566_s23 = scalar_lea.hbm %s6868_s2, 4096 }
  0x23   : > { %p4567_p1 = scmp.lt.u32.totalorder %s4779_s15, %s6868_s2  ;;  %p4568_p2 = scmp.lt.u32.totalorder %s4566_s23, %s4562_s19 }
  0x24   : > { %p4564_p13 = pnand %p4563_p12, %p4747_p5  ;;  %p4570_p4 = scmp.lt.u32.totalorder %s4562_s19, %s4779_s15 }
  0x25   : > { %p4569_p3 = por %p4568_p2, %p4567_p1 }
  0x26   : > { %p4565_p0 = pneg %p4564_p13 }
  0x27   : > { %p4571_p7 = por %p4570_p4, %p4569_p3 }
  0x29   : > { %p4572_p8 = pnand %p4571_p7, %p4565_p0 }
  0x2b   : > { %4575 = shalt.err (!%p4572_p8)
}
  0x2c   : > { %s4576_s22 = scalar_lea.vmem %s4781_s17, 2048  ;;  %s4658_s29 = smov [#allocation3]  }
  0x2d   : > { %p4577_p12 = scmp.ne.s32.totalorder %s4781_s17, %s4576_s22  ;;  %s4580_s16 = sshll.u32 %s4658_s29, 4  ;;  %s4581_s16 = int_to_ptr.vmem [resolvable:$false] %s4580_s16 }
  0x2e   : > { %s4582_s20 = scalar_lea.vmem %s4581_s16, 4096  ;;  %p4583_p10 = scmp.lt.s32.totalorder %s4781_s17, %s4581_s16 }
  0x2f   : > { %p4578_p13 = pnand %p4577_p12, %p4747_p5  ;;  %p4584_p9 = scmp.lt.s32.totalorder %s4582_s20, %s4576_s22 }
  0x31   : > { %p4579_p11 = pneg %p4578_p13  ;;  %p4585_p1 = por %p4584_p9, %p4583_p10 }
  0x33   : > { %p4586_p2 = pnand %p4585_p1, %p4579_p11 }
  0x35   : > { %4589 = shalt.err (!%p4586_p2)
}
  0x36   : > { %s4659_s19 = smov 1024   ;;  %s4660_s21 = smov 512  }
  0x37   : > { %s4661_s23 = smov 32  }
  0x38   : > { %4443 = dma.hbm_to_vmem [thread:$0]  (%p4747_p5), %s4779_s15, 2048, %s4781_s17, %s4783_s18, %s4659_s19, %s4660_s21, %s4661_s23  }
  0x39 PF: > { %p4359_p0 = scmp.ge.s32.totalorder %s4656_s27, 1  ;;  %p310_p3 = scmp.lt.s32.totalorder %s4656_s27, 3 }
  0x3b   : > { %p311_p4 = pnand %p4359_p0, %p310_p3 }
  0x3d   : > { %314 = sbr.rel (%p311_p4) target bundleno = 1186 (0x4a2), region = 67 }
  0x44   : > { %s4810_s8 = sand.u32 1, %s4648_s25  }
  0x45   : > { %s4360_s9 = sshll.u32 %s4810_s8, 6  ;;  %s4361_s22 = sshll.u32 %s4810_s8, 7 }
  0x46   : > { %s4816_s11 = scalar_lea.vmem [#allocation2], %s4360_s9  ;;  %s324_s15 = scalar_lea.sflag [#allocation4], %s4810_s8 }
  0x47   : > { %s4819_s17 = scalar_lea.vmem [#allocation3], %s4361_s22 }
  0x48   : > { %4635 = dma.done.wait (%p4751_p6), %s324_s15, 2048  }
  0x49   : > { %4637 = vsyncadd (%p4751_p6), %s324_s15, 4294965248  ;;  %s4363_s18 = sshll.u32 %s4729_s28, 2  ;;  %v4662_v8 = vmov 0.0   ;;  %v4663_v9 = vmov 0   ;;  %vm404_vm0 = vcmask 64512   ;;  %v392_v14 = vld [vmem:[%s6869_s3] sm:$0xff] }
  0x4a   : > { %p368_p5 = scmp.lt.s32.totalorder %s4363_s18, 7  ;;  %475 = vmatprep.mubr.f32.mxu0 %v4662_v8  ;;  %552 = vmatprep.mubr.f32.mxu1 %v4662_v8  ;;  %v376_v15 = vld [vmem:[%s6872_s6] sm:$0xff]  ;;  %v393_v16 = vld [vmem:[%s6869_s3 + $0x8] sm:$0xff]  ;;  %v378_v17 = vld [vmem:[%s6872_s6 + $0x10] sm:$0xff]  ;;  %vm782_vm1 = vcmask 130048   ;;  %vm1227_vm2 = vcmask 1046528  }
  0x4b   : > { %4492 = vset.pattern.permute.xlu0 %v4663_v9  ;;  %4493 = vset.pattern.permute.xlu1 %v4663_v9  ;;  %v377_v18 = vld [vmem:[%s6872_s6 + $0x8] sm:$0xff]  ;;  %v379_v19 = vld [vmem:[%s6872_s6 + $0x18] sm:$0xff]  ;;  %v380_v20 = vld [vmem:[%s6872_s6 + $0x20] sm:$0xff]  ;;  %vm1288_vm3 = vcmask 1045504   ;;  %vm1567_vm4 = vcmask 1041408   ;;  %p7113_p9 = scmp.ne.s32.totalorder %s6924_s13, 0 }
  0x4c   : > { %s7121_s18 = smov (!%p368_p5, %s4363_s18), 7  ;;  %396 = vperm.xlu0 %4492, %v376_v15   ;;  %664 = vperm.xlu1 %4493, %v378_v17   ;;  %v381_v21 = vld [vmem:[%s6872_s6 + $0x28] sm:$0xff]  ;;  %v382_v22 = vld [vmem:[%s6872_s6 + $0x30] sm:$0xff]  ;;  %v383_v23 = vld [vmem:[%s6872_s6 + $0x38] sm:$0xff]  ;;  %s4664_s23 = smov [#allocation6]  }
  0x4d   : > { %s4364_s29 = sshll.u32 %s7121_s18, 3  ;;  %v384_v24 = vld [vmem:[%s6872_s6 + $0x40] sm:$0xff]  ;;  %v385_v25 = vld [vmem:[%s6872_s6 + $0x48] sm:$0xff]  ;;  %v386_v26 = vld [vmem:[%s6872_s6 + $0x50] sm:$0xff]  ;;  %s4594_s22 = sshll.u32 %s4664_s23, 4  ;;  %s4595_s22 = int_to_ptr.vmem [resolvable:$false] %s4594_s22 }
  0x4e   : > { %s371_s19 = scalar_lea.vmem %s6866_s0, %s4364_s29  ;;  %v387_v27 = vld [vmem:[%s6872_s6 + $0x58] sm:$0xff]  ;;  %s4596_s15 = scalar_lea.vmem %s4595_s22, 2048 }
  0x4f   : > { %v389_v10 = vld [vmem:[%s371_s19 + $0x8] sm:$0xff]  ;;  %v391_v11 = vld [vmem:[%s371_s19 + $0x18] sm:$0xff]  ;;  %v388_v12 = vld [vmem:[%s371_s19] sm:$0xff] }
  0x50   : > { %411 = vmatprep.subr.mxu0 %v389_v10  ;;  %488 = vmatprep.subr.mxu1 %v391_v11  ;;  %v390_v13 = vld [vmem:[%s371_s19 + $0x10] sm:$0xff] }
  0x51   : > { %412 = vmatpush1.msra.mxu0 %v388_v12  ;;  %489 = vmatpush1.msra.mxu1 %v390_v13 }
  0x52   : > { %4365 = vmatmul.mubr.msk.f32.vlgmr.msra.gmra.mrb[0].mxu0 %vm404_vm0, %v392_v14  ;;  %4367 = vmatmul.mubr.msk.f32.vlgmr.msra.gmra.mrb[0].mxu1 %vm404_vm0, %v392_v14 }
  0x53   : > { %481 = vmatprep.mubr.f32.mxu0 %v4662_v8  ;;  %558 = vmatprep.mubr.f32.mxu1 %v4662_v8 }
  0x54   : > { %401 = vperm.xlu0 %4492, %v377_v18   ;;  %669 = vperm.xlu1 %4493, %v379_v19  }
  0x56   : > { %4366 = vmatmul.mubr.msk.f32.gmra.mrb[2].mxu0 %vm404_vm0, %v393_v16  ;;  %4368 = vmatmul.mubr.msk.f32.gmra.mrb[2].mxu1 %vm404_vm0, %v393_v16 }
  0x57   : > { %853 = vmatprep.mubr.f32.mxu0 %v4662_v8  ;;  %930 = vmatprep.mubr.f32.mxu1 %v4662_v8 }
  0x58   : > { %682 = vperm.xlu0 %4492, %v380_v20   ;;  %687 = vperm.xlu1 %4493, %v381_v21  }
  0x5c   : > { %774 = vperm.xlu0 %4492, %v382_v22   ;;  %779 = vperm.xlu1 %4493, %v383_v23  }
  0x60   : > { %1041 = vperm.xlu0 %4492, %v384_v24   ;;  %1046 = vperm.xlu1 %4493, %v385_v25  }
  0x64   : > { %1059 = vperm.xlu0 %4492, %v386_v26   ;;  %1064 = vperm.xlu1 %4493, %v387_v27  }
  0xcb   : > { %v397_v28 = vpop.permute.xlu0 %396 }
  0xd3   : > { %v402_v33 = vpop.permute.xlu0 %401 }
 0x125   : > { %v477_v29 = vpop.f32.mrb[0].mxu0  ;;  %v554_v30 = vpop.f32.mrb[0].mxu1 }
 0x126   : > { %v479_v31 = vpop.f32.mrb[1].mxu0  ;;  %v556_v32 = vpop.f32.mrb[1].mxu1  ;;  %v478_v36 = vadd.f32 %v477_v29, %v397_v28  ;;  %v555_v37 = vadd.f32 %v554_v30, %v397_v28 }
 0x127   : > { %v480_v42 = vadd.f32 %v479_v31, %v397_v28  ;;  %v557_v43 = vadd.f32 %v556_v32, %v397_v28 }
 0x129   : > { %v483_v34 = vpop.f32.mrb[2].mxu0  ;;  %v560_v35 = vpop.f32.mrb[2].mxu1 }
 0x12a   : > { %v484_v38 = vadd.f32 %v483_v34, %v402_v33  ;;  %v561_v39 = vadd.f32 %v560_v35, %v402_v33  ;;  %v485_v40 = vpop.f32.mrb[3].mxu0  ;;  %v562_v41 = vpop.f32.mrb[3].mxu1 }
 0x12b   : > { %v486_v44 = vadd.f32 %v485_v40, %v402_v33  ;;  %v563_v45 = vadd.f32 %v562_v41, %v402_v33 }
 0x12c   : > { %v565_v46 = vadd.f32 %v484_v38, %v478_v36  ;;  %v579_v47 = vadd.f32 %v561_v39, %v555_v37 }
 0x12d   : > { %v572_v48 = vadd.f32 %v486_v44, %v480_v42  ;;  %v586_v49 = vadd.f32 %v563_v45, %v557_v43 }
 0x12e   : > { %v566_v50 = vrot.slane %v565_v46, 4  ;;  %v580_v51 = vrot.slane %v579_v47, 4 }
 0x12f   : > { %v573_v52 = vrot.slane %v572_v48, 4  ;;  %v587_v53 = vrot.slane %v586_v49, 4 }
 0x130   : > { %v567_v54 = vadd.f32 %v566_v50, %v565_v46  ;;  %v581_v55 = vadd.f32 %v580_v51, %v579_v47 }
 0x131   : > { %v574_v56 = vadd.f32 %v573_v52, %v572_v48  ;;  %v588_v57 = vadd.f32 %v587_v53, %v586_v49 }
 0x132   : > { %v568_v58 = vrot.slane %v567_v54, 2  ;;  %v582_v59 = vrot.slane %v581_v55, 2 }
 0x133   : > { %v575_v60 = vrot.slane %v574_v56, 2  ;;  %v589_v61 = vrot.slane %v588_v57, 2 }
 0x134   : > { %v569_v62 = vadd.f32 %v568_v58, %v567_v54  ;;  %v583_v63 = vadd.f32 %v582_v59, %v581_v55 }
 0x135   : > { %v576_v0 = vadd.f32 %v575_v60, %v574_v56  ;;  %v590_v1 = vadd.f32 %v589_v61, %v588_v57 }
 0x136   : > { %v570_v2 = vrot.slane %v569_v62, 1  ;;  %v584_v3 = vrot.slane %v583_v63, 1 }
 0x137   : > { %v577_v4 = vrot.slane %v576_v0, 1  ;;  %v591_v5 = vrot.slane %v590_v1, 1 }
 0x138   : > { %v571_v6 = vadd.f32 %v570_v2, %v569_v62  ;;  %v585_v7 = vadd.f32 %v584_v3, %v583_v63  ;;  %v665_v3 = vpop.permute.xlu1 %664 }
 0x139   : > { %v578_v9 = vadd.f32 %v577_v4, %v576_v0  ;;  %v592_v10 = vadd.f32 %v591_v5, %v590_v1 }
 0x13a   : > { %v594_v11 = vmul.f32 0.0625, %v571_v6  ;;  %v596_v12 = vmul.f32 0.0625, %v585_v7 }
 0x13b   : > { %v595_v13 = vmul.f32 0.0625, %v578_v9  ;;  %v597_v14 = vmul.f32 0.0625, %v592_v10 }
 0x13c   : > { %v598_v15 = vsub.f32 %v478_v36, %v594_v11  ;;  %v602_v16 = vsub.f32 %v484_v38, %v594_v11  ;;  %v600_v17 = vsub.f32 %v555_v37, %v596_v12  ;;  %v604_v18 = vsub.f32 %v561_v39, %v596_v12  ;;  %v670_v4 = vpop.permute.xlu1 %669 }
 0x13d   : > { %v4881_v19 = vsub.f32 %v480_v42, %v595_v13  ;;  %v603_v20 = vsub.f32 %v486_v44, %v595_v13  ;;  %v4883_v21 = vsub.f32 %v557_v43, %v597_v14  ;;  %v4885_v22 = vsub.f32 %v563_v45, %v597_v14 }
 0x13e   : > { %v606_v23 = vmul.f32 %v598_v15, %v598_v15  ;;  %v610_v24 = vmul.f32 %v602_v16, %v602_v16  ;;  %v608_v25 = vmul.f32 %v600_v17, %v600_v17  ;;  %v612_v26 = vmul.f32 %v604_v18, %v604_v18 }
 0x13f   : > { %v607_v27 = vmul.f32 %v4881_v19, %v4881_v19  ;;  %v611_v28 = vmul.f32 %v603_v20, %v603_v20  ;;  %v609_v29 = vmul.f32 %v4883_v21, %v4883_v21  ;;  %v613_v30 = vmul.f32 %v4885_v22, %v4885_v22 }
 0x140   : > { %v614_v31 = vadd.f32 %v610_v24, %v606_v23  ;;  %v628_v32 = vadd.f32 %v612_v26, %v608_v25  ;;  %v683_v26 = vpop.permute.xlu0 %682 }
 0x141   : > { %v621_v33 = vadd.f32 %v611_v28, %v607_v27  ;;  %v635_v34 = vadd.f32 %v613_v30, %v609_v29 }
 0x142   : > { %v615_v35 = vrot.slane %v614_v31, 4  ;;  %v629_v36 = vrot.slane %v628_v32, 4 }
 0x143   : > { %v622_v37 = vrot.slane %v621_v33, 4  ;;  %v636_v38 = vrot.slane %v635_v34, 4 }
 0x144   : > { %v616_v39 = vadd.f32 %v615_v35, %v614_v31  ;;  %v630_v40 = vadd.f32 %v629_v36, %v628_v32  ;;  %v688_v31 = vpop.permute.xlu1 %687 }
 0x145   : > { %v623_v41 = vadd.f32 %v622_v37, %v621_v33  ;;  %v637_v42 = vadd.f32 %v636_v38, %v635_v34 }
 0x146   : > { %v617_v43 = vrot.slane %v616_v39, 2  ;;  %v631_v44 = vrot.slane %v630_v40, 2 }
 0x147   : > { %v624_v45 = vrot.slane %v623_v41, 2  ;;  %v638_v46 = vrot.slane %v637_v42, 2 }
 0x148   : > { %v618_v47 = vadd.f32 %v617_v43, %v616_v39  ;;  %v632_v48 = vadd.f32 %v631_v44, %v630_v40 }
 0x149   : > { %v625_v49 = vadd.f32 %v624_v45, %v623_v41  ;;  %v639_v50 = vadd.f32 %v638_v46, %v637_v42 }
 0x14a   : > { %v619_v51 = vrot.slane %v618_v47, 1  ;;  %v633_v52 = vrot.slane %v632_v48, 1 }
 0x14b   : > { %v626_v53 = vrot.slane %v625_v49, 1  ;;  %v640_v54 = vrot.slane %v639_v50, 1 }
 0x14c   : > { %v620_v55 = vadd.f32 %v619_v51, %v618_v47  ;;  %v634_v56 = vadd.f32 %v633_v52, %v632_v48 }
 0x14d   : > { %v627_v57 = vadd.f32 %v626_v53, %v625_v49  ;;  %v641_v58 = vadd.f32 %v640_v54, %v639_v50 }
 0x14e   : > { %v642_v59 = vmul.f32 0.0625, %v620_v55  ;;  %v644_v60 = vmul.f32 0.0625, %v634_v56 }
 0x14f   : > { %v643_v61 = vmul.f32 0.0625, %v627_v57  ;;  %v645_v62 = vmul.f32 0.0625, %v641_v58 }
 0x150   : > { %v646_v63 = vadd.f32 1e-05, %v642_v59  ;;  %v648_v0 = vadd.f32 1e-05, %v644_v60 }
 0x151   : > { %v647_v1 = vadd.f32 1e-05, %v643_v61  ;;  %v649_v2 = vadd.f32 1e-05, %v645_v62 }
 0x152   : > { %4494 = vrsqrt.f32 %v646_v63 }
 0x153   : > { %4496 = vrsqrt.f32 %v648_v0 }
 0x154   : > { %4498 = vrsqrt.f32 %v647_v1 }
 0x155   : > { %4500 = vrsqrt.f32 %v649_v2 }
 0x15c   : > { %v4495_v5 = vpop.eup %4494 }
 0x15d   : > { %v4497_v6 = vpop.eup %4496  ;;  %v658_v7 = vmul.f32 %v4495_v5, %v602_v16  ;;  %v654_v9 = vmul.f32 %v4495_v5, %v598_v15 }
 0x15e   : > { %v4499_v10 = vpop.eup %4498  ;;  %v660_v11 = vmul.f32 %v4497_v6, %v604_v18  ;;  %v656_v12 = vmul.f32 %v4497_v6, %v600_v17 }
 0x15f   : > { %v4501_v13 = vpop.eup %4500  ;;  %v659_v14 = vmul.f32 %v4499_v10, %v603_v20  ;;  %v655_v23 = vmul.f32 %v4499_v10, %v4881_v19  ;;  %v672_v24 = vmul.f32 %v665_v3, %v654_v9  ;;  %v676_v25 = vmul.f32 %v670_v4, %v658_v7 }
 0x160   : > { %v661_v27 = vmul.f32 %v4501_v13, %v4885_v22  ;;  %v657_v28 = vmul.f32 %v4501_v13, %v4883_v21  ;;  %v674_v29 = vmul.f32 %v665_v3, %v656_v12  ;;  %v678_v30 = vmul.f32 %v670_v4, %v660_v11 }
 0x161   : > { %v673_v32 = vmul.f32 %v665_v3, %v655_v23  ;;  %v4896_v16 = vadd.f32 %v683_v26, %v672_v24  ;;  %v677_v15 = vmul.f32 %v670_v4, %v659_v14  ;;  %v4898_v18 = vadd.f32 %v688_v31, %v676_v25 }
 0x162   : > { %v675_v17 = vmul.f32 %v665_v3, %v657_v28  ;;  %v4900_v20 = vadd.f32 %v683_v26, %v674_v29  ;;  %v679_v19 = vmul.f32 %v670_v4, %v661_v27  ;;  %v4902_v33 = vadd.f32 %v688_v31, %v678_v30 }
 0x163   : > { %v4904_v34 = vadd.f32 %v683_v26, %v673_v32  ;;  %v698_v21 = vmul.f32 %v4896_v16, %v4896_v16  ;;  %v4908_v22 = vadd.f32 %v688_v31, %v677_v15  ;;  %v702_v35 = vmul.f32 %v4898_v18, %v4898_v18 }
 0x164   : > { %v4912_v36 = vadd.f32 %v683_v26, %v675_v17  ;;  %v700_v37 = vmul.f32 %v4900_v20, %v4900_v20  ;;  %v4916_v38 = vadd.f32 %v688_v31, %v679_v19  ;;  %v704_v39 = vmul.f32 %v4902_v33, %v4902_v33 }
 0x165   : > { %v699_v40 = vmul.f32 %v4904_v34, %v4904_v34  ;;  %v706_v41 = vmul.f32 %v698_v21, %v4896_v16  ;;  %v703_v42 = vmul.f32 %v4908_v22, %v4908_v22  ;;  %v710_v43 = vmul.f32 %v702_v35, %v4898_v18 }
 0x166   : > { %v701_v44 = vmul.f32 %v4912_v36, %v4912_v36  ;;  %v708_v45 = vmul.f32 %v700_v37, %v4900_v20  ;;  %v705_v46 = vmul.f32 %v4916_v38, %v4916_v38  ;;  %v712_v47 = vmul.f32 %v704_v39, %v4902_v33 }
 0x167   : > { %v714_v48 = vmul.f32 0.044715, %v706_v41  ;;  %v711_v49 = vmul.f32 %v703_v42, %v4908_v22  ;;  %v718_v50 = vmul.f32 0.044715, %v710_v43  ;;  %v707_v51 = vmul.f32 %v699_v40, %v4904_v34 }
 0x168   : > { %v716_v52 = vmul.f32 0.044715, %v708_v45  ;;  %v713_v53 = vmul.f32 %v705_v46, %v4916_v38  ;;  %v720_v54 = vmul.f32 0.044715, %v712_v47  ;;  %v709_v55 = vmul.f32 %v701_v44, %v4912_v36 }
 0x169   : > { %v726_v56 = vadd.f32 %v718_v50, %v4898_v18  ;;  %v715_v57 = vmul.f32 0.044715, %v707_v51  ;;  %v719_v58 = vmul.f32 0.044715, %v711_v49  ;;  %v722_v59 = vadd.f32 %v714_v48, %v4896_v16 }
 0x16a   : > { %v717_v60 = vmul.f32 0.044715, %v709_v55  ;;  %v721_v61 = vmul.f32 0.044715, %v713_v53  ;;  %v724_v62 = vadd.f32 %v716_v52, %v4900_v20  ;;  %v728_v3 = vadd.f32 %v720_v54, %v4902_v33  ;;  %v780_v54 = vpop.permute.xlu1 %779 }
 0x16b   : > { %v734_v63 = vmul.f32 0.7978846, %v726_v56  ;;  %v723_v0 = vadd.f32 %v715_v57, %v4904_v34  ;;  %v727_v1 = vadd.f32 %v719_v58, %v4908_v22  ;;  %v730_v2 = vmul.f32 0.7978846, %v722_v59 }
 0x16c   : > { %v725_v4 = vadd.f32 %v717_v60, %v4912_v36  ;;  %v729_v5 = vadd.f32 %v721_v61, %v4916_v38  ;;  %v732_v11 = vmul.f32 0.7978846, %v724_v62  ;;  %v736_v12 = vmul.f32 0.7978846, %v728_v3 }
 0x16d   : > { %v731_v6 = vmul.f32 0.7978846, %v723_v0  ;;  %v735_v7 = vmul.f32 0.7978846, %v727_v1  ;;  %4502 = vtanh.f32 %v730_v2 }
 0x16e   : > { %v733_v9 = vmul.f32 0.7978846, %v725_v4  ;;  %v737_v10 = vmul.f32 0.7978846, %v729_v5  ;;  %4504 = vtanh.f32 %v734_v63 }
 0x16f   : > { %4506 = vtanh.f32 %v731_v6 }
 0x170   : > { %4508 = vtanh.f32 %v735_v7 }
 0x171   : > { %4510 = vtanh.f32 %v733_v9 }
 0x172   : > { %4512 = vtanh.f32 %v737_v10 }
 0x173   : > { %4514 = vtanh.f32 %v732_v11 }
 0x174   : > { %4516 = vtanh.f32 %v736_v12 }
 0x177   : > { %v4503_v13 = vpop.eup %4502 }
 0x178   : > { %v4505_v14 = vpop.eup %4504  ;;  %v746_v23 = vadd.f32 1.0, %v4503_v13 }
 0x179   : > { %v4507_v24 = vpop.eup %4506  ;;  %v750_v25 = vadd.f32 1.0, %v4505_v14 }
 0x17a   : > { %v4509_v26 = vpop.eup %4508  ;;  %v747_v27 = vadd.f32 1.0, %v4507_v24  ;;  %v754_v28 = vmul.f32 0.5, %v746_v23 }
 0x17b   : > { %v4511_v29 = vpop.eup %4510  ;;  %v751_v30 = vadd.f32 1.0, %v4509_v26  ;;  %v758_v31 = vmul.f32 0.5, %v750_v25 }
 0x17c   : > { %v4513_v32 = vpop.eup %4512  ;;  %v755_v15 = vmul.f32 0.5, %v747_v27  ;;  %v749_v17 = vadd.f32 1.0, %v4511_v29  ;;  %v762_v19 = vmul.f32 %v754_v28, %v4896_v16 }
 0x17d   : > { %v4515_v21 = vpop.eup %4514  ;;  %v759_v35 = vmul.f32 0.5, %v751_v30  ;;  %v753_v37 = vadd.f32 1.0, %v4513_v32  ;;  %v766_v39 = vmul.f32 %v758_v31, %v4898_v18 }
 0x17e   : > { %v4517_v40 = vpop.eup %4516  ;;  %v763_v41 = vmul.f32 %v755_v15, %v4904_v34  ;;  %v757_v42 = vmul.f32 0.5, %v749_v17  ;;  %v748_v43 = vadd.f32 1.0, %v4515_v21 }
 0x17f   : > { %v767_v44 = vmul.f32 %v759_v35, %v4908_v22  ;;  %v761_v45 = vmul.f32 0.5, %v753_v37  ;;  %v4405_v46 = vpack.c.bf16 %v766_v39, %v762_v19  ;;  %v752_v47 = vadd.f32 1.0, %v4517_v40  ;;  %v770_v22 = vld [vmem:[%s6870_s4] sm:$0xff] }
 0x180   : > { %v765_v48 = vmul.f32 %v757_v42, %v4912_v36  ;;  %v756_v49 = vmul.f32 0.5, %v748_v43 }
 0x181   : > { %v4403_v50 = vpack.c.bf16 %v767_v44, %v763_v41  ;;  %v769_v16 = vmul.f32 %v761_v45, %v4916_v38  ;;  %v760_v51 = vmul.f32 0.5, %v752_v47  ;;  %v775_v38 = vpop.permute.xlu0 %774 }
 0x182   : > { %v764_v52 = vmul.f32 %v756_v49, %v4900_v20  ;;  %v771_v20 = vld [vmem:[%s6870_s4 + $0x8] sm:$0xff] }
 0x183   : > { %4404 = vmatprep.subr.bf16.mxu0 %v4403_v50  ;;  %v4407_v18 = vpack.c.bf16 %v769_v16, %v765_v48  ;;  %v768_v34 = vmul.f32 %v760_v51, %v4902_v33 }
 0x184   : > { %4406 = vmatpush1.bf16.msra.mxu0 %v4405_v46 }
 0x185   : > { %4408 = vmatprep.subr.bf16.mxu1 %v4407_v18  ;;  %v4409_v53 = vpack.c.bf16 %v768_v34, %v764_v52 }
 0x187   : > { %4410 = vmatpush1.bf16.msra.mxu1 %v4409_v53  ;;  %4369 = vmatmul.mubr.msk.f32.vlgmr.msra.gmra.mrb[4].mxu0 %vm782_vm1, %v770_v22 }
 0x188   : > { %859 = vmatprep.mubr.f32.mxu0 %v4662_v8 }
 0x18a   : > { %4371 = vmatmul.mubr.msk.f32.vlgmr.msra.gmra.mrb[4].mxu1 %vm782_vm1, %v770_v22 }
 0x18b   : > { %936 = vmatprep.mubr.f32.mxu1 %v4662_v8  ;;  %4370 = vmatmul.mubr.msk.f32.gmra.mrb[6].mxu0 %vm782_vm1, %v771_v20 }
 0x18c   : > { %1389 = vmatprep.mubr.f32.mxu0 %v4662_v8 }
 0x18e   : > { %4372 = vmatmul.mubr.msk.f32.gmra.mrb[6].mxu1 %vm782_vm1, %v771_v20 }
 0x18f   : > { %1466 = vmatprep.mubr.f32.mxu1 %v4662_v8 }
 0x25a   : > { %v855_v33 = vpop.f32.mrb[4].mxu0 }
 0x25b   : > { %v857_v36 = vpop.f32.mrb[5].mxu0  ;;  %v856_v58 = vadd.f32 %v855_v33, %v775_v38 }
 0x25c   : > { %v858_v61 = vadd.f32 %v857_v36, %v775_v38 }
 0x25d   : > { %v932_v55 = vpop.f32.mrb[4].mxu1 }
 0x25e   : > { %v934_v56 = vpop.f32.mrb[5].mxu1  ;;  %v861_v57 = vpop.f32.mrb[6].mxu0  ;;  %v933_v1 = vadd.f32 %v932_v55, %v775_v38 }
 0x25f   : > { %v862_v59 = vadd.f32 %v861_v57, %v780_v54  ;;  %v863_v60 = vpop.f32.mrb[7].mxu0  ;;  %v935_v5 = vadd.f32 %v934_v56, %v775_v38 }
 0x260   : > { %v864_v62 = vadd.f32 %v863_v60, %v780_v54 }
 0x261   : > { %v943_v63 = vadd.f32 %v862_v59, %v856_v58  ;;  %v938_v0 = vpop.f32.mrb[6].mxu1 }
 0x262   : > { %v939_v2 = vadd.f32 %v938_v0, %v780_v54  ;;  %v950_v3 = vadd.f32 %v864_v62, %v858_v61  ;;  %v940_v4 = vpop.f32.mrb[7].mxu1 }
 0x263   : > { %v944_v6 = vrot.slane %v943_v63, 4  ;;  %v941_v7 = vadd.f32 %v940_v4, %v780_v54 }
 0x264   : > { %v957_v9 = vadd.f32 %v939_v2, %v933_v1  ;;  %v951_v10 = vrot.slane %v950_v3, 4 }
 0x265   : > { %v945_v11 = vadd.f32 %v944_v6, %v943_v63  ;;  %v964_v12 = vadd.f32 %v941_v7, %v935_v5 }
 0x266   : > { %v958_v13 = vrot.slane %v957_v9, 4  ;;  %v952_v14 = vadd.f32 %v951_v10, %v950_v3 }
 0x267   : > { %v946_v23 = vrot.slane %v945_v11, 2  ;;  %v965_v24 = vrot.slane %v964_v12, 4 }
 0x268   : > { %v959_v25 = vadd.f32 %v958_v13, %v957_v9  ;;  %v953_v26 = vrot.slane %v952_v14, 2 }
 0x269   : > { %v947_v27 = vadd.f32 %v946_v23, %v945_v11  ;;  %v966_v28 = vadd.f32 %v965_v24, %v964_v12 }
 0x26a   : > { %v960_v29 = vrot.slane %v959_v25, 2  ;;  %v954_v30 = vadd.f32 %v953_v26, %v952_v14 }
 0x26b   : > { %v948_v31 = vrot.slane %v947_v27, 1  ;;  %v967_v32 = vrot.slane %v966_v28, 2 }
 0x26c   : > { %v961_v15 = vadd.f32 %v960_v29, %v959_v25  ;;  %v955_v17 = vrot.slane %v954_v30, 1 }
 0x26d   : > { %v949_v19 = vadd.f32 %v948_v31, %v947_v27  ;;  %v968_v21 = vadd.f32 %v967_v32, %v966_v28 }
 0x26e   : > { %v962_v35 = vrot.slane %v961_v15, 1  ;;  %v956_v37 = vadd.f32 %v955_v17, %v954_v30 }
 0x26f   : > { %v971_v39 = vmul.f32 0.0625, %v949_v19  ;;  %v969_v40 = vrot.slane %v968_v21, 1  ;;  %v1042_v19 = vpop.permute.xlu0 %1041 }
 0x270   : > { %v963_v41 = vadd.f32 %v962_v35, %v961_v15  ;;  %v972_v42 = vmul.f32 0.0625, %v956_v37 }
 0x271   : > { %v4966_v43 = vsub.f32 %v856_v58, %v971_v39  ;;  %v4968_v44 = vsub.f32 %v862_v59, %v971_v39  ;;  %v970_v45 = vadd.f32 %v969_v40, %v968_v21  ;;  %v1047_v21 = vpop.permute.xlu1 %1046 }
 0x272   : > { %v973_v46 = vmul.f32 0.0625, %v963_v41  ;;  %v976_v47 = vsub.f32 %v858_v61, %v972_v42  ;;  %v980_v48 = vsub.f32 %v864_v62, %v972_v42 }
 0x273   : > { %v983_v49 = vmul.f32 %v4966_v43, %v4966_v43  ;;  %v987_v50 = vmul.f32 %v4968_v44, %v4968_v44  ;;  %v974_v16 = vmul.f32 0.0625, %v970_v45 }
 0x274   : > { %v4974_v51 = vsub.f32 %v933_v1, %v973_v46  ;;  %v4976_v52 = vsub.f32 %v939_v2, %v973_v46  ;;  %v984_v18 = vmul.f32 %v976_v47, %v976_v47  ;;  %v988_v34 = vmul.f32 %v980_v48, %v980_v48 }
 0x275   : > { %v991_v22 = vadd.f32 %v987_v50, %v983_v49  ;;  %v4978_v53 = vsub.f32 %v935_v5, %v974_v16  ;;  %v4980_v20 = vsub.f32 %v941_v7, %v974_v16  ;;  %v1060_v16 = vpop.permute.xlu0 %1059 }
 0x276   : > { %v985_v33 = vmul.f32 %v4974_v51, %v4974_v51  ;;  %v989_v36 = vmul.f32 %v4976_v52, %v4976_v52  ;;  %v998_v38 = vadd.f32 %v988_v34, %v984_v18  ;;  %v1065_v18 = vpop.permute.xlu1 %1064 }
 0x277   : > { %v992_v54 = vrot.slane %v991_v22, 4  ;;  %v986_v55 = vmul.f32 %v4978_v53, %v4978_v53  ;;  %v990_v56 = vmul.f32 %v4980_v20, %v4980_v20 }
 0x278   : > { %v1005_v57 = vadd.f32 %v989_v36, %v985_v33  ;;  %v999_v58 = vrot.slane %v998_v38, 4 }
 0x279   : > { %v993_v59 = vadd.f32 %v992_v54, %v991_v22  ;;  %v1012_v60 = vadd.f32 %v990_v56, %v986_v55 }
 0x27a   : > { %v1006_v61 = vrot.slane %v1005_v57, 4  ;;  %v1000_v62 = vadd.f32 %v999_v58, %v998_v38 }
 0x27b   : > { %v994_v63 = vrot.slane %v993_v59, 2  ;;  %v1013_v0 = vrot.slane %v1012_v60, 4 }
 0x27c   : > { %v1007_v1 = vadd.f32 %v1006_v61, %v1005_v57  ;;  %v1001_v2 = vrot.slane %v1000_v62, 2 }
 0x27d   : > { %v995_v3 = vadd.f32 %v994_v63, %v993_v59  ;;  %v1014_v4 = vadd.f32 %v1013_v0, %v1012_v60 }
 0x27e   : > { %v1008_v5 = vrot.slane %v1007_v1, 2  ;;  %v1002_v6 = vadd.f32 %v1001_v2, %v1000_v62 }
 0x27f   : > { %v996_v7 = vrot.slane %v995_v3, 1  ;;  %v1015_v9 = vrot.slane %v1014_v4, 2 }
 0x280   : > { %v1009_v10 = vadd.f32 %v1008_v5, %v1007_v1  ;;  %v1003_v11 = vrot.slane %v1002_v6, 1 }
 0x281   : > { %v997_v12 = vadd.f32 %v996_v7, %v995_v3  ;;  %v1016_v13 = vadd.f32 %v1015_v9, %v1014_v4 }
 0x282   : > { %v1010_v14 = vrot.slane %v1009_v10, 1  ;;  %v1004_v23 = vadd.f32 %v1003_v11, %v1002_v6 }
 0x283   : > { %v1019_v24 = vmul.f32 0.0625, %v997_v12  ;;  %v1017_v25 = vrot.slane %v1016_v13, 1 }
 0x284   : > { %v1011_v26 = vadd.f32 %v1010_v14, %v1009_v10  ;;  %v1020_v27 = vmul.f32 0.0625, %v1004_v23 }
 0x285   : > { %v1023_v28 = vadd.f32 1e-05, %v1019_v24  ;;  %v1018_v29 = vadd.f32 %v1017_v25, %v1016_v13 }
 0x286   : > { %v1021_v30 = vmul.f32 0.0625, %v1011_v26  ;;  %v1024_v31 = vadd.f32 1e-05, %v1020_v27 }
 0x287   : > { %4518 = vrsqrt.f32 %v1023_v28  ;;  %v1022_v32 = vmul.f32 0.0625, %v1018_v29 }
 0x288   : > { %v1025_v15 = vadd.f32 1e-05, %v1021_v30  ;;  %4520 = vrsqrt.f32 %v1024_v31 }
 0x289   : > { %v1026_v17 = vadd.f32 1e-05, %v1022_v32 }
 0x28a   : > { %4522 = vrsqrt.f32 %v1025_v15 }
 0x28b   : > { %4524 = vrsqrt.f32 %v1026_v17 }
 0x291   : > { %v4519_v35 = vpop.eup %4518 }
 0x292   : > { %v4521_v37 = vpop.eup %4520  ;;  %v1031_v39 = vmul.f32 %v4519_v35, %v4966_v43  ;;  %v1035_v40 = vmul.f32 %v4519_v35, %v4968_v44 }
 0x293   : > { %v1032_v41 = vmul.f32 %v4521_v37, %v976_v47  ;;  %v1036_v42 = vmul.f32 %v4521_v37, %v980_v48 }
 0x294   : > { %v4523_v45 = vpop.eup %4522  ;;  %v1049_v46 = vmul.f32 %v1042_v19, %v1031_v39  ;;  %v1053_v49 = vmul.f32 %v1047_v21, %v1035_v40 }
 0x295   : > { %v4525_v50 = vpop.eup %4524  ;;  %v1033_v34 = vmul.f32 %v4523_v45, %v4974_v51  ;;  %v1037_v22 = vmul.f32 %v4523_v45, %v4976_v52  ;;  %v1050_v33 = vmul.f32 %v1042_v19, %v1032_v41  ;;  %v1054_v36 = vmul.f32 %v1047_v21, %v1036_v42 }
 0x296   : > { %v4994_v38 = vadd.f32 %v1060_v16, %v1049_v46  ;;  %v4996_v54 = vadd.f32 %v1065_v18, %v1053_v49  ;;  %v1034_v43 = vmul.f32 %v4525_v50, %v4978_v53  ;;  %v1038_v44 = vmul.f32 %v4525_v50, %v4980_v20 }
 0x297   : > { %v1051_v47 = vmul.f32 %v1042_v19, %v1033_v34  ;;  %v1055_v48 = vmul.f32 %v1047_v21, %v1037_v22  ;;  %v5000_v55 = vadd.f32 %v1060_v16, %v1050_v33  ;;  %v5002_v56 = vadd.f32 %v1065_v18, %v1054_v36 }
 0x298   : > { %v1079_v51 = vmul.f32 %v4996_v54, %v4996_v54  ;;  %v1052_v52 = vmul.f32 %v1042_v19, %v1034_v43  ;;  %v1056_v57 = vmul.f32 %v1047_v21, %v1038_v44  ;;  %v1075_v58 = vmul.f32 %v4994_v38, %v4994_v38 }
 0x299   : > { %v5008_v59 = vadd.f32 %v1060_v16, %v1051_v47  ;;  %v5010_v60 = vadd.f32 %v1065_v18, %v1055_v48  ;;  %v1080_v53 = vmul.f32 %v5002_v56, %v5002_v56  ;;  %v1076_v20 = vmul.f32 %v5000_v55, %v5000_v55 }
 0x29a   : > { %v1087_v61 = vmul.f32 %v1079_v51, %v4996_v54  ;;  %v5017_v62 = vadd.f32 %v1060_v16, %v1052_v52  ;;  %v5019_v63 = vadd.f32 %v1065_v18, %v1056_v57  ;;  %v1083_v0 = vmul.f32 %v1075_v58, %v4994_v38 }
 0x29b   : > { %v1081_v1 = vmul.f32 %v5010_v60, %v5010_v60  ;;  %v1088_v2 = vmul.f32 %v1080_v53, %v5002_v56  ;;  %v1084_v3 = vmul.f32 %v1076_v20, %v5000_v55  ;;  %v1077_v4 = vmul.f32 %v5008_v59, %v5008_v59 }
 0x29c   : > { %v1095_v5 = vmul.f32 0.044715, %v1087_v61  ;;  %v1082_v6 = vmul.f32 %v5019_v63, %v5019_v63  ;;  %v1078_v7 = vmul.f32 %v5017_v62, %v5017_v62  ;;  %v1091_v9 = vmul.f32 0.044715, %v1083_v0 }
 0x29d   : > { %v1089_v10 = vmul.f32 %v1081_v1, %v5010_v60  ;;  %v1096_v11 = vmul.f32 0.044715, %v1088_v2  ;;  %v1092_v12 = vmul.f32 0.044715, %v1084_v3  ;;  %v1085_v13 = vmul.f32 %v1077_v4, %v5008_v59 }
 0x29e   : > { %v1090_v14 = vmul.f32 %v1082_v6, %v5019_v63  ;;  %v1086_v23 = vmul.f32 %v1078_v7, %v5017_v62  ;;  %v1099_v24 = vadd.f32 %v1091_v9, %v4994_v38  ;;  %v1103_v25 = vadd.f32 %v1095_v5, %v4996_v54 }
 0x29f   : > { %v1097_v26 = vmul.f32 0.044715, %v1089_v10  ;;  %v1100_v27 = vadd.f32 %v1092_v12, %v5000_v55  ;;  %v1104_v28 = vadd.f32 %v1096_v11, %v5002_v56  ;;  %v1093_v29 = vmul.f32 0.044715, %v1085_v13 }
 0x2a0   : > { %v1098_v30 = vmul.f32 0.044715, %v1090_v14  ;;  %v1094_v31 = vmul.f32 0.044715, %v1086_v23  ;;  %v1107_v32 = vmul.f32 0.7978846, %v1099_v24 }
 0x2a1   : > { %v1108_v15 = vmul.f32 0.7978846, %v1100_v27  ;;  %v1112_v17 = vmul.f32 0.7978846, %v1104_v28  ;;  %v1111_v19 = vmul.f32 0.7978846, %v1103_v25  ;;  %v1101_v21 = vadd.f32 %v1093_v29, %v5008_v59 }
 0x2a2   : > { %v1102_v35 = vadd.f32 %v1094_v31, %v5017_v62  ;;  %v1106_v37 = vadd.f32 %v1098_v30, %v5019_v63  ;;  %4526 = vtanh.f32 %v1107_v32  ;;  %v1105_v39 = vadd.f32 %v1097_v26, %v5010_v60  ;;  %v4384_v14 = vld [vmem:[%s6871_s5 + $0x28] sm:$0xf]  ;;  %v4389_v23 = vld [vmem:[%s6871_s5 + $0x30] sm:$0xff]  ;;  %v4390_v24 = vld [vmem:[%s6871_s5 + $0x38] sm:$0xf] }
 0x2a3   : > { %4528 = vtanh.f32 %v1108_v15  ;;  %v1109_v42 = vmul.f32 0.7978846, %v1101_v21  ;;  %v1171_v25 = vlaneseq  ;;  %v5109_v28 = vld [vmem:[%s4816_s11] sm:$0xff]  ;;  %v5128_v21 = vld [vmem:[%s4816_s11 + $0x10] sm:$0xff] }
 0x2a4   : > { %4530 = vtanh.f32 %v1112_v17  ;;  %v1110_v40 = vmul.f32 0.7978846, %v1102_v35  ;;  %v1114_v41 = vmul.f32 0.7978846, %v1106_v37  ;;  %v1113_v45 = vmul.f32 0.7978846, %v1105_v39 }
 0x2a5   : > { %4532 = vtanh.f32 %v1111_v19  ;;  %v1172_v26 = vshrl.u32 %v1171_v25, 7  ;;  %v5116_v31 = vld [vmem:[%s4819_s17 + $0x20] sm:$0xff]  ;;  %v5136_v39 = vld [vmem:[%s4816_s11 + $0x8] sm:$0xff] }
 0x2a6   : > { %4534 = vtanh.f32 %v1110_v40  ;;  %v5119_v32 = vld [vmem:[%s4819_s17 + $0x40] sm:$0xff] }
 0x2a7   : > { %4536 = vtanh.f32 %v1114_v41  ;;  %v5106_v27 = vsub.s32 1, %v1172_v26  ;;  %v5113_v30 = vsub.s32 2, %v1172_v26  ;;  %v5131_v35 = vld [vmem:[%s4819_s17 + $0x60] sm:$0x7] }
 0x2a8   : > { %4538 = vtanh.f32 %v1109_v42  ;;  %v5139_v40 = vld [vmem:[%s4819_s17] sm:$0xff] }
 0x2a9   : > { %4540 = vtanh.f32 %v1113_v45  ;;  %v1198_v29 = vrot.slane %v5109_v28, %v5106_v27  ;;  %v1259_v19 = vrot.slane %v5109_v28, %v5113_v30  ;;  %v1206_v45 = vrot.slane %v5128_v21, %v5106_v27 }
 0x2ab   : > { %v1211_v15 = vmul.f32 %v1198_v29, %v5116_v31  ;;  %v1215_v17 = vmul.f32 %v1198_v29, %v5119_v32 }
 0x2ac   : > { %v4527_v46 = vpop.eup %4526 }
 0x2ad   : > { %v4529_v49 = vpop.eup %4528  ;;  %v1123_v50 = vadd.f32 1.0, %v4527_v46  ;;  %v1228_v41 = vrot.slane %v1211_v15, 1  ;;  %v1229_v42 = vrot.slane %v1215_v17, 1  ;;  %v1272_v46 = vmul.f32 %v1259_v19, %v5119_v32 }
 0x2ae   : > { %v4531_v16 = vpop.eup %4530  ;;  %v1124_v18 = vadd.f32 1.0, %v4529_v49  ;;  %v1276_v49 = vmul.f32 %v1259_v19, %v5131_v35 }
 0x2af   : > { %v4533_v34 = vpop.eup %4532  ;;  %v1128_v22 = vadd.f32 1.0, %v4531_v16  ;;  %v1131_v33 = vmul.f32 0.5, %v1123_v50  ;;  %v5146_v50 = vld [vmem:[%s4819_s17 + $0x30] sm:$0xff] }
 0x2b0   : > { %v4535_v36 = vpop.eup %4534  ;;  %v1132_v43 = vmul.f32 0.5, %v1124_v18  ;;  %v1127_v44 = vadd.f32 1.0, %v4533_v34  ;;  %v5149_v16 = vld [vmem:[%s4819_s17 + $0x50] sm:$0xff]  ;;  %v1202_v18 = vrot.slane %v5136_v39, %v5106_v27  ;;  %v5153_v34 = vsub.s32 3, %v1172_v26 }
 0x2b1   : > { %v4537_v47 = vpop.eup %4536  ;;  %v1136_v48 = vmul.f32 0.5, %v1128_v22  ;;  %v1126_v51 = vadd.f32 1.0, %v4535_v36  ;;  %v1139_v20 = vmul.f32 %v1131_v33, %v4994_v38  ;;  %v5155_v22 = vsub.s32 4, %v1172_v26 }
 0x2b2   : > { %v4539_v52 = vpop.eup %4538  ;;  %v1140_v57 = vmul.f32 %v1132_v43, %v5000_v55  ;;  %v1130_v58 = vadd.f32 1.0, %v4537_v47  ;;  %v1135_v53 = vmul.f32 0.5, %v1127_v44  ;;  %v5160_v43 = vld [vmem:[%s4819_s17 + $0x28] sm:$0xff]  ;;  %v1230_v47 = vsel %vm1227_vm2, %v1228_v41, %v1229_v42 }
 0x2b3   : > { %v4541_v61 = vpop.eup %4540  ;;  %v1144_v0 = vmul.f32 %v1136_v48, %v5002_v56  ;;  %v1134_v1 = vmul.f32 0.5, %v1126_v51  ;;  %v1125_v2 = vadd.f32 1.0, %v4539_v52  ;;  %v5163_v44 = vld [vmem:[%s4819_s17 + $0x48] sm:$0xff]  ;;  %v1213_v51 = vmul.f32 %v1206_v45, %v5146_v50 }
 0x2b4   : > { %v1138_v3 = vmul.f32 0.5, %v1130_v58  ;;  %v1143_v4 = vmul.f32 %v1135_v53, %v4996_v54  ;;  %v1129_v5 = vadd.f32 1.0, %v4541_v61  ;;  %v1317_v54 = vld [vmem:[%s6871_s5] sm:$0xff]  ;;  %v1217_v52 = vmul.f32 %v1206_v45, %v5149_v16 }
 0x2b5   : > { %v4411_v6 = vpack.c.bf16 %v1144_v0, %v1140_v57  ;;  %v1142_v7 = vmul.f32 %v1134_v1, %v5017_v62  ;;  %v1133_v9 = vmul.f32 0.5, %v1125_v2  ;;  %v1318_v62 = vld [vmem:[%s6871_s5 + $0x8] sm:$0xf]  ;;  %v5171_v57 = vld [vmem:[%s4816_s11 + $0x18] sm:$0xff]  ;;  %v5173_v58 = vsub.s32 5, %v1172_v26 }
 0x2b6   : > { %v1146_v10 = vmul.f32 %v1138_v3, %v5019_v63  ;;  %v4413_v55 = vpack.c.bf16 %v1143_v4, %v1139_v20  ;;  %v1137_v11 = vmul.f32 0.5, %v1129_v5  ;;  %v4383_v63 = vld [vmem:[%s6871_s5 + $0x20] sm:$0xff]  ;;  %v1289_v53 = vrot.slane %v1272_v46, 2  ;;  %v5178_v0 = vld [vmem:[%s4819_s17 + $0x70] sm:$0x7] }
 0x2b7   : > { %4412 = vmatprep.subr.bf16.mxu0 %v4411_v6  ;;  %v1141_v38 = vmul.f32 %v1133_v9, %v5008_v59  ;;  %v4377_v59 = vld [vmem:[%s6871_s5 + $0x10] sm:$0xff]  ;;  %v1290_v20 = vrot.slane %v1276_v49, 2  ;;  %v1267_v61 = vrot.slane %v5128_v21, %v5113_v30  ;;  %v1212_v1 = vmul.f32 %v1202_v18, %v5160_v43 }
 0x2b8   : > { %v4415_v12 = vpack.c.bf16 %v1146_v10, %v1142_v7  ;;  %4414 = vmatpush1.bf16.msra.mxu0 %v4413_v55  ;;  %v1145_v56 = vmul.f32 %v1137_v11, %v5010_v60  ;;  %v4378_v60 = vld [vmem:[%s6871_s5 + $0x18] sm:$0xf]  ;;  %v1216_v2 = vmul.f32 %v1202_v18, %v5163_v44  ;;  %v1263_v3 = vrot.slane %v5136_v39, %v5113_v30  ;;  %v5187_v7 = vld [vmem:[%s4819_s17 + $0x68] sm:$0x7] }
 0x2b9   : > { %4420 = vmatprep.subr.bf16.mxu0 %v4411_v6  ;;  %v5184_v4 = vsub.s32 7, %v1172_v26  ;;  %v1210_v9 = vrot.slane %v5171_v57, %v5106_v27  ;;  %v5191_v10 = vsub.s32 6, %v1172_v26  ;;  %v1234_v11 = vrot.slane %v1213_v51, 1 }
 0x2ba   : > { %4416 = vmatprep.subr.bf16.mxu1 %v4415_v12  ;;  %v4417_v13 = vpack.c.bf16 %v1145_v56, %v1141_v38  ;;  %v1235_v38 = vrot.slane %v1217_v52, 1  ;;  %v5198_v56 = vld [vmem:[%s4819_s17 + $0x58] sm:$0xff]  ;;  %v1277_v25 = vmul.f32 %v1263_v3, %v5187_v7  ;;  %v1271_v17 = vrot.slane %v5171_v57, %v5113_v30 }
 0x2bb   : > { %4373 = vmatmul.mubr.msk.f32.vlgmr.msra.gmra.mrb[8].mxu0 %vm782_vm1, %v1317_v54  ;;  %v5217_v15 = vmul.f32 %v1210_v9, %v5198_v56  ;;  %v5234_v52 = vld [vmem:[%s4819_s17 + $0x18] sm:$0xff] }
 0x2bc   : > { %4418 = vmatpush1.bf16.msra.mxu1 %v4417_v13  ;;  %4422 = vmatpush1.bf16.msra.mxu0 %v4413_v55  ;;  %v1293_v51 = vrot.slane %v1277_v25, 2 }
 0x2bd   : > { %4424 = vmatprep.subr.bf16.mxu1 %v4415_v12  ;;  %4428 = vmatprep.subr.bf16.mxu0 %v4411_v6 }
 0x2be   : > { %1395 = vmatprep.mubr.f32.mxu0 %v4662_v8 }
 0x2bf   : > { %4375 = vmatmul.mubr.msk.f32.vlgmr.msra.gmra.mrb[8].mxu1 %vm782_vm1, %v1317_v54  ;;  %4374 = vmatmul.mubr.msk.f32.gmra.mrb[10].mxu0 %vm782_vm1, %v1318_v62  ;;  %v1291_v54 = vsel %vm1288_vm3, %v1289_v53, %v1290_v20 }
 0x2c0   : > { %4426 = vmatpush1.bf16.msra.mxu1 %v4417_v13  ;;  %1472 = vmatprep.mubr.f32.mxu1 %v4662_v8 }
 0x2c1   : > { %4432 = vmatprep.subr.bf16.mxu1 %v4415_v12  ;;  %2129 = vmatprep.mubr.f32.mxu0 %v4662_v8 }
 0x2c3   : > { %4376 = vmatmul.mubr.msk.f32.gmra.mrb[10].mxu1 %vm782_vm1, %v1318_v62  ;;  %4379 = vmatmul.mubr.msk.f32.vlgmr.msra.gmra.mrb[12].mxu0 %vm782_vm1, %v4377_v59  ;;  %v1274_v62 = vmul.f32 %v1267_v61, %v5149_v16 }
 0x2c4   : > { %2206 = vmatprep.mubr.f32.mxu1 %v4662_v8  ;;  %4430 = vmatpush1.bf16.msra.mxu0 %v4413_v55 }
 0x2c5   : > { %4436 = vmatprep.subr.bf16.mxu0 %v4411_v6  ;;  %2135 = vmatprep.mubr.f32.mxu0 %v4662_v8  ;;  %v1295_v45 = vrot.slane %v1274_v62, 2  ;;  %v1999_v62 = vrot.slane %v5109_v28, %v5173_v58 }
 0x2c7   : > { %4381 = vmatmul.mubr.msk.f32.vlgmr.msra.gmra.mrb[12].mxu1 %vm782_vm1, %v4377_v59  ;;  %4380 = vmatmul.mubr.msk.f32.gmra.mrb[14].mxu0 %vm782_vm1, %v4378_v60  ;;  %v1278_v59 = vmul.f32 %v1267_v61, %v5178_v0  ;;  %v1275_v61 = vmul.f32 %v1271_v17, %v5198_v56 }
 0x2c8   : > { %4434 = vmatpush1.bf16.msra.mxu1 %v4417_v13  ;;  %2212 = vmatprep.mubr.f32.mxu1 %v4662_v8 }
 0x2c9   : > { %4440 = vmatprep.subr.bf16.mxu1 %v4415_v12  ;;  %2884 = vmatprep.mubr.f32.mxu0 %v4662_v8  ;;  %v5195_v12 = vld [vmem:[%s4819_s17 + $0x38] sm:$0xff]  ;;  %v1296_v46 = vrot.slane %v1278_v59, 2 }
 0x2ca   : > { %v1214_v29 = vmul.f32 %v1210_v9, %v5195_v12 }
 0x2cb   : > { %4382 = vmatmul.mubr.msk.f32.gmra.mrb[14].mxu1 %vm782_vm1, %v4378_v60  ;;  %4385 = vmatmul.mubr.msk.f32.vlgmr.msra.gmra.mrb[16].mxu0 %vm782_vm1, %v4383_v63 }
 0x2cc   : > { %2961 = vmatprep.mubr.f32.mxu1 %v4662_v8  ;;  %4438 = vmatpush1.bf16.msra.mxu0 %v4413_v55  ;;  %v1237_v53 = vrot.slane %v1214_v29, 1 }
 0x2cd   : > { %2890 = vmatprep.mubr.f32.mxu0 %v4662_v8 }
 0x2cf   : > { %4387 = vmatmul.mubr.msk.f32.vlgmr.msra.gmra.mrb[16].mxu1 %vm782_vm1, %v4383_v63  ;;  %4386 = vmatmul.mubr.msk.f32.gmra.mrb[18].mxu0 %vm782_vm1, %v4384_v14  ;;  %v5209_v63 = vld [vmem:[%s4819_s17 + $0x8] sm:$0xff] }
 0x2d0   : > { %4442 = vmatpush1.bf16.msra.mxu1 %v4417_v13  ;;  %2967 = vmatprep.mubr.f32.mxu1 %v4662_v8  ;;  %v5202_v13 = vld [vmem:[%s4819_s17 + $0x10] sm:$0xff] }
 0x2d1   : > { %3639 = vmatprep.mubr.f32.mxu0 %v4662_v8 }
 0x2d3   : > { %4388 = vmatmul.mubr.msk.f32.gmra.mrb[18].mxu1 %vm782_vm1, %v4384_v14  ;;  %4391 = vmatmul.mubr.msk.f32.vlgmr.msra.gmra.mrb[20].mxu0 %vm782_vm1, %v4389_v23  ;;  %v1231_v14 = vrot.slane %v1212_v1, 1  ;;  %v1947_v1 = vrot.slane %v5128_v21, %v5155_v22 }
 0x2d4   : > { %3716 = vmatprep.mubr.f32.mxu1 %v4662_v8  ;;  %3645 = vmatprep.mubr.f32.mxu0 %v4662_v8 }
 0x2d5   : > { %v1954_v25 = vmul.f32 %v1947_v1, %v5146_v50  ;;  %v1958_v29 = vmul.f32 %v1947_v1, %v5149_v16 }
 0x2d7   : > { %4393 = vmatmul.mubr.msk.f32.vlgmr.msra.gmra.mrb[20].mxu1 %vm782_vm1, %v4389_v23  ;;  %4392 = vmatmul.mubr.msk.f32.gmra.mrb[22].mxu0 %vm782_vm1, %v4390_v24  ;;  %v1232_v23 = vrot.slane %v1216_v2, 1  ;;  %v1975_v1 = vrot.slane %v1958_v29, 1 }
 0x2d8   : > { %3722 = vmatprep.mubr.f32.mxu1 %v4662_v8  ;;  %v5121_v8 = vsub.s32 0, %v1172_v26 }
 0x2da   : > { %v1174_v37 = vrot.slane %v5109_v28, %v5121_v8  ;;  %v1182_v48 = vrot.slane %v5128_v21, %v5121_v8  ;;  %v1178_v60 = vrot.slane %v5136_v39, %v5121_v8 }
 0x2db   : > { %4394 = vmatmul.mubr.msk.f32.gmra.mrb[22].mxu1 %vm782_vm1, %v4390_v24  ;;  %v1273_v24 = vmul.f32 %v1263_v3, %v5163_v44 }
 0x2dc   : > { %v1187_v33 = vmul.f32 %v1174_v37, %v5139_v40  ;;  %v1191_v36 = vmul.f32 %v1174_v37, %v5116_v31  ;;  %v1193_v55 = vmul.f32 %v1182_v48, %v5146_v50  ;;  %v1189_v19 = vmul.f32 %v1182_v48, %v5202_v13 }
 0x2dd   : > { %v1236_v37 = vsel %vm1227_vm2, %v1234_v11, %v1235_v38  ;;  %v1188_v49 = vmul.f32 %v1178_v60, %v5209_v63  ;;  %v1192_v18 = vmul.f32 %v1178_v60, %v5160_v43  ;;  %v1186_v48 = vrot.slane %v5171_v57, %v5121_v8 }
 0x2de   : > { %v1248_v5 = vadd.f32 %v1230_v47, %v1187_v33  ;;  %v1252_v6 = vadd.f32 %v1229_v42, %v1191_v36  ;;  %v1254_v41 = vadd.f32 %v1235_v38, %v1193_v55  ;;  %v1939_v42 = vrot.slane %v5109_v28, %v5155_v22  ;;  %v5228_v33 = vld [vmem:[%s4819_s17 + $0x78] sm:$0x7] }
 0x2df   : > { %v1233_v36 = vsel %vm1227_vm2, %v1231_v14, %v1232_v23  ;;  %v1292_v47 = vrot.slane %v1273_v24, 2  ;;  %v5243_v3 = vmul.f32 %v1271_v17, %v5228_v33  ;;  %v1250_v55 = vadd.f32 %v1236_v37, %v1189_v19 }
 0x2e0   : > { %v5213_v26 = vadd.f32 %v1290_v20, %v1252_v6  ;;  %v1238_v20 = vrot.slane %v5217_v15, 1  ;;  %v5240_v2 = vadd.f32 %v1291_v54, %v1248_v5  ;;  %v1952_v6 = vmul.f32 %v1939_v42, %v5116_v31 }
 0x2e1   : > { %v1956_v9 = vmul.f32 %v1939_v42, %v5119_v32  ;;  %v1297_v11 = vsel %vm1288_vm3, %v1295_v45, %v1296_v46  ;;  %v5248_v38 = vadd.f32 %v1296_v46, %v1254_v41  ;;  %v1249_v59 = vadd.f32 %v1233_v36, %v1188_v49 }
 0x2e2   : > { %v1253_v60 = vadd.f32 %v1232_v23, %v1192_v18  ;;  %v1294_v5 = vsel %vm1288_vm3, %v1292_v47, %v1293_v51  ;;  %v1190_v54 = vmul.f32 %v1186_v48, %v5234_v52  ;;  %v1239_v14 = vsel %vm1227_vm2, %v1237_v53, %v1238_v20 }
 0x2e3   : > { %v1298_v24 = vrot.slane %v1275_v61, 2  ;;  %v6877_v15 = vrot.slane %v5243_v3, 2  ;;  %v1915_v17 = vrot.slane %v5109_v28, %v5153_v34  ;;  %v1968_v19 = vrot.slane %v1952_v6, 1 }
 0x2e4   : > { %v1969_v37 = vrot.slane %v1956_v9, 1  ;;  %v5260_v41 = vadd.f32 %v1297_v11, %v1250_v55  ;;  %v2012_v23 = vmul.f32 %v1999_v62, %v5119_v32  ;;  %v5264_v42 = vmul.f32 %v1999_v62, %v5131_v35 }
 0x2e5   : > { %v1943_v45 = vrot.slane %v5136_v39, %v5155_v22  ;;  %v5268_v46 = vadd.f32 %v1294_v5, %v1249_v59  ;;  %v5270_v49 = vadd.f32 %v1293_v51, %v1253_v60  ;;  %v1923_v18 = vrot.slane %v5128_v21, %v5153_v34 }
 0x2e6   : > { %v2007_v36 = vrot.slane %v5128_v21, %v5173_v58  ;;  %v1194_v47 = vmul.f32 %v1186_v48, %v5195_v12  ;;  %v1251_v53 = vadd.f32 %v1239_v14, %v1190_v54  ;;  %v1974_v61 = vrot.slane %v1954_v25, 1 }
 0x2e7   : > { %6926 = vst [vmem:[#allocation9_spill] sm:$0xff] %v5268_v46  ;;  %6927 = vst [vmem:[#allocation10_spill] sm:$0xff] %v5270_v49  ;;  %v1300_v6 = vsel %vm1288_vm3, %v1298_v24, %v6877_v15  ;;  %v1928_v9 = vmul.f32 %v1915_v17, %v5139_v40  ;;  %v1932_v51 = vmul.f32 %v1915_v17, %v5116_v31  ;;  %v2028_v11 = vrot.slane %v2012_v23, 2  ;;  %v1153_v15 = vld [vmem:[%s4816_s11 + $0x30] sm:$0xf] }
 0x2e8   : > { %v1970_v55 = vsel %vm1227_vm2, %v1968_v19, %v1969_v37  ;;  %v6876_v62 = vrot.slane %v5264_v42, 2  ;;  %v1953_v59 = vmul.f32 %v1943_v45, %v5160_v43  ;;  %v5286_v48 = vmul.f32 %v1943_v45, %v5163_v44 }
 0x2e9   : > { %v1930_v60 = vmul.f32 %v1923_v18, %v5202_v13  ;;  %v5290_v5 = vmul.f32 %v2007_v36, %v5149_v16  ;;  %v5293_v54 = vmul.f32 %v2007_v36, %v5178_v0  ;;  %v2003_v14 = vrot.slane %v5136_v39, %v5173_v58 }
 0x2ea   : > { %v5297_v24 = vadd.f32 %v1238_v20, %v1194_v47  ;;  %v1934_v25 = vmul.f32 %v1923_v18, %v5146_v50  ;;  %v1976_v29 = vsel %vm1227_vm2, %v1974_v61, %v1975_v1  ;;  %v1951_v17 = vrot.slane %v5171_v57, %v5155_v22 }
 0x2eb   : > { %v5303_v19 = vadd.f32 %v1300_v6, %v1251_v53  ;;  %v5305_v23 = vadd.f32 %v1970_v55, %v1928_v9  ;;  %v5307_v45 = vadd.f32 %v1969_v37, %v1932_v51  ;;  %v2694_v36 = vrot.slane %v5109_v28, %v5184_v4  ;;  %v1151_v51 = vld [vmem:[%s4816_s11 + $0x20] sm:$0xf] }
 0x2ec   : > { %v5314_v20 = vsel %vm1288_vm3, %v2028_v11, %v6876_v62  ;;  %v1919_v18 = vrot.slane %v5136_v39, %v5153_v34  ;;  %v1971_v47 = vrot.slane %v1953_v59, 1  ;;  %v1972_v53 = vrot.slane %v5286_v48, 1 }
 0x2ed   : > { %6928 = vst [vmem:[#allocation11_spill] sm:$0xff] %v5303_v19  ;;  %v5319_v61 = vadd.f32 %v1976_v29, %v1930_v60  ;;  %v2034_v6 = vrot.slane %v5290_v5, 2  ;;  %v2013_v9 = vmul.f32 %v2003_v14, %v5163_v44  ;;  %v5325_v55 = vadd.f32 %v1975_v1, %v1934_v25 }
 0x2ee   : > { %v1955_v11 = vmul.f32 %v1951_v17, %v5195_v12  ;;  %v1959_v62 = vmul.f32 %v1951_v17, %v5198_v56  ;;  %v2011_v59 = vrot.slane %v5171_v57, %v5173_v58  ;;  %v5333_v48 = vmul.f32 %v2003_v14, %v5187_v7 }
 0x2ef   : > { %v2707_v60 = vmul.f32 %v2694_v36, %v5116_v31  ;;  %v2711_v5 = vmul.f32 %v2694_v36, %v5119_v32  ;;  %v2702_v44 = vrot.slane %v5128_v21, %v5184_v4  ;;  %v1929_v1 = vmul.f32 %v1919_v18, %v5209_v63 }
 0x2f0   : > { %v1933_v25 = vmul.f32 %v1919_v18, %v5160_v43  ;;  %v1973_v29 = vsel %vm1227_vm2, %v1971_v47, %v1972_v53  ;;  %v2754_v17 = vrot.slane %v1151_v51, %v5121_v8  ;;  %v2031_v37 = vrot.slane %v2013_v9, 2 }
 0x2f1   : > { %v2709_v19 = vmul.f32 %v2702_v44, %v5146_v50  ;;  %v2713_v7 = vmul.f32 %v2702_v44, %v5149_v16  ;;  %v2762_v14 = vrot.slane %v1153_v15, %v5121_v8  ;;  %v1927_v36 = vrot.slane %v5171_v57, %v5153_v34 }
 0x2f2   : > { %v1977_v49 = vrot.slane %v1955_v11, 1  ;;  %v1978_v46 = vrot.slane %v1959_v62, 1  ;;  %v2015_v63 = vmul.f32 %v2011_v59, %v5198_v56  ;;  %v2019_v43 = vmul.f32 %v2011_v59, %v5228_v33 }
 0x2f3   : > { %v2670_v18 = vrot.slane %v5109_v28, %v5191_v10  ;;  %v2723_v47 = vrot.slane %v2707_v60, 1  ;;  %v2724_v9 = vrot.slane %v2711_v5, 1  ;;  %v2032_v51 = vrot.slane %v5333_v48, 2 }
 0x2f4   : > { %v2767_v44 = vmul.f32 %v2754_v17, %v5119_v32  ;;  %v2771_v15 = vmul.f32 %v2754_v17, %v5131_v35  ;;  %v2678_v57 = vrot.slane %v5128_v21, %v5191_v10  ;;  %v2729_v11 = vrot.slane %v2709_v19, 1 }
 0x2f5   : > { %v2730_v62 = vrot.slane %v2713_v7, 1  ;;  %v2769_v56 = vmul.f32 %v2762_v14, %v5149_v16  ;;  %v2773_v33 = vmul.f32 %v2762_v14, %v5178_v0  ;;  %v1931_v59 = vmul.f32 %v1927_v36, %v5234_v52 }
 0x2f6   : > { %v1935_v28 = vmul.f32 %v1927_v36, %v5195_v12  ;;  %v1979_v60 = vsel %vm1227_vm2, %v1977_v49, %v1978_v46  ;;  %v2037_v48 = vrot.slane %v2015_v63, 2  ;;  %v2038_v5 = vrot.slane %v2019_v43, 2 }
 0x2f7   : > { %v2683_v32 = vmul.f32 %v2670_v18, %v5139_v40  ;;  %v2687_v35 = vmul.f32 %v2670_v18, %v5116_v31  ;;  %v2725_v21 = vsel %vm1227_vm2, %v2723_v47, %v2724_v9  ;;  %v2783_v19 = vrot.slane %v2767_v44, 2 }
 0x2f8   : > { %v2784_v17 = vrot.slane %v2771_v15, 2  ;;  %v2685_v16 = vmul.f32 %v2678_v57, %v5202_v13  ;;  %v2689_v0 = vmul.f32 %v2678_v57, %v5146_v50  ;;  %v6929_v52 = vrot.slane %v5293_v54, 2 }
 0x2f9   : > { %v2731_v49 = vsel %vm1227_vm2, %v2729_v11, %v2730_v62  ;;  %v2789_v7 = vrot.slane %v2769_v56, 2  ;;  %v2790_v14 = vrot.slane %v2773_v33, 2  ;;  %v1989_v36 = vadd.f32 %v1973_v29, %v1929_v1 }
 0x2fa   : > { %v2036_v12 = vsel %vm1288_vm3, %v2034_v6, %v6929_v52  ;;  %v1993_v40 = vadd.f32 %v1972_v53, %v1933_v25  ;;  %v2033_v31 = vsel %vm1288_vm3, %v2031_v37, %v2032_v51  ;;  %v1991_v63 = vadd.f32 %v1979_v60, %v1931_v59 }
 0x2fb   : > { %v1995_v43 = vadd.f32 %v1978_v46, %v1935_v28  ;;  %v2039_v18 = vsel %vm1288_vm3, %v2037_v48, %v2038_v5  ;;  %v2743_v47 = vadd.f32 %v2725_v21, %v2683_v32  ;;  %v2747_v13 = vadd.f32 %v2724_v9, %v2687_v35 }
 0x2fc   : > { %v6930_v50 = vrot.slane %v5243_v3, 2  ;;  %v2785_v6 = vsel %vm1288_vm3, %v2783_v19, %v2784_v17  ;;  %v2745_v15 = vadd.f32 %v2731_v49, %v2685_v16  ;;  %v2749_v57 = vadd.f32 %v2730_v62, %v2689_v0 }
 0x2fd   : > { %v5381_v53 = vadd.f32 %v5314_v20, %v5305_v23  ;;  %v6931_v46 = vrot.slane %v5264_v42, 2  ;;  %v5389_v1 = vadd.f32 %v2036_v12, %v5319_v61  ;;  %v2791_v3 = vsel %vm1288_vm3, %v2789_v7, %v2790_v14 }
 0x2fe   : > { %v5376_v44 = vadd.f32 %v6930_v50, %v5297_v24  ;;  %v6932_v25 = vmov %v6929_v52  ;;  %v5399_v9 = vadd.f32 %v2033_v31, %v1989_v36  ;;  %v5401_v23 = vadd.f32 %v2032_v51, %v1993_v40 }
 0x2ff   : > { %v5386_v37 = vadd.f32 %v6931_v46, %v5307_v45  ;;  %v5397_v29 = vadd.f32 %v6932_v25, %v5325_v55  ;;  %v5403_v20 = vadd.f32 %v2039_v18, %v1991_v63  ;;  %v5409_v61 = vadd.f32 %v2038_v5, %v1995_v43 }
 0x300   : > { %v5411_v11 = vadd.f32 %v2785_v6, %v2743_v47  ;;  %v5413_v62 = vadd.f32 %v2784_v17, %v2747_v13  ;;  %v5417_v55 = vadd.f32 %v2791_v3, %v2745_v15  ;;  %v5419_v51 = vadd.f32 %v2790_v14, %v2749_v57 }
 0x301   : > { %6933 = vst [vmem:[#allocation12_spill] sm:$0xff] %v5403_v20  ;;  %6934 = vst [vmem:[#allocation13_spill] sm:$0xff] %v5409_v61  ;;  %v5423_v56 = vrot.slane %v5136_v39, %v5191_v10 }
 0x302   : > { %6935 = vst [vmem:[#allocation14_spill] sm:$0xff] %v5411_v11  ;;  %6936 = vst [vmem:[#allocation15_spill] sm:$0xff] %v5413_v62 }
 0x303   : > { %6937 = vst [vmem:[#allocation16_spill] sm:$0xff] %v5417_v55  ;;  %6938 = vst [vmem:[#allocation17_spill] sm:$0xff] %v5419_v51 }
 0x304   : > { %6939 = vst [vmem:[#allocation18_spill] sm:$0xff] %v5423_v56 }
 0x38e   : > { %v5392_v24 = vpop.f32.mrb[8].mxu0 }
 0x38f   : > { %v1502_v42 = vrot.slane %v5392_v24, %v5106_v27  ;;  %v5407_v45 = vpop.f32.mrb[9].mxu0  ;;  %v1482_v54 = vrot.slane %v5392_v24, %v5121_v8  ;;  %v1538_v33 = vrot.slane %v5392_v24, %v5113_v30  ;;  %v1591_v59 = vrot.slane %v5392_v24, %v5153_v34 }
 0x390   : > { %v1611_v28 = vrot.slane %v5392_v24, %v5155_v22  ;;  %v1647_v60 = vrot.slane %v5392_v24, %v5173_v58  ;;  %v1719_v48 = vrot.slane %v5392_v24, %v5184_v4  ;;  %v5443_v35 = vrot.slane %v5407_v45, %v5113_v30 }
 0x391   : > { %v5453_v16 = vrot.slane %v5407_v45, %v5173_v58  ;;  %v1515_v52 = vmul.f32 %v1502_v42, %v5240_v2  ;;  %v1495_v36 = vmul.f32 %v1482_v54, %v5240_v2  ;;  %v1551_v50 = vmul.f32 %v1538_v33, %v5240_v2 }
 0x392   : > { %v5435_v5 = vpop.f32.mrb[8].mxu1  ;;  %v5445_v21 = vpop.f32.mrb[10].mxu0  ;;  %v1555_v46 = vmul.f32 %v1538_v33, %v5213_v26  ;;  %v1624_v3 = vmul.f32 %v1611_v28, %v5240_v2  ;;  %v1660_v25 = vmul.f32 %v1647_v60, %v5240_v2  ;;  %v1664_v19 = vmul.f32 %v1647_v60, %v5213_v26 }
 0x393   : > { %v5455_v0 = vpop.f32.mrb[9].mxu1  ;;  %v5458_v12 = vpop.f32.mrb[11].mxu0  ;;  %v1510_v7 = vrot.slane %v5435_v5, %v5106_v27  ;;  %v1546_v40 = vrot.slane %v5435_v5, %v5113_v30  ;;  %v5475_v43 = vrot.slane %v5435_v5, %v5173_v58  ;;  %v1523_v57 = vrot.slane %v1515_v52, 3 }
 0x394   : > { %v5497_v47 = vrot.slane %v5455_v0, %v5113_v30  ;;  %v1568_v13 = vrot.slane %v1551_v50, 6  ;;  %v1699_v52 = vrot.slane %v5392_v24, %v5191_v10  ;;  %v1569_v14 = vrot.slane %v1555_v46, 6 }
 0x395   : > { %v1632_v33 = vrot.slane %v1624_v3, 3  ;;  %v1676_v17 = vrot.slane %v1660_v25, 6  ;;  %v1732_v28 = vmul.f32 %v1719_v48, %v5240_v2  ;;  %v1604_v32 = vmul.f32 %v1591_v59, %v5240_v2 }
 0x396   : > { %v5484_v6 = vpop.f32.mrb[10].mxu1  ;;  %v5486_v15 = vpop.f32.mrb[12].mxu0  ;;  %v1677_v31 = vrot.slane %v1664_v19, 6  ;;  %v1755_v18 = vrot.slane %v5445_v21, %v5121_v8  ;;  %v1531_v46 = vadd.f32 %v1523_v57, %v1495_v36  ;;  %v1827_v48 = vrot.slane %v5445_v21, %v5113_v30 }
 0x397   : > { %v5491_v42 = vpop.f32.mrb[11].mxu1  ;;  %v5493_v54 = vpop.f32.mrb[13].mxu0  ;;  %v1740_v3 = vrot.slane %v1732_v28, 3  ;;  %v1640_v59 = vadd.f32 %v1632_v33, %v1604_v32  ;;  %v1712_v19 = vmul.f32 %v1699_v52, %v5240_v2  ;;  %v5525_v56 = vrot.slane %v5455_v0, %v5173_v58 }
 0x398   : > { %v1768_v63 = vmul.f32 %v1755_v18, %v5240_v2  ;;  %v1772_v49 = vmul.f32 %v1755_v18, %v5213_v26  ;;  %v1570_v36 = vsel %vm1567_vm4, %v1568_v13, %v1569_v14  ;;  %v1678_v57 = vsel %vm1567_vm4, %v1676_v17, %v1677_v31 }
 0x399   : > { %v1807_v28 = vrot.slane %v5445_v21, %v5106_v27  ;;  %v1748_v24 = vadd.f32 %v1740_v3, %v1712_v19  ;;  %v1840_v52 = vmul.f32 %v1827_v48, %v5240_v2  ;;  %v1863_v18 = vrot.slane %v5445_v21, %v5153_v34 }
 0x39a   : > { %v5508_v50 = vpop.f32.mrb[12].mxu1  ;;  %v5510_v60 = vpop.f32.mrb[14].mxu0  ;;  %v1784_v51 = vrot.slane %v1768_v63, 6  ;;  %v1785_v32 = vrot.slane %v1772_v49, 6  ;;  %v1517_v62 = vmul.f32 %v1510_v7, %v5260_v41  ;;  %v1553_v14 = vmul.f32 %v1546_v40, %v5260_v41 }
 0x39b   : > { %v5516_v25 = vpop.f32.mrb[13].mxu1  ;;  %v5518_v39 = vpop.f32.mrb[15].mxu0  ;;  %v1557_v17 = vmul.f32 %v1546_v40, %v5248_v38  ;;  %v5547_v63 = vadd.f32 %v1570_v36, %v1531_v46  ;;  %v5549_v3 = vadd.f32 %v1678_v57, %v1640_v59  ;;  %v1820_v7 = vmul.f32 %v1807_v28, %v5240_v2 }
 0x39c   : > { %6940 = vst [vmem:[#allocation19_spill] sm:$0xff] %v5518_v39  ;;  %v1786_v48 = vsel %vm1567_vm4, %v1784_v51, %v1785_v32  ;;  %v6944_v40 = vrot.slane %v5435_v5, %v5121_v8  ;;  %v1525_v11 = vrot.slane %v1517_v62, 3  ;;  %v6945_v46 = vrot.slane %v5435_v5, %v5155_v22 }
 0x39d   : > { %v5552_v21 = vadd.f32 %v1786_v48, %v1748_v24  ;;  %v5568_v24 = vmul.f32 %v1863_v18, %v5240_v2  ;;  %v1662_v57 = vmul.f32 %v5475_v43, %v5260_v41  ;;  %v1666_v62 = vmul.f32 %v5475_v43, %v5248_v38 }
 0x39e   : > { %v5532_v33 = vpop.f32.mrb[14].mxu1  ;;  %v5534_v55 = vpop.f32.mrb[16].mxu0  ;;  %v1497_v19 = vmul.f32 %v6944_v40, %v5260_v41  ;;  %v1626_v59 = vmul.f32 %v6945_v46, %v5260_v41  ;;  %v1707_v28 = vrot.slane %v5435_v5, %v5191_v10  ;;  %v6950_v2 = vrot.slane %v5435_v5, %v5184_v4 }
 0x39f   : > { %6941 = vst [vmem:[#allocation20_spill] sm:$0xff] %v5534_v55  ;;  %v5541_v31 = vpop.f32.mrb[15].mxu1  ;;  %v5543_v13 = vpop.f32.mrb[17].mxu0  ;;  %v1574_v55 = vrot.slane %v1553_v14, 6  ;;  %v5581_v14 = vmul.f32 %v1863_v18, %v5213_v26  ;;  %v1763_v40 = vrot.slane %v5484_v6, %v5121_v8  ;;  %v6951_v46 = vrot.slane %v5435_v5, %v5153_v34 }
 0x3a0   : > { %6942 = vst [vmem:[#allocation21_spill] sm:$0xff] %v5541_v31  ;;  %6943 = vst [vmem:[#allocation22_spill] sm:$0xff] %v5543_v13  ;;  %v1848_v13 = vrot.slane %v1840_v52, 3  ;;  %v1575_v31 = vrot.slane %v1557_v17, 6  ;;  %v1634_v17 = vrot.slane %v1626_v59, 3  ;;  %v1734_v48 = vmul.f32 %v6950_v2, %v5260_v41 }
 0x3a1   : > { %v1533_v43 = vadd.f32 %v1525_v11, %v1497_v19  ;;  %v1606_v49 = vmul.f32 %v6951_v46, %v5260_v41  ;;  %v1770_v59 = vmul.f32 %v1763_v40, %v5260_v41  ;;  %v1714_v61 = vmul.f32 %v1707_v28, %v5260_v41  ;;  %v6953_v46 = vld [vmem:[#allocation9_spill] sm:$0xff] }
 0x3a2   : > { %v5563_v36 = vpop.f32.mrb[16].mxu1  ;;  %v5565_v51 = vpop.f32.mrb[18].mxu0  ;;  %v1576_v26 = vsel %vm1567_vm4, %v1574_v55, %v1575_v31  ;;  %v1742_v18 = vrot.slane %v1734_v48, 3  ;;  %v1815_v11 = vrot.slane %v5484_v6, %v5106_v27  ;;  %v1835_v5 = vrot.slane %v5484_v6, %v5113_v30 }
 0x3a3   : > { %6946 = vst [vmem:[#allocation23_spill] sm:$0xff] %v5563_v36  ;;  %6947 = vst [vmem:[#allocation24_spill] sm:$0xff] %v5565_v51  ;;  %v5576_v32 = vpop.f32.mrb[17].mxu1  ;;  %v5578_v52 = vpop.f32.mrb[19].mxu0  ;;  %v1682_v51 = vrot.slane %v1662_v57, 6  ;;  %v1642_v2 = vadd.f32 %v1634_v17, %v1606_v49  ;;  %v1790_v57 = vrot.slane %v1770_v59, 6  ;;  %v1871_v31 = vrot.slane %v5484_v6, %v5153_v34 }
 0x3a4   : > { %6948 = vst [vmem:[#allocation25_spill] sm:$0xff] %v5576_v32  ;;  %6949 = vst [vmem:[#allocation26_spill] sm:$0xff] %v5578_v52  ;;  %v1683_v52 = vrot.slane %v1666_v62, 6  ;;  %v1774_v32 = vmul.f32 %v1763_v40, %v5248_v38  ;;  %v5606_v62 = vadd.f32 %v1848_v13, %v1820_v7  ;;  %v1750_v28 = vadd.f32 %v1742_v18, %v1714_v61 }
 0x3a5   : > { %v5610_v17 = vadd.f32 %v1576_v26, %v1533_v43  ;;  %v1822_v7 = vmul.f32 %v1815_v11, %v5260_v41  ;;  %v1842_v61 = vmul.f32 %v1835_v5, %v5260_v41  ;;  %v5626_v43 = vmul.f32 %v1871_v31, %v5260_v41 }
 0x3a6   : > { %v5596_v36 = vpop.f32.mrb[18].mxu1  ;;  %v1684_v19 = vsel %vm1567_vm4, %v1682_v51, %v1683_v52  ;;  %v1791_v55 = vrot.slane %v1774_v32, 6  ;;  %v6954_v51 = vrot.slane %v5407_v45, %v5106_v27  ;;  %v1552_v32 = vmul.f32 %v5443_v35, %v6953_v46 }
 0x3a7   : > { %6952 = vst [vmem:[#allocation27_spill] sm:$0xff] %v5596_v36  ;;  %v5619_v6 = vadd.f32 %v1684_v19, %v1642_v2  ;;  %v5629_v26 = vmul.f32 %v1871_v31, %v5248_v38  ;;  %v6955_v18 = vrot.slane %v5407_v45, %v5121_v8  ;;  %v6957_v11 = vrot.slane %v5407_v45, %v5155_v22 }
 0x3a8   : > { %v1792_v40 = vsel %vm1567_vm4, %v1790_v57, %v1791_v55  ;;  %v1516_v52 = vmul.f32 %v6954_v51, %v6953_v46  ;;  %v6956_v57 = vld [vmem:[#allocation10_spill] sm:$0xff]  ;;  %v1661_v41 = vmul.f32 %v5453_v16, %v6953_v46  ;;  %v1571_v55 = vrot.slane %v1552_v32, 6 }
 0x3a9   : > { %v5621_v13 = vadd.f32 %v1792_v40, %v1750_v28  ;;  %v1496_v59 = vmul.f32 %v6955_v18, %v6953_v46  ;;  %v1556_v2 = vmul.f32 %v5443_v35, %v6956_v57  ;;  %v1625_v5 = vmul.f32 %v6957_v11, %v6953_v46 }
 0x3aa   : > { %v1524_v19 = vrot.slane %v1516_v52, 3  ;;  %v1665_v38 = vmul.f32 %v5453_v16, %v6956_v57  ;;  %v1703_v28 = vrot.slane %v5407_v45, %v5191_v10  ;;  %v6958_v35 = vrot.slane %v5407_v45, %v5184_v4 }
 0x3ab   : > { %v1572_v31 = vrot.slane %v1556_v2, 6  ;;  %v1633_v51 = vrot.slane %v1625_v5, 3  ;;  %v1679_v52 = vrot.slane %v1661_v41, 6  ;;  %v1759_v11 = vrot.slane %v5458_v12, %v5121_v8  ;;  %v5662_v41 = vpop.f32.mrb[19].mxu1 }
 0x3ac   : > { %v1733_v40 = vmul.f32 %v6958_v35, %v6953_v46  ;;  %v1680_v18 = vrot.slane %v1665_v38, 6  ;;  %v1850_v48 = vrot.slane %v1842_v61, 3  ;;  %v6959_v32 = vrot.slane %v5407_v45, %v5153_v34  ;;  %6960 = vst [vmem:[#allocation9_spill] sm:$0xff] %v5662_v41  ;;  %v6961_v41 = vld [vmem:[#allocation11_spill] sm:$0xff] }
 0x3ad   : > { %v1532_v36 = vadd.f32 %v1524_v19, %v1496_v59  ;;  %v1769_v35 = vmul.f32 %v1759_v11, %v6953_v46  ;;  %v1811_v5 = vrot.slane %v5458_v12, %v5106_v27  ;;  %v1573_v61 = vsel %vm1567_vm4, %v1571_v55, %v1572_v31 }
 0x3ae   : > { %v1605_v2 = vmul.f32 %v6959_v32, %v6953_v46  ;;  %v1741_v20 = vrot.slane %v1733_v40, 3  ;;  %v1773_v49 = vmul.f32 %v1759_v11, %v6956_v57  ;;  %v1831_v16 = vrot.slane %v5458_v12, %v5113_v30 }
 0x3af   : > { %v1681_v45 = vsel %vm1567_vm4, %v1679_v52, %v1680_v18  ;;  %v1713_v59 = vmul.f32 %v1703_v28, %v6953_v46  ;;  %v1787_v19 = vrot.slane %v1769_v35, 6  ;;  %v1867_v40 = vrot.slane %v5458_v12, %v5153_v34 }
 0x3b0   : > { %v1641_v38 = vadd.f32 %v1633_v51, %v1605_v2  ;;  %v5672_v32 = vadd.f32 %v1850_v48, %v1822_v7  ;;  %v1788_v39 = vrot.slane %v1773_v49, 6  ;;  %v6962_v55 = vrot.slane %v5455_v0, %v5106_v27 }
 0x3b1   : > { %v1554_v51 = vmul.f32 %v5497_v47, %v6961_v41  ;;  %v5680_v11 = vadd.f32 %v1573_v61, %v1532_v36  ;;  %v1749_v52 = vadd.f32 %v1741_v20, %v1713_v59  ;;  %v1821_v28 = vmul.f32 %v1811_v5, %v6953_v46 }
 0x3b2   : > { %v1518_v31 = vmul.f32 %v6962_v55, %v6961_v41  ;;  %v1558_v18 = vmul.f32 %v5497_v47, %v5376_v44  ;;  %v5685_v12 = vadd.f32 %v1681_v45, %v1641_v38  ;;  %v1789_v48 = vsel %vm1567_vm4, %v1787_v19, %v1788_v39 }
 0x3b3   : > { %v1841_v49 = vmul.f32 %v1831_v16, %v6953_v46  ;;  %v6963_v7 = vrot.slane %v5455_v0, %v5121_v8  ;;  %v5693_v35 = vadd.f32 %v1789_v48, %v1749_v52  ;;  %v5696_v20 = vmul.f32 %v1867_v40, %v6953_v46  ;;  %v5723_v48 = vpop.f32.mrb[20].mxu1 }
 0x3b4   : > { %v5699_v36 = vmul.f32 %v1867_v40, %v6956_v57  ;;  %v1526_v47 = vrot.slane %v1518_v31, 3  ;;  %v1577_v5 = vrot.slane %v1554_v51, 6  ;;  %v1578_v61 = vrot.slane %v1558_v18, 6  ;;  %v5721_v18 = vpop.f32.mrb[20].mxu0  ;;  %6969 = vst [vmem:[#allocation28_spill] sm:$0xff] %v5723_v48 }
 0x3b5   : > { %v1498_v2 = vmul.f32 %v6963_v7, %v6961_v41  ;;  %6964 = vst [vmem:[#allocation10_spill] sm:$0xff] %v5693_v35  ;;  %v6965_v39 = vrot.slane %v5455_v0, %v5155_v22  ;;  %v1663_v38 = vmul.f32 %v5525_v56, %v6961_v41  ;;  %v6966_v45 = vrot.slane %v5455_v0, %v5153_v34 }
 0x3b6   : > { %v1667_v57 = vmul.f32 %v5525_v56, %v5376_v44  ;;  %v1711_v59 = vrot.slane %v5455_v0, %v5191_v10  ;;  %v6967_v19 = vrot.slane %v5455_v0, %v5184_v4  ;;  %v1849_v55 = vrot.slane %v1841_v49, 3  ;;  %6968 = vst [vmem:[#allocation11_spill] sm:$0xff] %v5721_v18 }
 0x3b7   : > { %v1627_v16 = vmul.f32 %v6965_v39, %v6961_v41  ;;  %v1607_v46 = vmul.f32 %v6966_v45, %v6961_v41  ;;  %v1685_v51 = vrot.slane %v1663_v38, 6  ;;  %v1767_v52 = vrot.slane %v5491_v42, %v5121_v8 }
 0x3b8   : > { %v1735_v40 = vmul.f32 %v6967_v19, %v6961_v41  ;;  %v1534_v7 = vadd.f32 %v1526_v47, %v1498_v2  ;;  %v1686_v39 = vrot.slane %v1667_v57, 6  ;;  %v1579_v35 = vsel %vm1567_vm4, %v1577_v5, %v1578_v61 }
 0x3b9   : > { %v1635_v31 = vrot.slane %v1627_v16, 3  ;;  %v1771_v0 = vmul.f32 %v1767_v52, %v6961_v41  ;;  %v1775_v49 = vmul.f32 %v1767_v52, %v5376_v44  ;;  %v1839_v16 = vrot.slane %v5491_v42, %v5113_v30  ;;  %v5740_v52 = vpop.f32.mrb[21].mxu1 }
 0x3ba   : > { %v1743_v45 = vrot.slane %v1735_v40, 3  ;;  %v1715_v19 = vmul.f32 %v1711_v59, %v6961_v41  ;;  %v1819_v48 = vrot.slane %v5491_v42, %v5106_v27  ;;  %v1875_v2 = vrot.slane %v5491_v42, %v5153_v34  ;;  %v5738_v40 = vpop.f32.mrb[21].mxu0  ;;  %6971 = vst [vmem:[#allocation30_spill] sm:$0xff] %v5740_v52 }
 0x3bb   : > { %v1643_v38 = vadd.f32 %v1635_v31, %v1607_v46  ;;  %v1687_v47 = vsel %vm1567_vm4, %v1685_v51, %v1686_v39  ;;  %v1793_v57 = vrot.slane %v1771_v0, 6  ;;  %v1794_v5 = vrot.slane %v1775_v49, 6  ;;  %6970 = vst [vmem:[#allocation29_spill] sm:$0xff] %v5738_v40 }
 0x3bc   : > { %v1843_v61 = vmul.f32 %v1839_v16, %v6961_v41  ;;  %v1751_v31 = vadd.f32 %v1743_v45, %v1715_v19  ;;  %v5744_v59 = vmul.f32 %v1875_v2, %v6961_v41  ;;  %v5747_v56 = vmul.f32 %v1875_v2, %v5376_v44 }
 0x3bd   : > { %v5749_v42 = vadd.f32 %v1849_v55, %v1821_v28  ;;  %v5751_v51 = vadd.f32 %v1579_v35, %v1534_v7  ;;  %v1795_v39 = vsel %vm1567_vm4, %v1793_v57, %v1794_v5  ;;  %v5754_v49 = vadd.f32 %v1687_v47, %v1643_v38 }
 0x3be   : > { %v1851_v0 = vrot.slane %v1843_v61, 3  ;;  %v5756_v16 = vadd.f32 %v1795_v39, %v1751_v31  ;;  %v1823_v46 = vmul.f32 %v1819_v48, %v6961_v41  ;;  %v2222_v45 = vrot.slane %v5486_v15, %v5121_v8 }
 0x3bf   : > { %6972 = vst [vmem:[#allocation31_spill] sm:$0xff] %v5751_v51  ;;  %6973 = vst [vmem:[#allocation32_spill] sm:$0xff] %v5754_v49  ;;  %v2246_v44 = vrot.slane %v5486_v15, %v5106_v27  ;;  %v2282_v28 = vrot.slane %v5486_v15, %v5113_v30  ;;  %v2334_v35 = vrot.slane %v5486_v15, %v5153_v34  ;;  %v6978_v19 = vrot.slane %v5568_v24, 6 }
 0x3c0   : > { %6974 = vst [vmem:[#allocation33_spill] sm:$0xff] %v5756_v16  ;;  %v5768_v55 = vadd.f32 %v1851_v0, %v1823_v46  ;;  %v2358_v41 = vrot.slane %v5486_v15, %v5155_v22  ;;  %v2394_v48 = vrot.slane %v5486_v15, %v5173_v58  ;;  %v2446_v38 = vrot.slane %v5486_v15, %v5191_v10  ;;  %v5838_v16 = vpop.f32.mrb[22].mxu0 }
 0x3c1   : > { %v2470_v2 = vrot.slane %v5486_v15, %v5184_v4  ;;  %v5785_v5 = vrot.slane %v5508_v50, %v5113_v30  ;;  %v5793_v31 = vrot.slane %v5508_v50, %v5173_v58  ;;  %v5805_v7 = vrot.slane %v5493_v54, %v5113_v30  ;;  %6979 = vst [vmem:[#allocation36_spill] sm:$0xff] %v5838_v16 }
 0x3c2   : > { %6975 = vst [vmem:[#allocation34_spill] sm:$0xff] %v5768_v55  ;;  %v5813_v15 = vrot.slane %v5493_v54, %v5173_v58  ;;  %v5825_v46 = vrot.slane %v5516_v25, %v5113_v30  ;;  %v2235_v61 = vmul.f32 %v2222_v45, %v5381_v53  ;;  %v2259_v47 = vmul.f32 %v2246_v44, %v5381_v53 }
 0x3c3   : > { %v2295_v52 = vmul.f32 %v2282_v28, %v5381_v53  ;;  %v6977_v0 = vrot.slane %v5581_v14, 6  ;;  %v2299_v39 = vmul.f32 %v2282_v28, %v5386_v37  ;;  %v2347_v57 = vmul.f32 %v2334_v35, %v5381_v53 }
 0x3c4   : > { %6976 = vst [vmem:[#allocation35_spill] sm:$0xff] %v5825_v46  ;;  %v2371_v18 = vmul.f32 %v2358_v41, %v5381_v53  ;;  %v2239_v45 = vadd.f32 %v2235_v61, %v5547_v63  ;;  %v2267_v49 = vrot.slane %v2259_v47, 3  ;;  %v2407_v51 = vmul.f32 %v2394_v48, %v5381_v53 }
 0x3c5   : > { %v1894_v40 = vsel %vm1567_vm4, %v6978_v19, %v6977_v0  ;;  %v2311_v44 = vrot.slane %v2295_v52, 6  ;;  %v2312_v46 = vrot.slane %v2299_v39, 6  ;;  %v2351_v14 = vadd.f32 %v2347_v57, %v5549_v3 }
 0x3c6   : > { %v2379_v24 = vrot.slane %v2371_v18, 3  ;;  %v2411_v19 = vmul.f32 %v2394_v48, %v5386_v37  ;;  %v2275_v0 = vadd.f32 %v2267_v49, %v2239_v45  ;;  %v2423_v28 = vrot.slane %v2407_v51, 6 }
 0x3c7   : > { %v2459_v35 = vmul.f32 %v2446_v38, %v5381_v53  ;;  %v2483_v41 = vmul.f32 %v2470_v2, %v5381_v53  ;;  %v2313_v16 = vsel %vm1567_vm4, %v2311_v44, %v2312_v46  ;;  %v2506_v52 = vrot.slane %v5510_v60, %v5121_v8 }
 0x3c8   : > { %v2387_v55 = vadd.f32 %v2379_v24, %v2351_v14  ;;  %v2424_v63 = vrot.slane %v2411_v19, 6  ;;  %v5849_v47 = vadd.f32 %v2313_v16, %v2275_v0  ;;  %v2558_v49 = vrot.slane %v5510_v60, %v5106_v27 }
 0x3c9   : > { %v2463_v3 = vadd.f32 %v2459_v35, %v5552_v21  ;;  %v2491_v18 = vrot.slane %v2483_v41, 3  ;;  %v2519_v48 = vmul.f32 %v2506_v52, %v5381_v53  ;;  %v2523_v38 = vmul.f32 %v2506_v52, %v5386_v37 }
 0x3ca   : > { %v2425_v51 = vsel %vm1567_vm4, %v2423_v28, %v2424_v63  ;;  %v2582_v2 = vrot.slane %v5510_v60, %v5113_v30  ;;  %v1908_v57 = vadd.f32 %v1894_v40, %v5606_v62  ;;  %v2571_v21 = vmul.f32 %v2558_v49, %v5381_v53 }
 0x3cb   : > { %v5860_v61 = vadd.f32 %v2425_v51, %v2387_v55  ;;  %v2499_v16 = vadd.f32 %v2491_v18, %v2463_v3  ;;  %v2346_v46 = vrot.slane %v5516_v25, %v5153_v34  ;;  %v2535_v39 = vrot.slane %v2519_v48, 6 }
 0x3cc   : > { %v2536_v45 = vrot.slane %v2523_v38, 6  ;;  %v2595_v44 = vmul.f32 %v2582_v2, %v5381_v53  ;;  %v2370_v14 = vrot.slane %v5516_v25, %v5155_v22  ;;  %v5870_v24 = vrot.slane %v5516_v25, %v5173_v58 }
 0x3cd   : > { %v2458_v62 = vrot.slane %v5516_v25, %v5191_v10  ;;  %v2575_v40 = vadd.f32 %v2571_v21, %v1908_v57  ;;  %v6980_v0 = vrot.slane %v5508_v50, %v5121_v8  ;;  %v6981_v35 = vrot.slane %v5508_v50, %v5106_v27 }
 0x3ce   : > { %v2537_v55 = vsel %vm1567_vm4, %v2535_v39, %v2536_v45  ;;  %v2603_v19 = vrot.slane %v2595_v44, 3  ;;  %v2618_v52 = vrot.slane %v5510_v60, %v5153_v34  ;;  %v6982_v3 = vrot.slane %v5629_v26, 6 }
 0x3cf   : > { %v2237_v28 = vmul.f32 %v6980_v0, %v5389_v1  ;;  %v2261_v41 = vmul.f32 %v6981_v35, %v5389_v1  ;;  %v5883_v63 = vadd.f32 %v2537_v55, %v2499_v16  ;;  %v6983_v18 = vrot.slane %v5626_v43, 6 }
 0x3d0   : > { %v2297_v51 = vmul.f32 %v5785_v5, %v5389_v1  ;;  %v5894_v48 = vadd.f32 %v2603_v19, %v2575_v40  ;;  %v2301_v57 = vmul.f32 %v5785_v5, %v5397_v29  ;;  %v6984_v60 = vrot.slane %v5508_v50, %v5153_v34 }
 0x3d1   : > { %v1900_v49 = vsel %vm1567_vm4, %v6983_v18, %v6982_v3  ;;  %v2241_v38 = vadd.f32 %v2237_v28, %v5610_v17  ;;  %v2269_v2 = vrot.slane %v2261_v41, 3  ;;  %v6985_v43 = vrot.slane %v5508_v50, %v5155_v22 }
 0x3d2   : > { %v2317_v16 = vrot.slane %v2297_v51, 6  ;;  %v2349_v26 = vmul.f32 %v6984_v60, %v5389_v1  ;;  %v2409_v39 = vmul.f32 %v5793_v31, %v5389_v1  ;;  %v2318_v17 = vrot.slane %v2301_v57, 6 }
 0x3d3   : > { %v2373_v21 = vmul.f32 %v6985_v43, %v5389_v1  ;;  %v2277_v45 = vadd.f32 %v2269_v2, %v2241_v38  ;;  %v2413_v44 = vmul.f32 %v5793_v31, %v5397_v29  ;;  %v6986_v5 = vrot.slane %v5508_v50, %v5191_v10 }
 0x3d4   : > { %v2353_v55 = vadd.f32 %v2349_v26, %v5619_v6  ;;  %v2429_v0 = vrot.slane %v2409_v39, 6  ;;  %v6987_v28 = vrot.slane %v5508_v50, %v5184_v4  ;;  %v2319_v41 = vsel %vm1567_vm4, %v2317_v16, %v2318_v17 }
 0x3d5   : > { %v2461_v40 = vmul.f32 %v6986_v5, %v5389_v1  ;;  %v2381_v19 = vrot.slane %v2373_v21, 3  ;;  %v2430_v3 = vrot.slane %v2413_v44, 6  ;;  %v2514_v31 = vrot.slane %v5532_v33, %v5121_v8 }
 0x3d6   : > { %v2485_v35 = vmul.f32 %v6987_v28, %v5389_v1  ;;  %v5924_v51 = vadd.f32 %v2319_v41, %v2277_v45  ;;  %v2566_v6 = vrot.slane %v5532_v33, %v5106_v27  ;;  %v2590_v16 = vrot.slane %v5532_v33, %v5113_v30 }
 0x3d7   : > { %v2465_v18 = vadd.f32 %v2461_v40, %v5621_v13  ;;  %v2389_v38 = vadd.f32 %v2381_v19, %v2353_v55  ;;  %v2431_v57 = vsel %vm1567_vm4, %v2429_v0, %v2430_v3  ;;  %v2521_v50 = vmul.f32 %v2514_v31, %v5389_v1  ;;  %v5933_v13 = vpop.f32.mrb[22].mxu1 }
 0x3d8   : > { %v2493_v2 = vrot.slane %v2485_v35, 3  ;;  %v2525_v60 = vmul.f32 %v2514_v31, %v5397_v29  ;;  %v1910_v26 = vadd.f32 %v1900_v49, %v5672_v32  ;;  %v2573_v39 = vmul.f32 %v2566_v6, %v5389_v1 }
 0x3d9   : > { %v5936_v43 = vadd.f32 %v2431_v57, %v2389_v38  ;;  %v2541_v45 = vrot.slane %v2521_v50, 6  ;;  %v2597_v44 = vmul.f32 %v2590_v16, %v5389_v1  ;;  %v6988_v5 = vrot.slane %v5699_v36, 6 }
 0x3da   : > { %v2501_v21 = vadd.f32 %v2493_v2, %v2465_v18  ;;  %v2542_v17 = vrot.slane %v2525_v60, 6  ;;  %v6989_v40 = vrot.slane %v5696_v20, 6  ;;  %v2482_v19 = vrot.slane %v5516_v25, %v5184_v4 }
 0x3db   : > { %v5948_v32 = vmul.f32 %v2618_v52, %v5381_v53  ;;  %v5951_v49 = vmul.f32 %v2618_v52, %v5386_v37  ;;  %v2577_v0 = vadd.f32 %v2573_v39, %v1910_v26  ;;  %v2605_v35 = vrot.slane %v2597_v44, 3 }
 0x3dc   : > { %v1897_v55 = vsel %vm1567_vm4, %v6989_v40, %v6988_v5  ;;  %v2543_v28 = vsel %vm1567_vm4, %v2541_v45, %v2542_v17  ;;  %v6990_v36 = vrot.slane %v5493_v54, %v5121_v8  ;;  %v6991_v41 = vrot.slane %v5493_v54, %v5106_v27 }
 0x3dd   : > { %v5962_v18 = vadd.f32 %v2543_v28, %v2501_v21  ;;  %v2626_v53 = vrot.slane %v5532_v33, %v5153_v34  ;;  %v1909_v37 = vadd.f32 %v1897_v55, %v5749_v42  ;;  %v2296_v52 = vmul.f32 %v5805_v7, %v5399_v9  ;;  %v6996_v28 = vld [vmem:[#allocation10_spill] sm:$0xff] }
 0x3de   : > { %v2236_v20 = vmul.f32 %v6990_v36, %v5399_v9  ;;  %v2260_v3 = vmul.f32 %v6991_v41, %v5399_v9  ;;  %v5969_v31 = vadd.f32 %v2605_v35, %v2577_v0  ;;  %v2300_v6 = vmul.f32 %v5805_v7, %v5401_v23 }
 0x3df   : > { %v2314_v57 = vrot.slane %v2296_v52, 6  ;;  %v6992_v50 = vrot.slane %v5493_v54, %v5153_v34  ;;  %v6993_v33 = vrot.slane %v5493_v54, %v5155_v22  ;;  %v2408_v16 = vmul.f32 %v5813_v15, %v5399_v9 }
 0x3e0   : > { %v2240_v38 = vadd.f32 %v2236_v20, %v5680_v11  ;;  %v2268_v2 = vrot.slane %v2260_v3, 3  ;;  %v2315_v11 = vrot.slane %v2300_v6, 6  ;;  %v2412_v21 = vmul.f32 %v5813_v15, %v5401_v23  ;;  %v6997_v15 = vld [vmem:[#allocation19_spill] sm:$0xff] }
 0x3e1   : > { %v2348_v60 = vmul.f32 %v6992_v50, %v5399_v9  ;;  %v2372_v42 = vmul.f32 %v6993_v33, %v5399_v9  ;;  %v6994_v7 = vrot.slane %v5493_v54, %v5191_v10  ;;  %v2426_v44 = vrot.slane %v2408_v16, 6 }
 0x3e2   : > { %v2276_v26 = vadd.f32 %v2268_v2, %v2240_v38  ;;  %v6995_v5 = vrot.slane %v5493_v54, %v5184_v4  ;;  %v2316_v55 = vsel %vm1567_vm4, %v2314_v57, %v2315_v11  ;;  %v2427_v0 = vrot.slane %v2412_v21, 6 }
 0x3e3   : > { %v2460_v39 = vmul.f32 %v6994_v7, %v5399_v9  ;;  %v2352_v45 = vadd.f32 %v2348_v60, %v5685_v12  ;;  %v2380_v17 = vrot.slane %v2372_v42, 3  ;;  %v2510_v36 = vrot.slane %v6997_v15, %v5121_v8 }
 0x3e4   : > { %v2484_v40 = vmul.f32 %v6995_v5, %v5399_v9  ;;  %v5999_v20 = vadd.f32 %v2316_v55, %v2276_v26  ;;  %v2562_v12 = vrot.slane %v6997_v15, %v5106_v27  ;;  %v2428_v52 = vsel %vm1567_vm4, %v2426_v44, %v2427_v0 }
 0x3e5   : > { %v2464_v35 = vadd.f32 %v2460_v39, %v6996_v28  ;;  %v2388_v41 = vadd.f32 %v2380_v17, %v2352_v45  ;;  %v2520_v54 = vmul.f32 %v2510_v36, %v5399_v9  ;;  %v2524_v38 = vmul.f32 %v2510_v36, %v5401_v23  ;;  %v7006_v36 = vld [vmem:[#allocation31_spill] sm:$0xff] }
 0x3e6   : > { %v2492_v3 = vrot.slane %v2484_v40, 3  ;;  %v2586_v2 = vrot.slane %v6997_v15, %v5113_v30  ;;  %v2572_v50 = vmul.f32 %v2562_v12, %v5399_v9  ;;  %v2622_v60 = vrot.slane %v6997_v15, %v5153_v34  ;;  %v7000_v40 = vld [vmem:[#allocation12_spill] sm:$0xff]  ;;  %v7007_v12 = vld [vmem:[#allocation13_spill] sm:$0xff] }
 0x3e7   : > { %v6008_v6 = vadd.f32 %v2428_v52, %v2388_v41  ;;  %v2538_v33 = vrot.slane %v2520_v54, 6  ;;  %v2539_v42 = vrot.slane %v2524_v38, 6  ;;  %v6998_v26 = vrot.slane %v5747_v56, 6 }
 0x3e8   : > { %v2500_v57 = vadd.f32 %v2492_v3, %v2464_v35  ;;  %v2596_v16 = vmul.f32 %v2586_v2, %v5399_v9  ;;  %v6999_v11 = vrot.slane %v5744_v59, 6  ;;  %v6020_v7 = vmul.f32 %v2626_v53, %v5389_v1  ;;  %v6045_v35 = vpop.f32.mrb[23].mxu0 }
 0x3e9   : > { %v6023_v39 = vmul.f32 %v2626_v53, %v5397_v29  ;;  %v2576_v45 = vadd.f32 %v2572_v50, %v1909_v37  ;;  %v6026_v17 = vmul.f32 %v2622_v60, %v5399_v9  ;;  %v2540_v44 = vsel %vm1567_vm4, %v2538_v33, %v2539_v42  ;;  %v7003_v9 = vld [vmem:[#allocation34_spill] sm:$0xff]  ;;  %v7004_v37 = vld [vmem:[#allocation35_spill] sm:$0xff]  ;;  %7005 = vst [vmem:[#allocation10_spill] sm:$0xff] %v6045_v35  ;;  %v7008_v42 = vld [vmem:[#allocation32_spill] sm:$0xff] }
 0x3ea   : > { %v1903_v21 = vsel %vm1567_vm4, %v6999_v11, %v6998_v26  ;;  %v2604_v5 = vrot.slane %v2596_v16, 3  ;;  %v7001_v56 = vrot.slane %v5516_v25, %v5121_v8  ;;  %v7002_v1 = vrot.slane %v5516_v25, %v5106_v27 }
 0x3eb   : > { %v6037_v0 = vadd.f32 %v2540_v44, %v2500_v57  ;;  %v6040_v29 = vmul.f32 %v2622_v60, %v5401_v23  ;;  %v1911_v53 = vadd.f32 %v1903_v21, %v7003_v9  ;;  %v2298_v28 = vmul.f32 %v7004_v37, %v7000_v40 }
 0x3ec   : > { %v2238_v59 = vmul.f32 %v7001_v56, %v7000_v40  ;;  %v2262_v55 = vmul.f32 %v7002_v1, %v7000_v40  ;;  %v6047_v15 = vadd.f32 %v2604_v5, %v2576_v45  ;;  %v2302_v52 = vmul.f32 %v7004_v37, %v7007_v12  ;;  %v7009_v45 = vld [vmem:[#allocation33_spill] sm:$0xff] }
 0x3ed   : > { %v2320_v54 = vrot.slane %v2298_v28, 6  ;;  %v2350_v23 = vmul.f32 %v2346_v46, %v7000_v40  ;;  %v2374_v38 = vmul.f32 %v2370_v14, %v7000_v40  ;;  %v2410_v2 = vmul.f32 %v5870_v24, %v7000_v40 }
 0x3ee   : > { %v2242_v41 = vadd.f32 %v2238_v59, %v7006_v36  ;;  %v2270_v3 = vrot.slane %v2262_v55, 3  ;;  %v2321_v50 = vrot.slane %v2302_v52, 6  ;;  %v2414_v60 = vmul.f32 %v5870_v24, %v7007_v12  ;;  %v7010_v24 = vld [vmem:[#allocation21_spill] sm:$0xff] }
 0x3ef   : > { %v2462_v33 = vmul.f32 %v2458_v62, %v7000_v40  ;;  %v2354_v46 = vadd.f32 %v2350_v23, %v7008_v42  ;;  %v2382_v16 = vrot.slane %v2374_v38, 3  ;;  %v2432_v26 = vrot.slane %v2410_v2, 6 }
 0x3f0   : > { %v2278_v57 = vadd.f32 %v2270_v3, %v2242_v41  ;;  %v2486_v14 = vmul.f32 %v2482_v19, %v7000_v40  ;;  %v2322_v11 = vsel %vm1567_vm4, %v2320_v54, %v2321_v50  ;;  %v2433_v21 = vrot.slane %v2414_v60, 6 }
 0x3f1   : > { %v2466_v44 = vadd.f32 %v2462_v33, %v7009_v45  ;;  %v2518_v5 = vrot.slane %v7010_v24, %v5121_v8  ;;  %v2390_v62 = vadd.f32 %v2382_v16, %v2354_v46  ;;  %v2570_v1 = vrot.slane %v7010_v24, %v5106_v27  ;;  %v7015_v45 = vld [vmem:[#allocation25_spill] sm:$0xff]  ;;  %v7016_v16 = vld [vmem:[#allocation14_spill] sm:$0xff] }
 0x3f2   : > { %v6077_v56 = vadd.f32 %v2322_v11, %v2278_v57  ;;  %v2494_v59 = vrot.slane %v2486_v14, 3  ;;  %v2434_v55 = vsel %vm1567_vm4, %v2432_v26, %v2433_v21  ;;  %v2594_v9 = vrot.slane %v7010_v24, %v5113_v30  ;;  %v6163_v21 = vpop.f32.mrb[23].mxu1 }
 0x3f3   : > { %v2522_v25 = vmul.f32 %v2518_v5, %v7000_v40  ;;  %v2526_v19 = vmul.f32 %v2518_v5, %v7007_v12  ;;  %v6086_v37 = vadd.f32 %v2434_v55, %v2390_v62  ;;  %v2574_v36 = vmul.f32 %v2570_v1, %v7000_v40  ;;  %7014 = vst [vmem:[#allocation19_spill] sm:$0xff] %v6163_v21 }
 0x3f4   : > { %v2502_v28 = vadd.f32 %v2494_v59, %v2466_v44  ;;  %v2630_v41 = vrot.slane %v7010_v24, %v5153_v34  ;;  %v2647_v3 = vrot.slane %v5948_v32, 6  ;;  %v2598_v23 = vmul.f32 %v2594_v9, %v7000_v40  ;;  %v7012_v59 = vld [vmem:[#allocation23_spill] sm:$0xff] }
 0x3f5   : > { %v2544_v52 = vrot.slane %v2522_v25, 6  ;;  %v2545_v54 = vrot.slane %v2526_v19, 6  ;;  %v2648_v38 = vrot.slane %v5951_v49, 6  ;;  %v2578_v2 = vadd.f32 %v2574_v36, %v1911_v53  ;;  %v7011_v49 = vld [vmem:[#allocation20_spill] sm:$0xff] }
 0x3f6   : > { %v6095_v57 = vmul.f32 %v2630_v41, %v7000_v40  ;;  %v6098_v50 = vmul.f32 %v2630_v41, %v7007_v12  ;;  %v2606_v32 = vrot.slane %v2598_v23, 3  ;;  %v2977_v40 = vrot.slane %v7011_v49, %v5121_v8 }
 0x3f7   : > { %v2546_v42 = vsel %vm1567_vm4, %v2544_v52, %v2545_v54  ;;  %v3001_v12 = vrot.slane %v7011_v49, %v5106_v27  ;;  %v3037_v14 = vrot.slane %v7011_v49, %v5113_v30  ;;  %v3089_v11 = vrot.slane %v7011_v49, %v5153_v34  ;;  %v7013_v52 = vld [vmem:[#allocation22_spill] sm:$0xff]  ;;  %v7017_v54 = vld [vmem:[#allocation15_spill] sm:$0xff] }
 0x3f8   : > { %v6105_v26 = vadd.f32 %v2546_v42, %v2502_v28  ;;  %v6109_v53 = vadd.f32 %v2606_v32, %v2578_v2  ;;  %v3113_v44 = vrot.slane %v7011_v49, %v5155_v22  ;;  %v3149_v24 = vrot.slane %v7011_v49, %v5173_v58 }
 0x3f9   : > { %v3201_v5 = vrot.slane %v7011_v49, %v5191_v10  ;;  %v3225_v62 = vrot.slane %v7011_v49, %v5184_v4  ;;  %v6133_v25 = vrot.slane %v7012_v59, %v5113_v30  ;;  %v6141_v28 = vrot.slane %v7012_v59, %v5173_v58 }
 0x3fa   : > { %v6153_v2 = vrot.slane %v7013_v52, %v5113_v30  ;;  %v6161_v49 = vrot.slane %v7013_v52, %v5173_v58  ;;  %v2649_v32 = vsel %vm1567_vm4, %v2647_v3, %v2648_v38  ;;  %v2990_v41 = vmul.f32 %v2977_v40, %v7016_v16 }
 0x3fb   : > { %v3014_v36 = vmul.f32 %v3001_v12, %v7016_v16  ;;  %v3050_v9 = vmul.f32 %v3037_v14, %v7016_v16  ;;  %v2663_v19 = vadd.f32 %v2649_v32, %v5894_v48  ;;  %v3054_v55 = vmul.f32 %v3037_v14, %v7017_v54 }
 0x3fc   : > { %v3102_v23 = vmul.f32 %v3089_v11, %v7016_v16  ;;  %v3126_v1 = vmul.f32 %v3113_v44, %v7016_v16  ;;  %v2994_v46 = vadd.f32 %v2990_v41, %v5849_v47  ;;  %v3162_v3 = vmul.f32 %v3149_v24, %v7016_v16 }
 0x3fd   : > { %v3022_v60 = vrot.slane %v3014_v36, 3  ;;  %v3066_v42 = vrot.slane %v3050_v9, 6  ;;  %v3067_v38 = vrot.slane %v3054_v55, 6  ;;  %v3166_v33 = vmul.f32 %v3149_v24, %v7017_v54  ;;  %v7018_v9 = vld [vmem:[#allocation24_spill] sm:$0xff] }
 0x3fe   : > { %v3106_v40 = vadd.f32 %v3102_v23, %v5860_v61  ;;  %v3134_v12 = vrot.slane %v3126_v1, 3  ;;  %v3178_v48 = vrot.slane %v3162_v3, 6  ;;  %v3214_v14 = vmul.f32 %v3201_v5, %v7016_v16 }
 0x3ff   : > { %v3030_v21 = vadd.f32 %v3022_v60, %v2994_v46  ;;  %v3238_v11 = vmul.f32 %v3225_v62, %v7016_v16  ;;  %v3068_v44 = vsel %vm1567_vm4, %v3066_v42, %v3067_v38  ;;  %v3179_v47 = vrot.slane %v3166_v33, 6 }
 0x400   : > { %v3142_v32 = vadd.f32 %v3134_v12, %v3106_v40  ;;  %v3261_v36 = vrot.slane %v7018_v9, %v5121_v8  ;;  %v3218_v61 = vadd.f32 %v3214_v14, %v5883_v63  ;;  %v3313_v60 = vrot.slane %v7018_v9, %v5106_v27 }
 0x401   : > { %v6190_v41 = vadd.f32 %v3068_v44, %v3030_v21  ;;  %v3246_v1 = vrot.slane %v3238_v11, 3  ;;  %v3180_v46 = vsel %vm1567_vm4, %v3178_v48, %v3179_v47  ;;  %v3337_v33 = vrot.slane %v7018_v9, %v5113_v30 }
 0x402   : > { %v3274_v24 = vmul.f32 %v3261_v36, %v7016_v16  ;;  %v3278_v5 = vmul.f32 %v3261_v36, %v7017_v54  ;;  %v6200_v62 = vadd.f32 %v3180_v46, %v3142_v32  ;;  %v3326_v21 = vmul.f32 %v3313_v60, %v7016_v16 }
 0x403   : > { %v3254_v55 = vadd.f32 %v3246_v1, %v3218_v61  ;;  %v3373_v63 = vrot.slane %v7018_v9, %v5153_v34  ;;  %v3350_v3 = vmul.f32 %v3337_v33, %v7016_v16  ;;  %v7019_v38 = vrot.slane %v6023_v39, 6  ;;  %v7021_v9 = vld [vmem:[#allocation16_spill] sm:$0xff]  ;;  %v7025_v33 = vld [vmem:[#allocation17_spill] sm:$0xff] }
 0x404   : > { %v3290_v23 = vrot.slane %v3274_v24, 6  ;;  %v3291_v42 = vrot.slane %v3278_v5, 6  ;;  %v7020_v40 = vrot.slane %v6020_v7, 6  ;;  %v6213_v48 = vrot.slane %v7015_v45, %v5113_v30 }
 0x405   : > { %v3330_v11 = vadd.f32 %v3326_v21, %v2663_v19  ;;  %v3358_v47 = vrot.slane %v3350_v3, 3  ;;  %v7022_v39 = vrot.slane %v7012_v59, %v5121_v8  ;;  %v7023_v36 = vrot.slane %v7012_v59, %v5106_v27 }
 0x406   : > { %v2655_v12 = vsel %vm1567_vm4, %v7020_v40, %v7019_v38  ;;  %v3292_v32 = vsel %vm1567_vm4, %v3290_v23, %v3291_v42  ;;  %v6230_v60 = vmul.f32 %v3373_v63, %v7016_v16  ;;  %v3052_v19 = vmul.f32 %v6133_v25, %v7021_v9 }
 0x407   : > { %v2665_v44 = vadd.f32 %v2655_v12, %v5969_v31  ;;  %v2992_v7 = vmul.f32 %v7022_v39, %v7021_v9  ;;  %v3016_v61 = vmul.f32 %v7023_v36, %v7021_v9  ;;  %v6227_v1 = vadd.f32 %v3292_v32, %v3254_v55 }
 0x408   : > { %v6233_v31 = vmul.f32 %v3373_v63, %v7017_v54  ;;  %v6237_v46 = vadd.f32 %v3358_v47, %v3330_v11  ;;  %v3056_v21 = vmul.f32 %v6133_v25, %v7025_v33  ;;  %v3072_v23 = vrot.slane %v3052_v19, 6 }
 0x409   : > { %7024 = vst [vmem:[#allocation12_spill] sm:$0xff] %v6227_v1  ;;  %v2996_v24 = vadd.f32 %v2992_v7, %v5924_v51  ;;  %v3024_v5 = vrot.slane %v3016_v61, 3  ;;  %v7026_v16 = vrot.slane %v7012_v59, %v5153_v34  ;;  %v7027_v54 = vrot.slane %v7012_v59, %v5155_v22 }
 0x40a   : > { %v3164_v42 = vmul.f32 %v6141_v28, %v7021_v9  ;;  %v3073_v51 = vrot.slane %v3056_v21, 6  ;;  %v3168_v38 = vmul.f32 %v6141_v28, %v7025_v33  ;;  %v7028_v25 = vrot.slane %v7012_v59, %v5191_v10  ;;  %v7030_v28 = vld [vmem:[#allocation27_spill] sm:$0xff] }
 0x40b   : > { %v3104_v55 = vmul.f32 %v7026_v16, %v7021_v9  ;;  %v3128_v63 = vmul.f32 %v7027_v54, %v7021_v9  ;;  %v3032_v3 = vadd.f32 %v3024_v5, %v2996_v24  ;;  %v7029_v47 = vrot.slane %v7012_v59, %v5184_v4 }
 0x40c   : > { %v3216_v40 = vmul.f32 %v7028_v25, %v7021_v9  ;;  %v3184_v32 = vrot.slane %v3164_v42, 6  ;;  %v3074_v7 = vsel %vm1567_vm4, %v3072_v23, %v3073_v51  ;;  %v3185_v36 = vrot.slane %v3168_v38, 6 }
 0x40d   : > { %v3108_v12 = vadd.f32 %v3104_v55, %v5936_v43  ;;  %v3136_v11 = vrot.slane %v3128_v63, 3  ;;  %v3240_v39 = vmul.f32 %v7029_v47, %v7021_v9  ;;  %v3269_v19 = vrot.slane %v7030_v28, %v5121_v8 }
 0x40e   : > { %v3220_v61 = vadd.f32 %v3216_v40, %v5962_v18  ;;  %v6267_v24 = vadd.f32 %v3074_v7, %v3032_v3  ;;  %v3321_v43 = vrot.slane %v7030_v28, %v5106_v27  ;;  %v3186_v16 = vsel %vm1567_vm4, %v3184_v32, %v3185_v36 }
 0x40f   : > { %v3144_v5 = vadd.f32 %v3136_v11, %v3108_v12  ;;  %v3248_v21 = vrot.slane %v3240_v39, 3  ;;  %v3276_v59 = vmul.f32 %v3269_v19, %v7021_v9  ;;  %v3280_v23 = vmul.f32 %v3269_v19, %v7025_v33  ;;  %v6294_v39 = vld [vmem:[%s4816_s11 + $0x28] sm:$0xf] }
 0x410   : > { %7031 = vst [vmem:[#allocation34_spill] sm:$0xff] %v6267_v24  ;;  %v3345_v18 = vrot.slane %v7030_v28, %v5113_v30  ;;  %v3328_v63 = vmul.f32 %v3321_v43, %v7021_v9  ;;  %v3381_v42 = vrot.slane %v7030_v28, %v5153_v34  ;;  %v7033_v25 = vrot.slane %v6040_v29, 6  ;;  %7035 = vst [vmem:[#allocation31_spill] sm:$0xff] %v6294_v39 }
 0x411   : > { %v6276_v55 = vadd.f32 %v3186_v16, %v3144_v5  ;;  %v3256_v54 = vadd.f32 %v3248_v21, %v3220_v61  ;;  %v3296_v3 = vrot.slane %v3276_v59, 6  ;;  %v3297_v51 = vrot.slane %v3280_v23, 6  ;;  %v6321_v23 = vld [vmem:[%s4819_s17 + $0x8] sm:$0xff] }
 0x412   : > { %v3352_v38 = vmul.f32 %v3345_v18, %v7021_v9  ;;  %v7034_v40 = vrot.slane %v6026_v17, 6  ;;  %v6291_v32 = vrot.slane %v7015_v45, %v5173_v58  ;;  %v3332_v47 = vadd.f32 %v3328_v63, %v2665_v44  ;;  %7037 = vst [vmem:[#allocation32_spill] sm:$0xff] %v6321_v23  ;;  %v7038_v18 = vld [vmem:[#allocation18_spill] sm:$0xff] }
 0x413   : > { %7032 = vst [vmem:[#allocation35_spill] sm:$0xff] %v6276_v55  ;;  %v3298_v36 = vsel %vm1567_vm4, %v3296_v3, %v3297_v51  ;;  %v6313_v43 = vmul.f32 %v3381_v42, %v7021_v9  ;;  %v6316_v16 = vmul.f32 %v3381_v42, %v7025_v33  ;;  %v2758_v59 = vrot.slane %v6294_v39, %v5121_v8  ;;  %v6326_v63 = vld [vmem:[%s4819_s17 + $0x28] sm:$0xff] }
 0x414   : > { %v2652_v12 = vsel %vm1567_vm4, %v7034_v40, %v7033_v25  ;;  %v3360_v61 = vrot.slane %v3352_v38, 3  ;;  %v6306_v19 = vadd.f32 %v3298_v36, %v3256_v54  ;;  %v2684_v54 = vmul.f32 %v6321_v23, %v7038_v18  ;;  %7039 = vst [vmem:[#allocation33_spill] sm:$0xff] %v6326_v63  ;;  %v6332_v51 = vld [vmem:[%s4819_s17 + $0x48] sm:$0xff]  ;;  %v4547_v36 = vld [vmem:[%s4816_s11 + $0x18] sm:$0xff] }
 0x415   : > { %v6297_v7 = vadd.f32 %v2652_v12, %v6047_v15  ;;  %v4542_v15 = vld [vmem:[%s4816_s11 + $0x8] sm:$0xff]  ;;  %v2688_v3 = vmul.f32 %v6326_v63, %v7038_v18  ;;  %7040 = vst [vmem:[#allocation21_spill] sm:$0xff] %v6332_v51  ;;  %v2768_v42 = vmul.f32 %v6332_v51, %v2758_v59  ;;  %v7042_v40 = vrot.slane %v6098_v50, 6 }
 0x416   : > { %7036 = vst [vmem:[#allocation13_spill] sm:$0xff] %v6306_v19  ;;  %v2698_v5 = vrot.slane %v4542_v15, %v5184_v4  ;;  %v6310_v21 = vadd.f32 %v3360_v61, %v3332_v47  ;;  %v6337_v38 = vld [vmem:[%s4819_s17 + $0x68] sm:$0x7]  ;;  %v7043_v12 = vrot.slane %v6095_v57, 6  ;;  %v2682_v61 = vrot.slane %v4547_v36, %v5191_v10 }
 0x417   : > { %7041 = vst [vmem:[#allocation20_spill] sm:$0xff] %v6337_v38  ;;  %v2772_v25 = vmul.f32 %v6337_v38, %v2758_v59  ;;  %v2706_v44 = vrot.slane %v4547_v36, %v5184_v4  ;;  %v2786_v59 = vrot.slane %v2768_v42, 2  ;;  %v7045_v57 = vld [vmem:[#allocation26_spill] sm:$0xff]  ;;  %v7054_v23 = vrot.slane %v7013_v52, %v5191_v10 }
 0x418   : > { %v2708_v9 = vmul.f32 %v6326_v63, %v2698_v5  ;;  %v2712_v33 = vmul.f32 %v6332_v51, %v2698_v5  ;;  %v2658_v47 = vsel %vm1567_vm4, %v7043_v12, %v7042_v40  ;;  %v6348_v5 = vld [vmem:[%s4816_s11 + $0x38] sm:$0xf]  ;;  %v3265_v29 = vrot.slane %v7045_v57, %v5121_v8 }
 0x419   : > { %7044 = vst [vmem:[#allocation23_spill] sm:$0xff] %v6348_v5  ;;  %v6351_v28 = vadd.f32 %v2658_v47, %v6109_v53  ;;  %v2787_v50 = vrot.slane %v2772_v25, 2  ;;  %v3317_v40 = vrot.slane %v7045_v57, %v5106_v27  ;;  %v6364_v53 = vld [vmem:[%s4819_s17 + $0x58] sm:$0xff]  ;;  %v3341_v36 = vrot.slane %v7045_v57, %v5113_v30 }
 0x41a   : > { %v2726_v15 = vrot.slane %v2708_v9, 1  ;;  %v2727_v18 = vrot.slane %v2712_v33, 1  ;;  %v6360_v33 = vld [vmem:[%s4819_s17 + $0x38] sm:$0xff]  ;;  %7047 = vst [vmem:[#allocation25_spill] sm:$0xff] %v6364_v53  ;;  %v2714_v47 = vmul.f32 %v6364_v53, %v2706_v44  ;;  %v2766_v11 = vrot.slane %v6348_v5, %v5121_v8 }
 0x41b   : > { %7046 = vst [vmem:[#allocation22_spill] sm:$0xff] %v6360_v33  ;;  %v2710_v17 = vmul.f32 %v6360_v33, %v2706_v44  ;;  %v2788_v25 = vsel %vm1288_vm3, %v2786_v59, %v2787_v50  ;;  %v2690_v44 = vmul.f32 %v6360_v33, %v2682_v61  ;;  %v7053_v33 = vrot.slane %v7013_v52, %v5155_v22 }
 0x41c   : > { %v2728_v12 = vsel %vm1227_vm2, %v2726_v15, %v2727_v18  ;;  %v2748_v9 = vadd.f32 %v2727_v18, %v2688_v3  ;;  %v3377_v3 = vrot.slane %v7045_v57, %v5153_v34  ;;  %v6375_v18 = vld [vmem:[%s4819_s17 + $0x18] sm:$0xff]  ;;  %v2733_v35 = vrot.slane %v2714_v47, 1 }
 0x41d   : > { %v2744_v42 = vadd.f32 %v2728_v12, %v2684_v54  ;;  %7048 = vst [vmem:[#allocation14_spill] sm:$0xff] %v6375_v18  ;;  %v2686_v14 = vmul.f32 %v6375_v18, %v2682_v61  ;;  %v2732_v12 = vrot.slane %v2710_v17, 1  ;;  %v2770_v59 = vmul.f32 %v6364_v53, %v2766_v11 }
 0x41e   : > { %v2808_v15 = vadd.f32 %v2787_v50, %v2748_v9  ;;  %v6383_v50 = vld [vmem:[%s4819_s17 + $0x78] sm:$0x7]  ;;  %v7050_v9 = vrot.slane %v7013_v52, %v5121_v8  ;;  %v7051_v61 = vrot.slane %v7013_v52, %v5106_v27 }
 0x41f   : > { %v2804_v54 = vadd.f32 %v2788_v25, %v2744_v42  ;;  %7049 = vst [vmem:[#allocation15_spill] sm:$0xff] %v6383_v50  ;;  %v2774_v57 = vmul.f32 %v6383_v50, %v2766_v11  ;;  %v7052_v42 = vrot.slane %v7013_v52, %v5153_v34 }
 0x420   : > { %v3055_v38 = vmul.f32 %v6153_v2, %v2808_v15  ;;  %v3167_v51 = vmul.f32 %v6161_v49, %v2808_v15  ;;  %v3279_v5 = vmul.f32 %v3265_v29, %v2808_v15 }
 0x421   : > { %v2991_v18 = vmul.f32 %v7050_v9, %v2804_v54  ;;  %v3015_v17 = vmul.f32 %v7051_v61, %v2804_v54  ;;  %v3051_v47 = vmul.f32 %v6153_v2, %v2804_v54  ;;  %v3103_v25 = vmul.f32 %v7052_v42, %v2804_v54 }
 0x422   : > { %v3070_v53 = vrot.slane %v3055_v38, 6  ;;  %v3127_v19 = vmul.f32 %v7053_v33, %v2804_v54  ;;  %v3163_v11 = vmul.f32 %v6161_v49, %v2804_v54  ;;  %v3182_v50 = vrot.slane %v3167_v51, 6 }
 0x423   : > { %v2995_v9 = vadd.f32 %v2991_v18, %v5999_v20  ;;  %v3023_v55 = vrot.slane %v3015_v17, 3  ;;  %v3069_v24 = vrot.slane %v3051_v47, 6  ;;  %v3107_v61 = vadd.f32 %v3103_v25, %v6008_v6 }
 0x424   : > { %v3135_v63 = vrot.slane %v3127_v19, 3  ;;  %v3181_v2 = vrot.slane %v3163_v11, 6  ;;  %v3215_v42 = vmul.f32 %v7054_v23, %v2804_v54  ;;  %v7055_v38 = vrot.slane %v7013_v52, %v5184_v4 }
 0x425   : > { %v3031_v33 = vadd.f32 %v3023_v55, %v2995_v9  ;;  %v3071_v49 = vsel %vm1567_vm4, %v3069_v24, %v3070_v53  ;;  %v3275_v51 = vmul.f32 %v3265_v29, %v2804_v54  ;;  %v3294_v1 = vrot.slane %v3279_v5, 6 }
 0x426   : > { %v3239_v39 = vmul.f32 %v7055_v38, %v2804_v54  ;;  %v3143_v20 = vadd.f32 %v3135_v63, %v3107_v61  ;;  %v3183_v18 = vsel %vm1567_vm4, %v3181_v2, %v3182_v50  ;;  %v3219_v6 = vadd.f32 %v3215_v42, %v6037_v0  ;;  %v7057_v61 = vld [vmem:[#allocation11_spill] sm:$0xff] }
 0x427   : > { %v6411_v17 = vadd.f32 %v3071_v49, %v3031_v33  ;;  %v3293_v47 = vrot.slane %v3275_v51, 6  ;;  %v3327_v25 = vmul.f32 %v3317_v40, %v2804_v54  ;;  %v3351_v23 = vmul.f32 %v3341_v36, %v2804_v54  ;;  %v7056_v40 = vld [vmem:[#allocation9_spill] sm:$0xff] }
 0x428   : > { %v3247_v19 = vrot.slane %v3239_v39, 3  ;;  %v6413_v11 = vadd.f32 %v3183_v18, %v3143_v20  ;;  %v6415_v38 = vmul.f32 %v3377_v3, %v2804_v54  ;;  %v6417_v55 = vmul.f32 %v3377_v3, %v2808_v15 }
 0x429   : > { %v3295_v24 = vsel %vm1567_vm4, %v3293_v47, %v3294_v1  ;;  %v3331_v29 = vadd.f32 %v3327_v25, %v6297_v7  ;;  %v3359_v63 = vrot.slane %v3351_v23, 3  ;;  %v2734_v0 = vsel %vm1227_vm2, %v2732_v12, %v2733_v35 }
 0x42a   : > { %v3255_v52 = vadd.f32 %v3247_v19, %v3219_v6  ;;  %v2746_v5 = vadd.f32 %v2734_v0, %v2686_v14  ;;  %v2750_v53 = vadd.f32 %v2733_v35, %v2690_v44  ;;  %v3273_v36 = vrot.slane %v7056_v40, %v5121_v8 }
 0x42b   : > { %v6426_v50 = vadd.f32 %v3359_v63, %v3331_v29  ;;  %v2792_v54 = vrot.slane %v2770_v59, 2  ;;  %v2793_v9 = vrot.slane %v2774_v57, 2  ;;  %v3385_v15 = vrot.slane %v7056_v40, %v5153_v34 }
 0x42c   : > { %v6422_v39 = vadd.f32 %v3295_v24, %v3255_v52  ;;  %v3408_v1 = vrot.slane %v6313_v43, 6  ;;  %v3409_v7 = vrot.slane %v6316_v16, 6  ;;  %v3325_v3 = vrot.slane %v7056_v40, %v5106_v27 }
 0x42d   : > { %v3349_v35 = vrot.slane %v7056_v40, %v5113_v30  ;;  %v2794_v12 = vsel %vm1288_vm3, %v2792_v54, %v2793_v9  ;;  %v2810_v59 = vadd.f32 %v2793_v9, %v2750_v53  ;;  %v3732_v2 = vrot.slane %v7057_v61, %v5121_v8 }
 0x42e   : > { %v2806_v57 = vadd.f32 %v2794_v12, %v2746_v5  ;;  %v3756_v42 = vrot.slane %v7057_v61, %v5106_v27  ;;  %v6445_v33 = vrot.slane %v7057_v61, %v5113_v30  ;;  %v7058_v6 = vrot.slane %v7015_v45, %v5121_v8 }
 0x42f   : > { %v3057_v49 = vmul.f32 %v6213_v48, %v2810_v59  ;;  %v3169_v51 = vmul.f32 %v6291_v32, %v2810_v59  ;;  %v3281_v20 = vmul.f32 %v3273_v36, %v2810_v59  ;;  %v6449_v18 = vmul.f32 %v3385_v15, %v2810_v59 }
 0x430   : > { %v2993_v19 = vmul.f32 %v7058_v6, %v2806_v57  ;;  %v7059_v47 = vrot.slane %v7015_v45, %v5106_v27  ;;  %v3053_v23 = vmul.f32 %v6213_v48, %v2806_v57  ;;  %v7060_v52 = vrot.slane %v7015_v45, %v5153_v34 }
 0x431   : > { %v3076_v29 = vrot.slane %v3057_v49, 6  ;;  %v7061_v63 = vrot.slane %v7015_v45, %v5155_v22  ;;  %v3165_v5 = vmul.f32 %v6291_v32, %v2806_v57  ;;  %v3188_v53 = vrot.slane %v3169_v51, 6 }
 0x432   : > { %v3017_v25 = vmul.f32 %v7059_v47, %v2806_v57  ;;  %v3105_v24 = vmul.f32 %v7060_v52, %v2806_v57  ;;  %v2997_v40 = vadd.f32 %v2993_v19, %v6077_v56  ;;  %v3075_v9 = vrot.slane %v3053_v23, 6 }
 0x433   : > { %v3129_v0 = vmul.f32 %v7061_v63, %v2806_v57  ;;  %v3187_v48 = vrot.slane %v3165_v5, 6  ;;  %v7062_v6 = vrot.slane %v7015_v45, %v5191_v10  ;;  %v7063_v49 = vrot.slane %v7015_v45, %v5184_v4 }
 0x434   : > { %v3025_v54 = vrot.slane %v3017_v25, 3  ;;  %v3109_v12 = vadd.f32 %v3105_v24, %v6086_v37  ;;  %v3077_v32 = vsel %vm1567_vm4, %v3075_v9, %v3076_v29  ;;  %v3277_v51 = vmul.f32 %v3273_v36, %v2806_v57 }
 0x435   : > { %v3137_v59 = vrot.slane %v3129_v0, 3  ;;  %v3217_v47 = vmul.f32 %v7062_v6, %v2806_v57  ;;  %v3241_v52 = vmul.f32 %v7063_v49, %v2806_v57  ;;  %v3300_v14 = vrot.slane %v3281_v20, 6 }
 0x436   : > { %v3033_v63 = vadd.f32 %v3025_v54, %v2997_v40  ;;  %v3189_v19 = vsel %vm1567_vm4, %v3187_v48, %v3188_v53  ;;  %v3299_v24 = vrot.slane %v3277_v51, 6  ;;  %v3329_v0 = vmul.f32 %v3325_v3, %v2806_v57  ;;  %v7068_v51 = vld [vmem:[#allocation29_spill] sm:$0xff] }
 0x437   : > { %v3145_v56 = vadd.f32 %v3137_v59, %v3109_v12  ;;  %v3221_v37 = vadd.f32 %v3217_v47, %v6105_v26  ;;  %v3249_v25 = vrot.slane %v3241_v52, 3  ;;  %v3353_v5 = vmul.f32 %v3349_v35, %v2806_v57  ;;  %v4559_v35 = vld [vmem:[%s4819_s17 + $0x30] sm:$0xff] }
 0x438   : > { %v6476_v23 = vadd.f32 %v3077_v32, %v3033_v63  ;;  %v6480_v49 = vmul.f32 %v3385_v15, %v2806_v57  ;;  %v3301_v20 = vsel %vm1567_vm4, %v3299_v24, %v3300_v14  ;;  %v3333_v29 = vadd.f32 %v3329_v0, %v6351_v28  ;;  %v7067_v14 = vld [vmem:[#allocation28_spill] sm:$0xff]  ;;  %v4555_v63 = vld [vmem:[%s4819_s17 + $0x40] sm:$0xff]  ;;  %v4560_v26 = vld [vmem:[%s4819_s17 + $0x50] sm:$0xff] }
 0x439   : > { %v6478_v6 = vadd.f32 %v3189_v19, %v3145_v56  ;;  %v3257_v45 = vadd.f32 %v3249_v25, %v3221_v37  ;;  %v3361_v53 = vrot.slane %v3353_v5, 3  ;;  %v6492_v3 = vrot.slane %v7057_v61, %v5173_v58  ;;  %v7071_v56 = vld [vmem:[#allocation36_spill] sm:$0xff] }
 0x43a   : > { %7064 = vst [vmem:[#allocation24_spill] sm:$0xff] %v6476_v23  ;;  %v6508_v59 = vrot.slane %v7067_v14, %v5113_v30  ;;  %v6516_v52 = vrot.slane %v7067_v14, %v5173_v58  ;;  %v6528_v37 = vrot.slane %v7068_v51, %v5113_v30  ;;  %v6536_v0 = vrot.slane %v7068_v51, %v5173_v58 }
 0x43b   : > { %7065 = vst [vmem:[#allocation16_spill] sm:$0xff] %v6478_v6  ;;  %v6488_v40 = vadd.f32 %v3301_v20, %v3257_v45  ;;  %v6498_v57 = vadd.f32 %v3361_v53, %v3333_v29  ;;  %v7069_v5 = vrot.slane %v6233_v31, 6  ;;  %v7070_v45 = vrot.slane %v6230_v60, 6  ;;  %v4552_v29 = vld [vmem:[%s4816_s11 + $0x20] sm:$0xf]  ;;  %v4558_v60 = vld [vmem:[%s4819_s17 + $0x10] sm:$0xff] }
 0x43c   : > { %v3425_v53 = vrot.slane %v4552_v29, %v5106_v27  ;;  %v3449_v25 = vrot.slane %v4552_v29, %v5113_v30  ;;  %v3509_v24 = vrot.slane %v4552_v29, %v5153_v34  ;;  %v6552_v12 = vrot.slane %v7071_v56, %v5121_v8  ;;  %v4553_v31 = vld [vmem:[%s4819_s17] sm:$0xff] }
 0x43d   : > { %7066 = vst [vmem:[#allocation17_spill] sm:$0xff] %v6488_v40  ;;  %v3404_v20 = vsel %vm1567_vm4, %v7070_v45, %v7069_v5  ;;  %v4554_v45 = vld [vmem:[%s4819_s17 + $0x20] sm:$0xff]  ;;  %v4092_v29 = vrot.slane %v7071_v56, %v5113_v30  ;;  %v6564_v9 = vrot.slane %v7071_v56, %v5153_v34  ;;  %v7074_v6 = vrot.slane %v7057_v61, %v5191_v10 }
 0x43e   : > { %v6547_v19 = vadd.f32 %v3404_v20, %v6237_v46  ;;  %v3438_v5 = vmul.f32 %v4553_v31, %v3425_v53  ;;  %v3442_v28 = vmul.f32 %v4554_v45, %v3425_v53  ;;  %v3462_v32 = vmul.f32 %v4554_v45, %v3449_v25  ;;  %v4556_v46 = vld [vmem:[%s4819_s17 + $0x60] sm:$0x7] }
 0x43f   : > { %v3466_v47 = vmul.f32 %v4555_v63, %v3449_v25  ;;  %v3522_v48 = vmul.f32 %v4555_v63, %v3509_v24  ;;  %v3526_v20 = vmul.f32 %v4556_v46, %v3509_v24  ;;  %v3410_v25 = vsel %vm1567_vm4, %v3408_v1, %v3409_v7  ;;  %v4557_v63 = vld [vmem:[%s4816_s11 + $0x30] sm:$0xf]  ;;  %s6629_s11 = scalar_lea.vmem [#allocation6], %s4360_s9  ;;  %s4402_s9 = sshll.u32 %s4729_s28, 9 }
 0x440   : > { %v3478_v54 = vrot.slane %v3462_v32, 1  ;;  %v3433_v24 = vrot.slane %v4557_v63, %v5106_v27  ;;  %v6574_v45 = vadd.f32 %v3410_v25, %v6310_v21  ;;  %v3457_v46 = vrot.slane %v4557_v63, %v5113_v30  ;;  %s6818_s12 = scalar_lea.hbm %s6873_s7, %s4402_s9  ;;  %s4234_s28 = scalar_lea.sflag [#allocation5], %s4810_s8 }
 0x441   : > { %v3479_v44 = vrot.slane %v3466_v47, 1  ;;  %v3538_v53 = vrot.slane %v3522_v48, 2  ;;  %v3539_v31 = vrot.slane %v3526_v20, 2  ;;  %v3517_v20 = vrot.slane %v4557_v63, %v5153_v34 }
 0x442   : > { %v3440_v16 = vmul.f32 %v4558_v60, %v3433_v24  ;;  %v3444_v43 = vmul.f32 %v4559_v35, %v3433_v24  ;;  %v3464_v7 = vmul.f32 %v4559_v35, %v3457_v46  ;;  %v3468_v36 = vmul.f32 %v4560_v26, %v3457_v46 }
 0x443   : > { %v3480_v32 = vsel %vm1227_vm2, %v3478_v54, %v3479_v44  ;;  %v3502_v47 = vadd.f32 %v3479_v44, %v3442_v28  ;;  %v3540_v1 = vsel %vm1288_vm3, %v3538_v53, %v3539_v31  ;;  %v6585_v21 = vrot.slane %v5933_v13, %v5121_v8 }
 0x444   : > { %v3498_v15 = vadd.f32 %v3480_v32, %v3438_v5  ;;  %v3484_v54 = vrot.slane %v3464_v7, 1  ;;  %v3485_v60 = vrot.slane %v3468_v36, 1 }
 0x445   : > { %v3562_v48 = vadd.f32 %v3539_v31, %v3502_v47  ;;  %v7072_v31 = vrot.slane %v7057_v61, %v5153_v34  ;;  %v7073_v47 = vrot.slane %v7057_v61, %v5155_v22 }
 0x446   : > { %v3558_v28 = vadd.f32 %v3540_v1, %v3498_v15 }
 0x447   : > { %v3809_v35 = vmul.f32 %v6445_v33, %v3562_v48  ;;  %v3921_v25 = vmul.f32 %v6492_v3, %v3562_v48  ;;  %v4033_v24 = vmul.f32 %v6552_v12, %v3562_v48  ;;  %v4145_v63 = vmul.f32 %v6564_v9, %v3562_v48 }
 0x448   : > { %v3745_v53 = vmul.f32 %v3732_v2, %v3558_v28  ;;  %v3769_v15 = vmul.f32 %v3756_v42, %v3558_v28  ;;  %v3805_v36 = vmul.f32 %v6445_v33, %v3558_v28  ;;  %v3857_v46 = vmul.f32 %v7072_v31, %v3558_v28 }
 0x449   : > { %v3822_v32 = vrot.slane %v3809_v35, 6  ;;  %v3881_v1 = vmul.f32 %v7073_v47, %v3558_v28  ;;  %v3917_v7 = vmul.f32 %v6492_v3, %v3558_v28  ;;  %v3934_v48 = vrot.slane %v3921_v25, 6 }
 0x44a   : > { %v3749_v2 = vadd.f32 %v3745_v53, %v6190_v41  ;;  %v3777_v5 = vrot.slane %v3769_v15, 3  ;;  %v3821_v44 = vrot.slane %v3805_v36, 6  ;;  %v3861_v42 = vadd.f32 %v3857_v46, %v6200_v62  ;;  %v7076_v15 = vld [vmem:[#allocation12_spill] sm:$0xff] }
 0x44b   : > { %v3889_v40 = vrot.slane %v3881_v1, 3  ;;  %v3933_v33 = vrot.slane %v3917_v7, 6  ;;  %v3969_v31 = vmul.f32 %v7074_v6, %v3558_v28  ;;  %v7075_v35 = vrot.slane %v7057_v61, %v5184_v4 }
 0x44c   : > { %v3785_v47 = vadd.f32 %v3777_v5, %v3749_v2  ;;  %v3823_v3 = vsel %vm1567_vm4, %v3821_v44, %v3822_v32  ;;  %v4029_v25 = vmul.f32 %v6552_v12, %v3558_v28  ;;  %v4046_v41 = vrot.slane %v4033_v24, 6 }
 0x44d   : > { %v3993_v23 = vmul.f32 %v7075_v35, %v3558_v28  ;;  %v3897_v53 = vadd.f32 %v3889_v40, %v3861_v42  ;;  %v3935_v62 = vsel %vm1567_vm4, %v3933_v33, %v3934_v48  ;;  %v3973_v36 = vadd.f32 %v3969_v31, %v7076_v15  ;;  %v4561_v33 = vld [vmem:[%s4819_s17 + $0x70] sm:$0x7]  ;;  %s4247_s17 = sshll.u32 %s6629_s11, 4  ;;  %s6821_s17 = int_to_ptr.vmem [resolvable:$true] %s4247_s17 }
 0x44e   : > { %v3837_v1 = vadd.f32 %v3823_v3, %v3785_v47  ;;  %v4045_v7 = vrot.slane %v4029_v25, 6  ;;  %v7077_v6 = vrot.slane %v7071_v56, %v5106_v27  ;;  %v4105_v35 = vmul.f32 %v4092_v29, %v3558_v28  ;;  %s4590_s21 = scalar_lea.vmem %s6821_s17, 1024  ;;  %p4597_p7 = scmp.lt.s32.totalorder %s6821_s17, %s4595_s22 }
 0x44f   : > { %v4001_v46 = vrot.slane %v3993_v23, 3  ;;  %v3949_v5 = vadd.f32 %v3935_v62, %v3897_v53  ;;  %v4141_v12 = vmul.f32 %v6564_v9, %v3558_v28  ;;  %v4158_v44 = vrot.slane %v4145_v63, 6  ;;  %p4591_p6 = scmp.ne.s32.totalorder %s6821_s17, %s4590_s21  ;;  %p4598_p8 = scmp.lt.s32.totalorder %s4596_s15, %s4590_s21 }
 0x450   : > { %v4081_v61 = vmul.f32 %v7077_v6, %v3558_v28  ;;  %v4047_v40 = vsel %vm1567_vm4, %v4045_v7, %v4046_v41  ;;  %v4113_v32 = vrot.slane %v4105_v35, 3  ;;  %4177 = vst [vmem:[%s6629_s11] sm:$0x7] %v3837_v1  ;;  %v3486_v23 = vsel %vm1227_vm2, %v3484_v54, %v3485_v60  ;;  %v7081_v7 = vld [vmem:[#allocation32_spill] sm:$0xff] }
 0x451   : > { %v4009_v2 = vadd.f32 %v4001_v46, %v3973_v36  ;;  %v4157_v29 = vrot.slane %v4141_v12, 6  ;;  %v4185_v48 = vrot.slane %v3949_v5, 5  ;;  %v3500_v42 = vadd.f32 %v3486_v23, %v3440_v16  ;;  %p4592_p10 = pnand %p4591_p6, %p7113_p9  ;;  %p4599_p12 = por %p4598_p8, %p4597_p7 }
 0x452   : > { %v4085_v24 = vadd.f32 %v4081_v61, %v6547_v19  ;;  %v3504_v28 = vadd.f32 %v3485_v60, %v3444_v43  ;;  %v3524_v63 = vmul.f32 %v4560_v26, %v3517_v20  ;;  %v3528_v31 = vmul.f32 %v4561_v33, %v3517_v20  ;;  %v7080_v20 = vld [vmem:[#allocation31_spill] sm:$0xff]  ;;  %v7082_v61 = vld [vmem:[#allocation33_spill] sm:$0xff] }
 0x453   : > { %v4061_v56 = vadd.f32 %v4047_v40, %v4009_v2  ;;  %v4159_v19 = vsel %vm1567_vm4, %v4157_v29, %v4158_v44  ;;  %4193 = vst [vmem:[%s6629_s11] sm:$0x38] %v4185_v48  ;;  %v4136_v3 = vrot.slane %v5933_v13, %v5153_v34  ;;  %v7078_v25 = vrot.slane %v6417_v55, 6  ;;  %p4593_p11 = pneg %p4592_p10 }
 0x454   : > { %v4121_v9 = vadd.f32 %v4113_v32, %v4085_v24  ;;  %v7079_v54 = vrot.slane %v6415_v38, 6  ;;  %v3544_v16 = vrot.slane %v3524_v63, 2  ;;  %v3545_v43 = vrot.slane %v3528_v31, 2 }
 0x455   : > { %v4201_v47 = vrot.slane %v4061_v56, 2  ;;  %v3429_v60 = vrot.slane %v7080_v20, %v5106_v27  ;;  %v3453_v62 = vrot.slane %v7080_v20, %v5113_v30  ;;  %v3513_v55 = vrot.slane %v7080_v20, %v5153_v34  ;;  %p4600_p13 = pnand %p4599_p12, %p4593_p11 }
 0x456   : > { %v3407_v41 = vsel %vm1567_vm4, %v7079_v54, %v7078_v25  ;;  %v4173_v53 = vadd.f32 %v4159_v19, %v4121_v9  ;;  %v3960_v38 = vrot.slane %v7068_v51, %v5191_v10  ;;  %v3546_v36 = vsel %vm1288_vm3, %v3544_v16, %v3545_v43  ;;  %v7087_v19 = vld [vmem:[#allocation34_spill] sm:$0xff] }
 0x457   : > { %v6644_v26 = vadd.f32 %v3407_v41, %v6426_v50  ;;  %4209 = vst [vmem:[%s6629_s11 + $0x20] ss:$-28 sps:$4 sm:$0xc1] %v4201_v47   ;;  %v3564_v46 = vadd.f32 %v3545_v43, %v3504_v28  ;;  %v3984_v50 = vrot.slane %v7068_v51, %v5184_v4  ;;  %v3560_v1 = vadd.f32 %v3546_v36, %v3500_v42  ;;  %v7088_v41 = vld [vmem:[#allocation35_spill] sm:$0xff] }
 0x458   : > { %v4221_v15 = vrot.slane %v4173_v53, 7  ;;  %v6659_v6 = vmul.f32 %v7081_v7, %v3429_v60  ;;  %v3443_v35 = vmul.f32 %v7082_v61, %v3429_v60  ;;  %v3463_v5 = vmul.f32 %v7082_v61, %v3453_v62 }
 0x459   : > { %v3811_v2 = vmul.f32 %v6508_v59, %v3564_v46  ;;  %v3923_v12 = vmul.f32 %v6516_v52, %v3564_v46  ;;  %v4035_v44 = vmul.f32 %v6585_v21, %v3564_v46  ;;  %v4147_v40 = vmul.f32 %v4136_v3, %v3564_v46 }
 0x45a   : > { %4229 = vst [vmem:[%s6629_s11 + $0x20] sm:$0xe] %v4221_v15  ;;  %v7083_v24 = vrot.slane %v7067_v14, %v5121_v8  ;;  %v7084_v23 = vrot.slane %v7067_v14, %v5106_v27  ;;  %v3807_v29 = vmul.f32 %v6508_v59, %v3560_v1  ;;  %v7085_v48 = vrot.slane %v7067_v14, %v5153_v34 }
 0x45b   : > { %v3828_v9 = vrot.slane %v3811_v2, 6  ;;  %v7086_v28 = vrot.slane %v7067_v14, %v5155_v22  ;;  %v3919_v33 = vmul.f32 %v6516_v52, %v3560_v1  ;;  %v3940_v31 = vrot.slane %v3923_v12, 6  ;;  %v7091_v12 = vld [vmem:[#allocation13_spill] sm:$0xff] }
 0x45c   : > { %v3747_v32 = vmul.f32 %v7083_v24, %v3560_v1  ;;  %v3771_v56 = vmul.f32 %v7084_v23, %v3560_v1  ;;  %v3859_v42 = vmul.f32 %v7085_v48, %v3560_v1  ;;  %v3827_v54 = vrot.slane %v3807_v29, 6 }
 0x45d   : > { %v3883_v63 = vmul.f32 %v7086_v28, %v3560_v1  ;;  %v3939_v59 = vrot.slane %v3919_v33, 6  ;;  %v7089_v43 = vrot.slane %v7067_v14, %v5191_v10  ;;  %v7090_v60 = vrot.slane %v7067_v14, %v5184_v4 }
 0x45e   : > { %v3751_v47 = vadd.f32 %v3747_v32, %v7087_v19  ;;  %v3779_v25 = vrot.slane %v3771_v56, 3  ;;  %v3863_v53 = vadd.f32 %v3859_v42, %v7088_v41  ;;  %v3829_v52 = vsel %vm1567_vm4, %v3827_v54, %v3828_v9  ;;  %v7094_v19 = vld [vmem:[#allocation21_spill] sm:$0xff] }
 0x45f   : > { %v3891_v16 = vrot.slane %v3883_v63, 3  ;;  %v3971_v20 = vmul.f32 %v7089_v43, %v3560_v1  ;;  %v3995_v15 = vmul.f32 %v7090_v60, %v3560_v1  ;;  %v4031_v46 = vmul.f32 %v6585_v21, %v3560_v1 }
 0x460   : > { %v3787_v36 = vadd.f32 %v3779_v25, %v3751_v47  ;;  %v4052_v7 = vrot.slane %v4035_v44, 6  ;;  %v3941_v2 = vsel %vm1567_vm4, %v3939_v59, %v3940_v31  ;;  %v7092_v29 = vrot.slane %v5933_v13, %v5106_v27 }
 0x461   : > { %v3899_v61 = vadd.f32 %v3891_v16, %v3863_v53  ;;  %v3975_v24 = vadd.f32 %v3971_v20, %v7091_v12  ;;  %v4003_v32 = vrot.slane %v3995_v15, 3  ;;  %v4051_v56 = vrot.slane %v4031_v46, 6 }
 0x462   : > { %v3839_v23 = vadd.f32 %v3829_v52, %v3787_v36  ;;  %v4083_v14 = vmul.f32 %v7092_v29, %v3560_v1  ;;  %v7093_v48 = vrot.slane %v5933_v13, %v5113_v30  ;;  %v4143_v44 = vmul.f32 %v4136_v3, %v3560_v1  ;;  %v7095_v3 = vld [vmem:[#allocation20_spill] sm:$0xff] }
 0x463   : > { %v3951_v9 = vadd.f32 %v3941_v2, %v3899_v61  ;;  %v4011_v21 = vadd.f32 %v4003_v32, %v3975_v24  ;;  %v4164_v28 = vrot.slane %v4147_v40, 6  ;;  %v4053_v63 = vsel %vm1567_vm4, %v4051_v56, %v4052_v7 }
 0x464   : > { %v4107_v42 = vmul.f32 %v7093_v48, %v3560_v1  ;;  %v4087_v33 = vadd.f32 %v4083_v14, %v6574_v45  ;;  %4179 = vst [vmem:[%s6629_s11 + $0x10] sm:$0x7] %v3839_v23  ;;  %v3467_v47 = vmul.f32 %v7094_v19, %v3453_v62  ;;  %v4163_v54 = vrot.slane %v4143_v44, 6  ;;  %v7096_v45 = vld [vmem:[#allocation10_spill] sm:$0xff] }
 0x465   : > { %v4063_v25 = vadd.f32 %v4053_v63, %v4011_v21  ;;  %v4187_v41 = vrot.slane %v3951_v9, 5  ;;  %v3481_v53 = vrot.slane %v3463_v5, 1  ;;  %v3523_v59 = vmul.f32 %v7094_v19, %v3513_v55 }
 0x466   : > { %v4115_v31 = vrot.slane %v4107_v42, 3  ;;  %v3482_v16 = vrot.slane %v3467_v47, 1  ;;  %v3527_v1 = vmul.f32 %v7095_v3, %v3513_v55  ;;  %v4165_v40 = vsel %vm1567_vm4, %v4163_v54, %v4164_v28  ;;  %v7101_v42 = vld [vmem:[#allocation22_spill] sm:$0xff] }
 0x467   : > { %4195 = vst [vmem:[%s6629_s11 + $0x10] sm:$0x38] %v4187_v41  ;;  %v4203_v43 = vrot.slane %v4063_v25, 2  ;;  %v4020_v20 = vrot.slane %v7096_v45, %v5121_v8  ;;  %v4072_v62 = vrot.slane %v7096_v45, %v5106_v27  ;;  %v3541_v36 = vrot.slane %v3523_v59, 2 }
 0x468   : > { %v4123_v13 = vadd.f32 %v4115_v31, %v4087_v33  ;;  %v3483_v15 = vsel %vm1227_vm2, %v3481_v53, %v3482_v16  ;;  %v3503_v5 = vadd.f32 %v3482_v16, %v3443_v35  ;;  %v3542_v55 = vrot.slane %v3527_v1, 2  ;;  %v7099_v35 = vld [vmem:[#allocation23_spill] sm:$0xff] }
 0x469   : > { %4211 = vst [vmem:[%s6629_s11 + $0x30] ss:$-28 sps:$4 sm:$0xc1] %v4203_v43   ;;  %v3499_v52 = vadd.f32 %v3483_v15, %v6659_v6  ;;  %v4096_v46 = vrot.slane %v7096_v45, %v5113_v30  ;;  %v4132_v7 = vrot.slane %v7096_v45, %v5153_v34  ;;  %v7097_v2 = vrot.slane %v6449_v18, 6 }
 0x46a   : > { %v4175_v60 = vadd.f32 %v4165_v40, %v4123_v13  ;;  %v7098_v12 = vrot.slane %v6480_v49, 6  ;;  %v3437_v32 = vrot.slane %v7099_v35, %v5106_v27  ;;  %v3461_v6 = vrot.slane %v7099_v35, %v5113_v30  ;;  %v7100_v49 = vld [vmem:[#allocation14_spill] sm:$0xff] }
 0x46b   : > { %v3543_v23 = vsel %vm1288_vm3, %v3541_v36, %v3542_v55  ;;  %v3563_v56 = vadd.f32 %v3542_v55, %v3503_v5  ;;  %v3521_v14 = vrot.slane %v7099_v35, %v5153_v34  ;;  %v7103_v19 = vrot.slane %v7068_v51, %v5106_v27 }
 0x46c   : > { %v4223_v61 = vrot.slane %v4175_v60, 7  ;;  %v3413_v24 = vsel %vm1567_vm4, %v7098_v12, %v7097_v2  ;;  %v3559_v18 = vadd.f32 %v3543_v23, %v3499_v52  ;;  %v6735_v48 = vmul.f32 %v7100_v49, %v3437_v32 }
 0x46d   : > { %v6729_v29 = vadd.f32 %v3413_v24, %v6498_v57  ;;  %v3445_v9 = vmul.f32 %v7101_v42, %v3437_v32  ;;  %v3465_v21 = vmul.f32 %v7101_v42, %v3461_v6  ;;  %v3810_v44 = vmul.f32 %v6528_v37, %v3563_v56  ;;  %v7106_v42 = vld [vmem:[#allocation25_spill] sm:$0xff] }
 0x46e   : > { %4231 = vst [vmem:[%s6629_s11 + $0x30] sm:$0xe] %v4223_v61  ;;  %v3922_v28 = vmul.f32 %v6536_v0, %v3563_v56  ;;  %v4034_v63 = vmul.f32 %v4020_v20, %v3563_v56  ;;  %v4146_v33 = vmul.f32 %v4132_v7, %v3563_v56  ;;  %v7102_v57 = vrot.slane %v7068_v51, %v5121_v8 }
 0x46f   : > { %v3770_v47 = vmul.f32 %v7103_v19, %v3559_v18  ;;  %v3806_v25 = vmul.f32 %v6528_v37, %v3559_v18  ;;  %v7104_v54 = vrot.slane %v7068_v51, %v5153_v34  ;;  %v3825_v53 = vrot.slane %v3810_v44, 6 }
 0x470   : > { %v3746_v31 = vmul.f32 %v7102_v57, %v3559_v18  ;;  %v7105_v13 = vrot.slane %v7068_v51, %v5155_v22  ;;  %v3918_v59 = vmul.f32 %v6536_v0, %v3559_v18  ;;  %v3937_v3 = vrot.slane %v3922_v28, 6 }
 0x471   : > { %v3858_v41 = vmul.f32 %v7104_v54, %v3559_v18  ;;  %v3778_v40 = vrot.slane %v3770_v47, 3  ;;  %v3824_v43 = vrot.slane %v3806_v25, 6  ;;  %v3970_v15 = vmul.f32 %v3960_v38, %v3559_v18 }
 0x472   : > { %v3882_v16 = vmul.f32 %v7105_v13, %v3559_v18  ;;  %v3750_v1 = vadd.f32 %v3746_v31, %v6411_v17  ;;  %v3936_v37 = vrot.slane %v3918_v59, 6  ;;  %v3994_v5 = vmul.f32 %v3984_v50, %v3559_v18 }
 0x473   : > { %v3862_v45 = vadd.f32 %v3858_v41, %v6413_v11  ;;  %v3826_v0 = vsel %vm1567_vm4, %v3824_v43, %v3825_v53  ;;  %v4030_v52 = vmul.f32 %v4020_v20, %v3559_v18  ;;  %v4049_v55 = vrot.slane %v4034_v63, 6 }
 0x474   : > { %v3890_v60 = vrot.slane %v3882_v16, 3  ;;  %v3786_v36 = vadd.f32 %v3778_v40, %v3750_v1  ;;  %v3938_v61 = vsel %vm1567_vm4, %v3936_v37, %v3937_v3  ;;  %v3974_v11 = vadd.f32 %v3970_v15, %v6422_v39  ;;  %v7109_v16 = vld [vmem:[#allocation19_spill] sm:$0xff] }
 0x475   : > { %v4002_v2 = vrot.slane %v3994_v5, 3  ;;  %v4048_v24 = vrot.slane %v4030_v52, 6  ;;  %v4082_v35 = vmul.f32 %v4072_v62, %v3559_v18  ;;  %v4106_v38 = vmul.f32 %v4096_v46, %v3559_v18 }
 0x476   : > { %v3898_v17 = vadd.f32 %v3890_v60, %v3862_v45  ;;  %v3838_v12 = vadd.f32 %v3826_v0, %v3786_v36  ;;  %v4142_v51 = vmul.f32 %v4132_v7, %v3559_v18  ;;  %v4161_v50 = vrot.slane %v4146_v33, 6  ;;  %v7107_v7 = vld [vmem:[#allocation15_spill] sm:$0xff]  ;;  %v7108_v33 = vld [vmem:[#allocation30_spill] sm:$0xff] }
 0x477   : > { %v4010_v23 = vadd.f32 %v4002_v2, %v3974_v11  ;;  %v4050_v56 = vsel %vm1567_vm4, %v4048_v24, %v4049_v55  ;;  %v4086_v20 = vadd.f32 %v4082_v35, %v6644_v26  ;;  %v4114_v49 = vrot.slane %v4106_v38, 3 }
 0x478   : > { %v3950_v32 = vadd.f32 %v3938_v61, %v3898_v17  ;;  %4178 = vst [vmem:[%s6629_s11 + $0x8] sm:$0x7] %v3838_v12  ;;  %v3469_v44 = vmul.f32 %v7106_v42, %v3461_v6  ;;  %v4160_v39 = vrot.slane %v4142_v51, 6  ;;  %v3487_v57 = vrot.slane %v3465_v21, 1  ;;  %v7110_v12 = vld [vmem:[#allocation24_spill] sm:$0xff] }
 0x479   : > { %v4062_v28 = vadd.f32 %v4050_v56, %v4010_v23  ;;  %v4122_v62 = vadd.f32 %v4114_v49, %v4086_v20  ;;  %v3525_v31 = vmul.f32 %v7106_v42, %v3521_v14  ;;  %v3529_v18 = vmul.f32 %v7107_v7, %v3521_v14 }
 0x47a   : > { %v4186_v63 = vrot.slane %v3950_v32, 5  ;;  %v3488_v46 = vrot.slane %v3469_v44, 1  ;;  %v3744_v19 = vrot.slane %v7108_v33, %v5121_v8  ;;  %v3804_v26 = vrot.slane %v7108_v33, %v5113_v30 }
 0x47b   : > { %v4162_v47 = vsel %vm1567_vm4, %v4160_v39, %v4161_v50  ;;  %v4202_v6 = vrot.slane %v4062_v28, 2  ;;  %v3547_v41 = vrot.slane %v3525_v31, 2  ;;  %v3916_v53 = vrot.slane %v7108_v33, %v5173_v58  ;;  %v7112_v28 = vld [vmem:[#allocation17_spill] sm:$0xff] }
 0x47c   : > { %4194 = vst [vmem:[%s6629_s11 + $0x8] sm:$0x38] %v4186_v63  ;;  %v4174_v25 = vadd.f32 %v4162_v47, %v4122_v62  ;;  %v3489_v54 = vsel %vm1227_vm2, %v3487_v57, %v3488_v46  ;;  %v3505_v21 = vadd.f32 %v3488_v46, %v3445_v9  ;;  %v3548_v13 = vrot.slane %v3529_v18, 2 }
 0x47d   : > { %4210 = vst [vmem:[%s6629_s11 + $0x28] ss:$-28 sps:$4 sm:$0xc1] %v4202_v6   ;;  %v3501_v14 = vadd.f32 %v3489_v54, %v6735_v48  ;;  %v4028_v59 = vrot.slane %v7109_v16, %v5121_v8  ;;  %v3768_v3 = vrot.slane %v7108_v33, %v5106_v27  ;;  %v3856_v1 = vrot.slane %v7108_v33, %v5153_v34 }
 0x47e   : > { %v4222_v40 = vrot.slane %v4174_v25, 7  ;;  %v4140_v9 = vrot.slane %v7109_v16, %v5153_v34  ;;  %v3880_v58 = vrot.slane %v7108_v33, %v5155_v22  ;;  %v3549_v43 = vsel %vm1288_vm3, %v3547_v41, %v3548_v13 }
 0x47f   : > { %v3565_v48 = vadd.f32 %v3548_v13, %v3505_v21  ;;  %v3968_v45 = vrot.slane %v7108_v33, %v5191_v10  ;;  %v3561_v8 = vadd.f32 %v3549_v43, %v3501_v14  ;;  %v3992_v60 = vrot.slane %v7108_v33, %v5184_v4 }
 0x480   : > { %4230 = vst [vmem:[%s6629_s11 + $0x28] sm:$0xe] %v4222_v40  ;;  %v4080_v37 = vrot.slane %v7109_v16, %v5106_v27  ;;  %v4104_v34 = vrot.slane %v7109_v16, %v5113_v30  ;;  %v7111_v27 = vld [vmem:[#allocation16_spill] sm:$0xff] }
 0x481   : > { %v3812_v15 = vmul.f32 %v3804_v26, %v3565_v48  ;;  %v3924_v5 = vmul.f32 %v3916_v53, %v3565_v48  ;;  %v4036_v22 = vmul.f32 %v4028_v59, %v3565_v48  ;;  %v4148_v36 = vmul.f32 %v4140_v9, %v3565_v48 }
 0x482   : > { %v3748_v0 = vmul.f32 %v3744_v19, %v3561_v8  ;;  %v3772_v52 = vmul.f32 %v3768_v3, %v3561_v8  ;;  %v3808_v55 = vmul.f32 %v3804_v26, %v3561_v8  ;;  %v3860_v17 = vmul.f32 %v3856_v1, %v3561_v8 }
 0x483   : > { %v3831_v10 = vrot.slane %v3812_v15, 6  ;;  %v3884_v61 = vmul.f32 %v3880_v58, %v3561_v8  ;;  %v3920_v11 = vmul.f32 %v3916_v53, %v3561_v8  ;;  %v3943_v2 = vrot.slane %v3924_v5, 6 }
 0x484   : > { %v3752_v4 = vadd.f32 %v3748_v0, %v7110_v12  ;;  %v3780_v24 = vrot.slane %v3772_v52, 3  ;;  %v3830_v35 = vrot.slane %v3808_v55, 6  ;;  %v3864_v38 = vadd.f32 %v3860_v17, %v7111_v27 }
 0x485   : > { %v3892_v32 = vrot.slane %v3884_v61, 3  ;;  %v3942_v30 = vrot.slane %v3920_v11, 6  ;;  %v3972_v23 = vmul.f32 %v3968_v45, %v3561_v8  ;;  %v3996_v51 = vmul.f32 %v3992_v60, %v3561_v8 }
 0x486   : > { %v3788_v50 = vadd.f32 %v3780_v24, %v3752_v4  ;;  %v3832_v56 = vsel %vm1567_vm4, %v3830_v35, %v3831_v10  ;;  %v4032_v20 = vmul.f32 %v4028_v59, %v3561_v8  ;;  %v4055_v49 = vrot.slane %v4036_v22, 6 }
 0x487   : > { %v3900_v42 = vadd.f32 %v3892_v32, %v3864_v38  ;;  %v3944_v44 = vsel %vm1567_vm4, %v3942_v30, %v3943_v2  ;;  %v3976_v39 = vadd.f32 %v3972_v23, %v7112_v28  ;;  %v4004_v63 = vrot.slane %v3996_v51, 3 }
 0x488   : > { %v3840_v57 = vadd.f32 %v3832_v56, %v3788_v50  ;;  %v4054_v62 = vrot.slane %v4032_v20, 6  ;;  %v4084_v46 = vmul.f32 %v4080_v37, %v3561_v8  ;;  %v4108_v31 = vmul.f32 %v4104_v34, %v3561_v8 }
 0x489   : > { %v3952_v7 = vadd.f32 %v3944_v44, %v3900_v42  ;;  %v4012_v18 = vadd.f32 %v4004_v63, %v3976_v39  ;;  %v4144_v33 = vmul.f32 %v4140_v9, %v3561_v8  ;;  %v4167_v19 = vrot.slane %v4148_v36, 6 }
 0x48a   : > { %v4056_v26 = vsel %vm1567_vm4, %v4054_v62, %v4055_v49  ;;  %v4088_v47 = vadd.f32 %v4084_v46, %v6729_v29  ;;  %v4116_v6 = vrot.slane %v4108_v31, 3  ;;  %4180 = vst [vmem:[%s6629_s11 + $0x18] sm:$0x7] %v3840_v57 }
 0x48b   : > { %v4064_v25 = vadd.f32 %v4056_v26, %v4012_v18  ;;  %v4166_v54 = vrot.slane %v4144_v33, 6  ;;  %v4188_v21 = vrot.slane %v3952_v7, 5 }
 0x48c   : > { %v4124_v41 = vadd.f32 %v4116_v6, %v4088_v47 }
 0x48d   : > { %v4168_v53 = vsel %vm1567_vm4, %v4166_v54, %v4167_v19  ;;  %4196 = vst [vmem:[%s6629_s11 + $0x18] sm:$0x38] %v4188_v21  ;;  %v4204_v14 = vrot.slane %v4064_v25, 2 }
 0x48e   : > { %v4176_v13 = vadd.f32 %v4168_v53, %v4124_v41 }
 0x48f   : > { %4212 = vst [vmem:[%s6629_s11 + $0x38] ss:$-28 sps:$4 sm:$0xc1] %v4204_v14  }
 0x490   : > { %v4224_v29 = vrot.slane %v4176_v13, 7 }
 0x492   : > { %4232 = vst [vmem:[%s6629_s11 + $0x38] sm:$0xe] %v4224_v29 }
 0x493   : > { %4603 = shalt.err (!%p4600_p13)
}
 0x494   : > { %s4604_s18 = scalar_lea.hbm %s6818_s12, 1024  ;;  %s4608_s11 = scalar_lea.hbm %s6873_s7, 2048 }
 0x495   : > { %p4605_p1 = scmp.ne.s32.totalorder %s6818_s12, %s4604_s18  ;;  %p4609_p3 = scmp.lt.u32.totalorder %s6818_s12, %s6873_s7 }
 0x496   : > { %p4610_p4 = scmp.lt.u32.totalorder %s4608_s11, %s4604_s18  ;;  %p4612_p6 = scmp.lt.u32.totalorder %s4604_s18, %s6818_s12 }
 0x497   : > { %p4606_p2 = pnand %p4605_p1, %p7113_p9 }
 0x498   : > { %p4611_p5 = por %p4610_p4, %p4609_p3 }
 0x499   : > { %p4607_p0 = pneg %p4606_p2 }
 0x49a   : > { %p4613_p10 = por %p4612_p6, %p4611_p5 }
 0x49c   : > { %p4614_p11 = pnand %p4613_p10, %p4607_p0 }
 0x49e   : > { %4617 = shalt.err (!%p4614_p11)
}
 0x49f   : > { %s4665_s19 = smov 512   ;;  %s4666_s21 = smov 1024  }
 0x4a0   : > { %s4667_s23 = smov 32  }
 0x4a1   : > { %4445 = dma.vmem_to_hbm [thread:$0]  (%p7113_p9), %s6821_s17, 1024, %s6818_s12, %s4234_s28, %s4665_s19, %s4666_s21, %s4667_s23  }
 0x4a2 PF: > { %s4262_s22 = sand.u32 1, %s4644_s24   ;;  %p7114_p7 = scmp.ne.s32.totalorder %s6925_s14, 0 }
 0x4a3   : > { %p7115_p8 = scmp.ge.s32.totalorder %s4656_s27, 2  ;;  %s4263_s15 = scalar_lea.sflag [#allocation5], %s4262_s22 }
 0x4a5   : > { %p4448_p12 = pnand %p7115_p8, %p7114_p7 }
 0x4a7   : > { %4639 = dma.done.wait (!%p4448_p12), %s4263_s15, 1024  }
 0x4a8   : > { %4641 = vsyncadd (!%p4448_p12), %s4263_s15, 4294966272  ;;  %p20_p13 = scmp.ge.s32.totalorder %s4733_s30, 4   ;;  %s7116_s24 = smov %s4648_s25 }
 0x4a9   : > { %s7117_s25 = smov %s4652_s26  ;;  %s7118_s26 = smov %s4745_s10 }
 0x4aa   : > { %s7119_s27 = smov %s4733_s30  ;;  %22 = sbr.rel (!%p20_p13) target bundleno = 5 (0x5), region = 130 }
 0x4b1   :  { %4268 = vsyncpa [#allocation4], 1 }
 0x4b2   :  { %4270 = vsyncpa [#allocation4 + $0x1], 1 }
 0x4b3   :  { %4271 = vsyncpa [#allocation5], 1 }
 0x4b4   :  { %4273 = vsyncpa [#allocation5 + $0x1], 1 }

</bundles_post_ra>
